<compile_context>
chip_gen: v5e
topology: v5e:2x2
jax: 0.10.0
libtpu: 0.0.40
codegen_flags: <defaults>
</compile_context>

<pallas_src>
import math

import numpy as np

import jax
import jax.numpy as jnp
from jax.experimental import pallas as pl
from jax.experimental.pallas import tpu as pltpu

# ---- problem sizes (small, consistent with the module) ----------------------
B, T, N, D = 2, 8, 3, 9          # batch, history len, neighbors, per-agent feats
CTX = 16                         # context_dim
H = 32                           # hidden_dim
NUM_HEADS = 4
HEAD_DIM = H // NUM_HEADS

R = 2 * B + B * N                # live rows: ego[0:B], targ[B:2B], nbr[2B:2B+B*N]
RP = 16                          # rows padded to a sublane-tile multiple
LANE = 128                       # lane width / fused state width (4 slots of H)
GW = 4 * LANE                    # 512-wide gates: [I | F | G | O] blocks

assert D < H - 1                 # bias-indicator lane must not collide with feats
assert R <= RP and 4 * H == LANE

# ---- constant-slab lane offsets (mat_slab, bf16, shape (128, 1792)) ----------
_O_WIH = 0                       # (128, 512) fused input->gate weights (+biases)
_O_WHH = GW                      # (128, 512) fused recurrent weights
_O_PROJ = 2 * GW                 # (128, 128) q/k/v projection (slot-structured)
_O_HSC = _O_PROJ + LANE          # (128, 128) per-head score reduce * 1/sqrt(hd)
_O_EXP = _O_HSC + LANE           # (128, 128) per-head weight expand onto v lanes
_O_WC = _O_EXP + LANE            # (128, 128) context_fc weight
_O_FIN = _O_WC + LANE            # (128, 128) ego/targ/attn output blocks
_O_W4 = _O_FIN + LANE            # (128, 128) ctx output block + fused bias row
_MAT_W = _O_W4 + LANE            # 1792


# ---- Pallas kernel -----------------------------------------------------------
def csl_kernel(x_ref, ctx_ref, mat_ref, mix_ref, add_ref, out_ref, gx_ref):
    f32, bf16 = jnp.float32, jnp.bfloat16

    # ---- hoisted input projection (biases folded via indicator lanes) -------
    # Staged into a f32 VMEM scratch one (RP, GW) chunk per timestep so the
    # full (128, 512) result never lives in vregs.
    wih = mat_ref[:, _O_WIH:_O_WIH + GW]                         # bf16
    for t in range(T):
        gx_ref[t] = jnp.dot(x_ref[t * RP:(t + 1) * RP, :], wih,
                            preferred_element_type=f32)          # (RP, 512) f32

    def sigm(v):                      # single EUP push instead of exp + recip
        return 0.5 * jnp.tanh(0.5 * v) + 0.5

    # ---- fused LSTM recurrence (ego + target + neighbors in one tile) -------
    def step(t, carry):
        h, c = carry
        whh = mat_ref[:, _O_WHH:_O_WHH + GW]      # re-read per step: bounds live range
        g = gx_ref[t] + jnp.dot(h.astype(bf16), whh,
                                preferred_element_type=f32)      # (RP, 512) f32
        # gate blocks are 128-lane aligned -> whole-vreg selections, no slicing
        i_s = sigm(g[:, 0 * LANE:1 * LANE])
        f_s = sigm(g[:, 1 * LANE:2 * LANE])
        g_t = jnp.tanh(g[:, 2 * LANE:3 * LANE])
        o_s = sigm(g[:, 3 * LANE:4 * LANE])
        c = f_s * c + i_s * g_t
        h = o_s * jnp.tanh(c)
        return h, c

    h, _ = jax.lax.fori_loop(
        0, T, step,
        (jnp.zeros((RP, LANE), f32), jnp.zeros((RP, LANE), f32)),
        unroll=True)

    # ---- batched multi-head attention (block-structured matmuls) ------------
    # qkv: q at targ rows (lanes 0:H), k at nbr rows (lanes 0:H),
    #      v at nbr rows (lanes 3H:4H); everything else is exactly zero.
    qkv = jnp.dot(h.astype(bf16), mat_ref[:, _O_PROJ:_O_PROJ + LANE],
                  preferred_element_type=f32) + add_ref[0:RP, :]
    qkv_b = qkv.astype(bf16)
    q_exp = jnp.dot(mix_ref[0:RP, :], qkv_b,
                    preferred_element_type=f32)                  # q -> nbr rows
    scores = jnp.dot((q_exp * qkv).astype(bf16),
                     mat_ref[:, _O_HSC:_O_HSC + LANE],
                     preferred_element_type=f32)                 # cols 0:NUM_HEADS
    # No max-shift: scores are O(1) dot products of tanh-bounded encodings.
    # Inert (non-neighbor) rows get exp(0)=1 but their v-lanes in qkv are
    # exactly zero, so they never reach the output.
    e = jnp.exp(scores)
    denom = jnp.dot(mix_ref[RP:2 * RP, :], e.astype(bf16),
                    preferred_element_type=f32) + add_ref[RP:2 * RP, :]
    w = e * pl.reciprocal(denom, approx=True)                    # softmax over nbrs
    attn = jnp.dot(w.astype(bf16), mat_ref[:, _O_EXP:_O_EXP + LANE],
                   preferred_element_type=f32) * qkv             # weighted v (lanes 3H:4H)
    z = h + attn                                                 # slots don't collide
    zmix = jnp.dot(mix_ref[2 * RP:2 * RP + 8, :], z.astype(bf16),
                   preferred_element_type=f32)                   # (8, 128) per-batch gather

    # ---- context MLP + fused (concat- and bias-free) output head ------------
    ctx_h = jax.nn.relu(
        jnp.dot(ctx_ref[...], mat_ref[:, _O_WC:_O_WC + LANE],
                preferred_element_type=f32) + add_ref[2 * RP:2 * RP + 8, :])
    out_ref[...] = (
        jnp.dot(zmix.astype(bf16), mat_ref[:, _O_FIN:_O_FIN + LANE],
                preferred_element_type=f32)
        + jnp.dot(ctx_h.astype(bf16), mat_ref[:, _O_W4:_O_W4 + LANE],
                  preferred_element_type=f32))                   # lane-dense (8, 128)


# ---- one-time host-side constant building (numpy, runs ONCE per param set) ---
def prepare_constants(params):
    p = [np.asarray(a, dtype=np.float32) for a in params]
    (ego_wih, ego_whh, ego_bih, ego_bhh,
     tgt_wih, tgt_whh, tgt_bih, tgt_bhh,
     nbr_wih, nbr_whh, nbr_bih, nbr_bhh,
     in_proj_w, in_proj_b, out_proj_w, out_proj_b,
     ctx_w, ctx_b, out_w, out_b) = p

    # -- fused LSTM weights: block-structured (128, 512) ----------------------
    wih_big = np.zeros((LANE, GW), np.float32)
    whh_big = np.zeros((LANE, GW), np.float32)
    lstms = ((ego_wih, ego_whh, ego_bih, ego_bhh),
             (tgt_wih, tgt_whh, tgt_bih, tgt_bhh),
             (nbr_wih, nbr_whh, nbr_bih, nbr_bhh))
    for g_idx, (wih, whh, bih, bhh) in enumerate(lstms):
        s = g_idx * H
        b_comb = bih + bhh
        for q in range(4):                           # PyTorch gate order i, f, g, o
            col0 = q * LANE + s
            wih_big[s:s + D, col0:col0 + H] = wih[q * H:(q + 1) * H, :].T
            wih_big[s + H - 1, col0:col0 + H] = b_comb[q * H:(q + 1) * H]
            whh_big[s:s + H, col0:col0 + H] = whh[q * H:(q + 1) * H, :].T

    # -- attention projections (slot-structured) -------------------------------
    wq, wk, wv = in_proj_w[0:H], in_proj_w[H:2 * H], in_proj_w[2 * H:3 * H]
    bq, bk, bv = in_proj_b[0:H], in_proj_b[H:2 * H], in_proj_b[2 * H:3 * H]
    proj = np.zeros((LANE, LANE), np.float32)
    proj[H:2 * H, 0:H] = wq.T                 # targ slot -> q (lanes 0:H)
    proj[2 * H:3 * H, 0:H] = wk.T             # nbr slot  -> k (lanes 0:H)
    proj[2 * H:3 * H, 3 * H:4 * H] = wv.T     # nbr slot  -> v (lanes 3H:4H)
    pb = np.zeros((RP, LANE), np.float32)
    pb[B:2 * B, 0:H] = bq
    pb[2 * B:2 * B + B * N, 0:H] = bk
    pb[2 * B:2 * B + B * N, 3 * H:4 * H] = bv

    # -- q broadcast, per-batch softmax sum, per-batch gather, pad indicator ---
    ebc = np.zeros((RP, RP), np.float32)
    msum = np.zeros((RP, RP), np.float32)
    gfin = np.zeros((8, RP), np.float32)
    for b in range(B):
        r0 = 2 * B + b * N
        ebc[r0:r0 + N, B + b] = 1.0
        msum[r0:r0 + N, r0:r0 + N] = 1.0
        gfin[b, b] = 1.0
        gfin[b, B + b] = 1.0
        gfin[b, r0:r0 + N] = 1.0
    padind = np.zeros((RP, LANE), np.float32)
    padind[0:2 * B, :] = 1.0
    padind[2 * B + B * N:RP, :] = 1.0

    # -- per-head score reduction / weight expansion ----------------------------
    scale = 1.0 / math.sqrt(HEAD_DIM)
    hscale = np.zeros((LANE, LANE), np.float32)
    expand = np.zeros((LANE, LANE), np.float32)
    for hd in range(NUM_HEADS):
        hscale[hd * HEAD_DIM:(hd + 1) * HEAD_DIM, hd] = scale
        expand[hd, 3 * H + hd * HEAD_DIM:3 * H + (hd + 1) * HEAD_DIM] = 1.0

    # -- fused (concat-free) output projection + bias via ctx indicator lane ----
    w3 = out_w[:, 2 * H:3 * H].T                       # (H, 2) block for nbr_enc
    finw = np.zeros((LANE, LANE), np.float32)
    finw[0:H, 0:2] = out_w[:, 0:H].T                   # ego
    finw[H:2 * H, 0:2] = out_w[:, H:2 * H].T           # target
    finw[3 * H:4 * H, 0:2] = out_proj_w.T @ w3         # attn -> out_proj -> W3

    wc_pad = np.zeros((LANE, LANE), np.float32)
    wc_pad[0:CTX, 0:H] = ctx_w.T
    w4b = np.zeros((LANE, LANE), np.float32)
    w4b[0:H, 0:2] = out_w[:, 3 * H:4 * H].T            # ctx block
    w4b[LANE - 1, 0:2] = out_b + out_proj_b @ w3       # fused output bias row
    bc_add = np.zeros((8, LANE), np.float32)
    bc_add[0:B, 0:H] = ctx_b
    bc_add[0:B, LANE - 1] = 1.0                        # bias indicator, survives relu

    # -- pack into 3 slabs ------------------------------------------------------
    mat_slab = np.concatenate(
        [wih_big, whh_big, proj, hscale, expand, wc_pad, finw, w4b], axis=1)
    assert mat_slab.shape == (LANE, _MAT_W)
    mix_slab = np.concatenate([ebc, msum, gfin], axis=0)       # (40, 16)
    add_slab = np.concatenate([pb, padind, bc_add], axis=0)    # (40, 128)

    return (jnp.asarray(mat_slab, dtype=jnp.bfloat16),
            jnp.asarray(mix_slab, dtype=jnp.bfloat16),
            jnp.asarray(add_slab, dtype=jnp.float32))


# ---- per-call input layout (small; stays in the jit) --------------------------
def _build_kernel_inputs(hist_ego, hist_target, hist_others, context):
    f32 = jnp.float32
    # exact equivalent of torch .view(B*N, T, D) on a contiguous (B,T,N,D) tensor
    others_flat = hist_others.reshape(B * N, T, D)

    # time-major, group-slotted, bias-indicator lane per group
    x = jnp.zeros((T, RP, LANE), f32)
    x = x.at[:, 0:B, 0:D].set(jnp.transpose(hist_ego, (1, 0, 2)))
    x = x.at[:, 0:B, H - 1].set(1.0)
    x = x.at[:, B:2 * B, H:H + D].set(jnp.transpose(hist_target, (1, 0, 2)))
    x = x.at[:, B:2 * B, 2 * H - 1].set(1.0)
    x = x.at[:, 2 * B:2 * B + B * N, 2 * H:2 * H + D].set(
        jnp.transpose(others_flat, (1, 0, 2)))
    x = x.at[:, 2 * B:2 * B + B * N, 3 * H - 1].set(1.0)
    x_flat = x.reshape(T * RP, LANE).astype(jnp.bfloat16)

    ctx_rows = jnp.zeros((8, LANE), f32).at[0:B, 0:CTX].set(context)
    return x_flat, ctx_rows.astype(jnp.bfloat16)


@jax.jit
def _csl_forward(hist_ego, hist_target, hist_others, context,
                 mat_slab, mix_slab, add_slab):
    x_flat, ctx_rows = _build_kernel_inputs(hist_ego, hist_target, hist_others,
                                            context)
    vmem = pl.BlockSpec(memory_space=pltpu.MemorySpace.VMEM)
    # Single grid-less invocation: the whole problem is <1 MiB of VMEM.  For a
    # large real batch, widen RP (more row groups per recurrent dot) first and
    # then add a batch grid axis with dimension_semantics=("parallel",) so v7x
    # can use both TensorCores.
    out = pl.pallas_call(
        csl_kernel,
        out_shape=jax.ShapeDtypeStruct((8, LANE), jnp.float32),
        in_specs=[vmem] * 5,
        out_specs=vmem,
        scratch_shapes=[pltpu.VMEM((T, RP, GW), jnp.float32)],
    )(x_flat, ctx_rows, mat_slab, mix_slab, add_slab)
    return out[:B, :2][:, None, :]            # == pred_init.unsqueeze(1)


def contextual_social_lstm_forward(hist_ego, hist_target, hist_others,
                                   mask_others, context, consts):
    """Returns (B, pred_len=1, 2), matching the PyTorch forward."""
    del mask_others  # computed as m_last in the reference forward but never used
    return _csl_forward(hist_ego, hist_target, hist_others, context, *consts)


# ---- pure-JAX reference (PyTorch semantics, all f32) --------------------------
def reference_forward(hist_ego, hist_target, hist_others, mask_others, context, params):
    del mask_others
    (ego_wih, ego_whh, ego_bih, ego_bhh,
     tgt_wih, tgt_whh, tgt_bih, tgt_bhh,
     nbr_wih, nbr_whh, nbr_bih, nbr_bhh,
     in_proj_w, in_proj_b, out_proj_w, out_proj_b,
     ctx_w, ctx_b, out_w, out_b) = params

    def lstm_last_h(x, wih, whh, bih, bhh):
        nb = x.shape[0]
        h = jnp.zeros((nb, H), jnp.float32)
        c = jnp.zeros((nb, H), jnp.float32)
        for t in range(x.shape[1]):
            g = x[:, t, :] @ wih.T + h @ whh.T + bih + bhh
            i = jax.nn.sigmoid(g[:, 0:H])
            f = jax.nn.sigmoid(g[:, H:2 * H])
            gg = jnp.tanh(g[:, 2 * H:3 * H])
            o = jax.nn.sigmoid(g[:, 3 * H:4 * H])
            c = f * c + i * gg
            h = o * jnp.tanh(c)
        return h

    ego_enc = lstm_last_h(hist_ego, ego_wih, ego_whh, ego_bih, ego_bhh)
    targ_enc = lstm_last_h(hist_target, tgt_wih, tgt_whh, tgt_bih, tgt_bhh)
    nbr_flat = hist_others.reshape(B * N, T, D)
    nbr_h = lstm_last_h(nbr_flat, nbr_wih, nbr_whh, nbr_bih, nbr_bhh).reshape(B, N, H)

    wq, wk, wv = in_proj_w[0:H], in_proj_w[H:2 * H], in_proj_w[2 * H:3 * H]
    bq, bk, bv = in_proj_b[0:H], in_proj_b[H:2 * H], in_proj_b[2 * H:3 * H]
    q = (targ_enc @ wq.T + bq).reshape(B, NUM_HEADS, HEAD_DIM)
    k = (nbr_h @ wk.T + bk).reshape(B, N, NUM_HEADS, HEAD_DIM)
    v = (nbr_h @ wv.T + bv).reshape(B, N, NUM_HEADS, HEAD_DIM)
    scores = jnp.einsum('bhd,bnhd->bhn', q, k) / math.sqrt(HEAD_DIM)
    wts = jax.nn.softmax(scores, axis=-1)
    attn = jnp.einsum('bhn,bnhd->bhd', wts, v).reshape(B, H)
    nbr_enc = attn @ out_proj_w.T + out_proj_b

    ctx_enc = jax.nn.relu(context @ ctx_w.T + ctx_b)
    cat = jnp.concatenate([ego_enc, targ_enc, nbr_enc, ctx_enc], axis=-1)
    pred = cat @ out_w.T + out_b              # dropout identity (eval mode)
    return pred[:, None, :]


# ---- deterministic parameter construction (PyTorch layouts) -------------------
def init_params(key):
    keys = iter(jax.random.split(key, 24))

    def u(shape, scale):
        return jax.random.uniform(next(keys), shape, jnp.float32, -scale, scale)

    params = []
    k_l = 1.0 / math.sqrt(H)
    for _ in range(3):                        # ego, target, neighbor LSTMs
        params += [u((4 * H, D), k_l), u((4 * H, H), k_l),
                   u((4 * H,), k_l), u((4 * H,), k_l)]
    k_a = 1.0 / math.sqrt(H)
    params += [u((3 * H, H), k_a), u((3 * H,), k_a),      # in_proj weight / bias
               u((H, H), k_a), u((H,), k_a)]              # out_proj weight / bias
    k_c = 1.0 / math.sqrt(CTX)
    params += [u((H, CTX), k_c), u((H,), k_c)]            # context_fc
    k_o = 1.0 / math.sqrt(4 * H)
    params += [u((2, 4 * H), k_o), u((2,), k_o)]          # output_fc
    return params


if __name__ == "__main__":
    key = jax.random.PRNGKey(0)
    k1, k2, k3, k4, k5, kp = jax.random.split(key, 6)

    hist_ego = jax.random.normal(k1, (B, T, D), jnp.float32)
    hist_target = jax.random.normal(k2, (B, T, D), jnp.float32)
    hist_others = jax.random.normal(k3, (B, T, N, D), jnp.float32)
    mask_others = (jax.random.uniform(k4, (B, T, N)) > 0.3).astype(jnp.float32)
    context = jax.random.normal(k5, (B, CTX), jnp.float32)
    params = init_params(kp)

    # Constants are built ONCE per parameter set on the host (no per-call
    # scatter ops inside the jit).
    consts = prepare_constants(params)

    out = contextual_social_lstm_forward(
        hist_ego, hist_target, hist_others, mask_others, context, consts)
    out = jax.block_until_ready(out)

    ref = reference_forward(hist_ego, hist_target, hist_others, mask_others,
                            context, params)
    assert out.shape == (B, 1, 2), out.shape
    # bf16 MXU operands (per perf review) add ~1e-3..3e-3 abs noise vs the
    # all-f32 reference; a real layout/gating bug shows up as >3e-2.
    assert jnp.allclose(out, ref, atol=1e-2, rtol=0.0), (out, ref)

    print("KERNEL_OK")
</pallas_src>

<mosaic_0001>
module attributes {stable_mosaic.version = 11 : i64} {
  func.func @csl_kernel(%arg0: memref<128x128xbf16, #tpu.memory_space<vmem>>, %arg1: memref<8x128xbf16, #tpu.memory_space<vmem>>, %arg2: memref<128x1792xbf16, #tpu.memory_space<vmem>>, %arg3: memref<40x16xbf16, #tpu.memory_space<vmem>>, %arg4: memref<40x128xf32, #tpu.memory_space<vmem>>, %arg5: memref<8x128xf32, #tpu.memory_space<vmem>>, %arg6: memref<8x16x512xf32, #tpu.memory_space<vmem>>) attributes {dimension_semantics = [], scalar_prefetch = 0 : i64, scratch_operands = 1 : i64, tpu.core_type = #tpu.core_type<tc>} {
    %c0 = arith.constant 0 : index
    %c0_0 = arith.constant 0 : index
    %0 = vector.load %arg2[%c0, %c0_0] : memref<128x1792xbf16, #tpu.memory_space<vmem>>, vector<128x512xbf16>
    %c0_1 = arith.constant 0 : index
    %c0_2 = arith.constant 0 : index
    %1 = vector.load %arg0[%c0_1, %c0_2] : memref<128x128xbf16, #tpu.memory_space<vmem>>, vector<16x128xbf16>
    %cst = arith.constant dense<0.000000e+00> : vector<16x512xf32>
    %2 = tpu.matmul %1, %0, %cst {dimension_numbers = #tpu.dot_dimension_numbers<[1], [0], [0], [1], [0, 0, 1, 1], [], []>} : vector<16x128xbf16>, vector<128x512xbf16>, vector<16x512xf32> -> vector<16x512xf32>
    %c0_3 = arith.constant 0 : index
    %c0_4 = arith.constant 0 : index
    %c0_5 = arith.constant 0 : index
    %3 = vector.load %arg6[%c0_3, %c0_4, %c0_5] : memref<8x16x512xf32, #tpu.memory_space<vmem>>, vector<1x16x512xf32>
    %4 = vector.shape_cast %3 : vector<1x16x512xf32> to vector<16x512xf32>
    %5 = vector.shape_cast %2 : vector<16x512xf32> to vector<1x16x512xf32>
    tpu.vector_store %arg6[%c0_3, %c0_4, %c0_5], %5 {strides = array<i32>} : memref<8x16x512xf32, #tpu.memory_space<vmem>>, vector<1x16x512xf32>,
    %c16 = arith.constant 16 : index
    %c0_6 = arith.constant 0 : index
    %6 = vector.load %arg0[%c16, %c0_6] : memref<128x128xbf16, #tpu.memory_space<vmem>>, vector<16x128xbf16>
    %cst_7 = arith.constant dense<0.000000e+00> : vector<16x512xf32>
    %7 = tpu.matmul %6, %0, %cst_7 {dimension_numbers = #tpu.dot_dimension_numbers<[1], [0], [0], [1], [0, 0, 1, 1], [], []>} : vector<16x128xbf16>, vector<128x512xbf16>, vector<16x512xf32> -> vector<16x512xf32>
    %c1 = arith.constant 1 : index
    %c0_8 = arith.constant 0 : index
    %c0_9 = arith.constant 0 : index
    %8 = vector.load %arg6[%c1, %c0_8, %c0_9] : memref<8x16x512xf32, #tpu.memory_space<vmem>>, vector<1x16x512xf32>
    %9 = vector.shape_cast %8 : vector<1x16x512xf32> to vector<16x512xf32>
    %10 = vector.shape_cast %7 : vector<16x512xf32> to vector<1x16x512xf32>
    tpu.vector_store %arg6[%c1, %c0_8, %c0_9], %10 {strides = array<i32>} : memref<8x16x512xf32, #tpu.memory_space<vmem>>, vector<1x16x512xf32>,
    %c32 = arith.constant 32 : index
    %c0_10 = arith.constant 0 : index
    %11 = vector.load %arg0[%c32, %c0_10] : memref<128x128xbf16, #tpu.memory_space<vmem>>, vector<16x128xbf16>
    %cst_11 = arith.constant dense<0.000000e+00> : vector<16x512xf32>
    %12 = tpu.matmul %11, %0, %cst_11 {dimension_numbers = #tpu.dot_dimension_numbers<[1], [0], [0], [1], [0, 0, 1, 1], [], []>} : vector<16x128xbf16>, vector<128x512xbf16>, vector<16x512xf32> -> vector<16x512xf32>
    %c2 = arith.constant 2 : index
    %c0_12 = arith.constant 0 : index
    %c0_13 = arith.constant 0 : index
    %13 = vector.load %arg6[%c2, %c0_12, %c0_13] : memref<8x16x512xf32, #tpu.memory_space<vmem>>, vector<1x16x512xf32>
    %14 = vector.shape_cast %13 : vector<1x16x512xf32> to vector<16x512xf32>
    %15 = vector.shape_cast %12 : vector<16x512xf32> to vector<1x16x512xf32>
    tpu.vector_store %arg6[%c2, %c0_12, %c0_13], %15 {strides = array<i32>} : memref<8x16x512xf32, #tpu.memory_space<vmem>>, vector<1x16x512xf32>,
    %c48 = arith.constant 48 : index
    %c0_14 = arith.constant 0 : index
    %16 = vector.load %arg0[%c48, %c0_14] : memref<128x128xbf16, #tpu.memory_space<vmem>>, vector<16x128xbf16>
    %cst_15 = arith.constant dense<0.000000e+00> : vector<16x512xf32>
    %17 = tpu.matmul %16, %0, %cst_15 {dimension_numbers = #tpu.dot_dimension_numbers<[1], [0], [0], [1], [0, 0, 1, 1], [], []>} : vector<16x128xbf16>, vector<128x512xbf16>, vector<16x512xf32> -> vector<16x512xf32>
    %c3 = arith.constant 3 : index
    %c0_16 = arith.constant 0 : index
    %c0_17 = arith.constant 0 : index
    %18 = vector.load %arg6[%c3, %c0_16, %c0_17] : memref<8x16x512xf32, #tpu.memory_space<vmem>>, vector<1x16x512xf32>
    %19 = vector.shape_cast %18 : vector<1x16x512xf32> to vector<16x512xf32>
    %20 = vector.shape_cast %17 : vector<16x512xf32> to vector<1x16x512xf32>
    tpu.vector_store %arg6[%c3, %c0_16, %c0_17], %20 {strides = array<i32>} : memref<8x16x512xf32, #tpu.memory_space<vmem>>, vector<1x16x512xf32>,
    %c64 = arith.constant 64 : index
    %c0_18 = arith.constant 0 : index
    %21 = vector.load %arg0[%c64, %c0_18] : memref<128x128xbf16, #tpu.memory_space<vmem>>, vector<16x128xbf16>
    %cst_19 = arith.constant dense<0.000000e+00> : vector<16x512xf32>
    %22 = tpu.matmul %21, %0, %cst_19 {dimension_numbers = #tpu.dot_dimension_numbers<[1], [0], [0], [1], [0, 0, 1, 1], [], []>} : vector<16x128xbf16>, vector<128x512xbf16>, vector<16x512xf32> -> vector<16x512xf32>
    %c4 = arith.constant 4 : index
    %c0_20 = arith.constant 0 : index
    %c0_21 = arith.constant 0 : index
    %23 = vector.load %arg6[%c4, %c0_20, %c0_21] : memref<8x16x512xf32, #tpu.memory_space<vmem>>, vector<1x16x512xf32>
    %24 = vector.shape_cast %23 : vector<1x16x512xf32> to vector<16x512xf32>
    %25 = vector.shape_cast %22 : vector<16x512xf32> to vector<1x16x512xf32>
    tpu.vector_store %arg6[%c4, %c0_20, %c0_21], %25 {strides = array<i32>} : memref<8x16x512xf32, #tpu.memory_space<vmem>>, vector<1x16x512xf32>,
    %c80 = arith.constant 80 : index
    %c0_22 = arith.constant 0 : index
    %26 = vector.load %arg0[%c80, %c0_22] : memref<128x128xbf16, #tpu.memory_space<vmem>>, vector<16x128xbf16>
    %cst_23 = arith.constant dense<0.000000e+00> : vector<16x512xf32>
    %27 = tpu.matmul %26, %0, %cst_23 {dimension_numbers = #tpu.dot_dimension_numbers<[1], [0], [0], [1], [0, 0, 1, 1], [], []>} : vector<16x128xbf16>, vector<128x512xbf16>, vector<16x512xf32> -> vector<16x512xf32>
    %c5 = arith.constant 5 : index
    %c0_24 = arith.constant 0 : index
    %c0_25 = arith.constant 0 : index
    %28 = vector.load %arg6[%c5, %c0_24, %c0_25] : memref<8x16x512xf32, #tpu.memory_space<vmem>>, vector<1x16x512xf32>
    %29 = vector.shape_cast %28 : vector<1x16x512xf32> to vector<16x512xf32>
    %30 = vector.shape_cast %27 : vector<16x512xf32> to vector<1x16x512xf32>
    tpu.vector_store %arg6[%c5, %c0_24, %c0_25], %30 {strides = array<i32>} : memref<8x16x512xf32, #tpu.memory_space<vmem>>, vector<1x16x512xf32>,
    %c96 = arith.constant 96 : index
    %c0_26 = arith.constant 0 : index
    %31 = vector.load %arg0[%c96, %c0_26] : memref<128x128xbf16, #tpu.memory_space<vmem>>, vector<16x128xbf16>
    %cst_27 = arith.constant dense<0.000000e+00> : vector<16x512xf32>
    %32 = tpu.matmul %31, %0, %cst_27 {dimension_numbers = #tpu.dot_dimension_numbers<[1], [0], [0], [1], [0, 0, 1, 1], [], []>} : vector<16x128xbf16>, vector<128x512xbf16>, vector<16x512xf32> -> vector<16x512xf32>
    %c6 = arith.constant 6 : index
    %c0_28 = arith.constant 0 : index
    %c0_29 = arith.constant 0 : index
    %33 = vector.load %arg6[%c6, %c0_28, %c0_29] : memref<8x16x512xf32, #tpu.memory_space<vmem>>, vector<1x16x512xf32>
    %34 = vector.shape_cast %33 : vector<1x16x512xf32> to vector<16x512xf32>
    %35 = vector.shape_cast %32 : vector<16x512xf32> to vector<1x16x512xf32>
    tpu.vector_store %arg6[%c6, %c0_28, %c0_29], %35 {strides = array<i32>} : memref<8x16x512xf32, #tpu.memory_space<vmem>>, vector<1x16x512xf32>,
    %c112 = arith.constant 112 : index
    %c0_30 = arith.constant 0 : index
    %36 = vector.load %arg0[%c112, %c0_30] : memref<128x128xbf16, #tpu.memory_space<vmem>>, vector<16x128xbf16>
    %cst_31 = arith.constant dense<0.000000e+00> : vector<16x512xf32>
    %37 = tpu.matmul %36, %0, %cst_31 {dimension_numbers = #tpu.dot_dimension_numbers<[1], [0], [0], [1], [0, 0, 1, 1], [], []>} : vector<16x128xbf16>, vector<128x512xbf16>, vector<16x512xf32> -> vector<16x512xf32>
    %c7 = arith.constant 7 : index
    %c0_32 = arith.constant 0 : index
    %c0_33 = arith.constant 0 : index
    %38 = vector.load %arg6[%c7, %c0_32, %c0_33] : memref<8x16x512xf32, #tpu.memory_space<vmem>>, vector<1x16x512xf32>
    %39 = vector.shape_cast %38 : vector<1x16x512xf32> to vector<16x512xf32>
    %40 = vector.shape_cast %37 : vector<16x512xf32> to vector<1x16x512xf32>
    tpu.vector_store %arg6[%c7, %c0_32, %c0_33], %40 {strides = array<i32>} : memref<8x16x512xf32, #tpu.memory_space<vmem>>, vector<1x16x512xf32>,
    %cst_34 = arith.constant 0.000000e+00 : f32
    %41 = vector.broadcast %cst_34 : f32 to vector<16x128xf32>
    %cst_35 = arith.constant 0.000000e+00 : f32
    %42 = vector.broadcast %cst_35 : f32 to vector<16x128xf32>
    %c0_i32 = arith.constant 0 : i32
    %c0_36 = arith.constant 0 : index
    %c512 = arith.constant 512 : index
    %43 = vector.load %arg2[%c0_36, %c512] : memref<128x1792xbf16, #tpu.memory_space<vmem>>, vector<128x512xbf16>
    %44 = arith.index_cast %c0_i32 : i32 to index
    %c0_37 = arith.constant 0 : index
    %c0_38 = arith.constant 0 : index
    %45 = vector.load %arg6[%44, %c0_37, %c0_38] : memref<8x16x512xf32, #tpu.memory_space<vmem>>, vector<1x16x512xf32>
    %46 = vector.shape_cast %45 : vector<1x16x512xf32> to vector<16x512xf32>
    %47 = arith.truncf %41 : vector<16x128xf32> to vector<16x128xbf16>
    %cst_39 = arith.constant dense<0.000000e+00> : vector<16x512xf32>
    %48 = tpu.matmul %47, %43, %cst_39 {dimension_numbers = #tpu.dot_dimension_numbers<[1], [0], [0], [1], [0, 0, 1, 1], [], []>} : vector<16x128xbf16>, vector<128x512xbf16>, vector<16x512xf32> -> vector<16x512xf32>
    %49 = arith.addf %46, %48 : vector<16x512xf32>
    %50 = vector.extract_strided_slice %49 {offsets = [0, 0], sizes = [16, 128], strides = [1, 1]} : vector<16x512xf32> to vector<16x128xf32>
    %cst_40 = arith.constant 5.000000e-01 : f32
    %51 = vector.broadcast %cst_40 : f32 to vector<16x128xf32>
    %52 = arith.mulf %51, %50 : vector<16x128xf32>
    %53 = math.tanh %52 : vector<16x128xf32>
    %cst_41 = arith.constant 5.000000e-01 : f32
    %54 = vector.broadcast %cst_41 : f32 to vector<16x128xf32>
    %55 = arith.mulf %54, %53 : vector<16x128xf32>
    %cst_42 = arith.constant 5.000000e-01 : f32
    %56 = vector.broadcast %cst_42 : f32 to vector<16x128xf32>
    %57 = arith.addf %55, %56 : vector<16x128xf32>
    %58 = vector.extract_strided_slice %49 {offsets = [0, 128], sizes = [16, 128], strides = [1, 1]} : vector<16x512xf32> to vector<16x128xf32>
    %cst_43 = arith.constant 5.000000e-01 : f32
    %59 = vector.broadcast %cst_43 : f32 to vector<16x128xf32>
    %60 = arith.mulf %59, %58 : vector<16x128xf32>
    %61 = math.tanh %60 : vector<16x128xf32>
    %cst_44 = arith.constant 5.000000e-01 : f32
    %62 = vector.broadcast %cst_44 : f32 to vector<16x128xf32>
    %63 = arith.mulf %62, %61 : vector<16x128xf32>
    %cst_45 = arith.constant 5.000000e-01 : f32
    %64 = vector.broadcast %cst_45 : f32 to vector<16x128xf32>
    %65 = arith.addf %63, %64 : vector<16x128xf32>
    %66 = vector.extract_strided_slice %49 {offsets = [0, 256], sizes = [16, 128], strides = [1, 1]} : vector<16x512xf32> to vector<16x128xf32>
    %67 = math.tanh %66 : vector<16x128xf32>
    %68 = vector.extract_strided_slice %49 {offsets = [0, 384], sizes = [16, 128], strides = [1, 1]} : vector<16x512xf32> to vector<16x128xf32>
    %cst_46 = arith.constant 5.000000e-01 : f32
    %69 = vector.broadcast %cst_46 : f32 to vector<16x128xf32>
    %70 = arith.mulf %69, %68 : vector<16x128xf32>
    %71 = math.tanh %70 : vector<16x128xf32>
    %cst_47 = arith.constant 5.000000e-01 : f32
    %72 = vector.broadcast %cst_47 : f32 to vector<16x128xf32>
    %73 = arith.mulf %72, %71 : vector<16x128xf32>
    %cst_48 = arith.constant 5.000000e-01 : f32
    %74 = vector.broadcast %cst_48 : f32 to vector<16x128xf32>
    %75 = arith.addf %73, %74 : vector<16x128xf32>
    %76 = arith.mulf %65, %42 : vector<16x128xf32>
    %77 = arith.mulf %57, %67 : vector<16x128xf32>
    %78 = arith.addf %76, %77 : vector<16x128xf32>
    %79 = math.tanh %78 : vector<16x128xf32>
    %80 = arith.mulf %75, %79 : vector<16x128xf32>
    %c1_i32 = arith.constant 1 : i32
    %c0_49 = arith.constant 0 : index
    %c512_50 = arith.constant 512 : index
    %81 = vector.load %arg2[%c0_49, %c512_50] : memref<128x1792xbf16, #tpu.memory_space<vmem>>, vector<128x512xbf16>
    %82 = arith.index_cast %c1_i32 : i32 to index
    %c0_51 = arith.constant 0 : index
    %c0_52 = arith.constant 0 : index
    %83 = vector.load %arg6[%82, %c0_51, %c0_52] : memref<8x16x512xf32, #tpu.memory_space<vmem>>, vector<1x16x512xf32>
    %84 = vector.shape_cast %83 : vector<1x16x512xf32> to vector<16x512xf32>
    %85 = arith.truncf %80 : vector<16x128xf32> to vector<16x128xbf16>
    %cst_53 = arith.constant dense<0.000000e+00> : vector<16x512xf32>
    %86 = tpu.matmul %85, %81, %cst_53 {dimension_numbers = #tpu.dot_dimension_numbers<[1], [0], [0], [1], [0, 0, 1, 1], [], []>} : vector<16x128xbf16>, vector<128x512xbf16>, vector<16x512xf32> -> vector<16x512xf32>
    %87 = arith.addf %84, %86 : vector<16x512xf32>
    %88 = vector.extract_strided_slice %87 {offsets = [0, 0], sizes = [16, 128], strides = [1, 1]} : vector<16x512xf32> to vector<16x128xf32>
    %cst_54 = arith.constant 5.000000e-01 : f32
    %89 = vector.broadcast %cst_54 : f32 to vector<16x128xf32>
    %90 = arith.mulf %89, %88 : vector<16x128xf32>
    %91 = math.tanh %90 : vector<16x128xf32>
    %cst_55 = arith.constant 5.000000e-01 : f32
    %92 = vector.broadcast %cst_55 : f32 to vector<16x128xf32>
    %93 = arith.mulf %92, %91 : vector<16x128xf32>
    %cst_56 = arith.constant 5.000000e-01 : f32
    %94 = vector.broadcast %cst_56 : f32 to vector<16x128xf32>
    %95 = arith.addf %93, %94 : vector<16x128xf32>
    %96 = vector.extract_strided_slice %87 {offsets = [0, 128], sizes = [16, 128], strides = [1, 1]} : vector<16x512xf32> to vector<16x128xf32>
    %cst_57 = arith.constant 5.000000e-01 : f32
    %97 = vector.broadcast %cst_57 : f32 to vector<16x128xf32>
    %98 = arith.mulf %97, %96 : vector<16x128xf32>
    %99 = math.tanh %98 : vector<16x128xf32>
    %cst_58 = arith.constant 5.000000e-01 : f32
    %100 = vector.broadcast %cst_58 : f32 to vector<16x128xf32>
    %101 = arith.mulf %100, %99 : vector<16x128xf32>
    %cst_59 = arith.constant 5.000000e-01 : f32
    %102 = vector.broadcast %cst_59 : f32 to vector<16x128xf32>
    %103 = arith.addf %101, %102 : vector<16x128xf32>
    %104 = vector.extract_strided_slice %87 {offsets = [0, 256], sizes = [16, 128], strides = [1, 1]} : vector<16x512xf32> to vector<16x128xf32>
    %105 = math.tanh %104 : vector<16x128xf32>
    %106 = vector.extract_strided_slice %87 {offsets = [0, 384], sizes = [16, 128], strides = [1, 1]} : vector<16x512xf32> to vector<16x128xf32>
    %cst_60 = arith.constant 5.000000e-01 : f32
    %107 = vector.broadcast %cst_60 : f32 to vector<16x128xf32>
    %108 = arith.mulf %107, %106 : vector<16x128xf32>
    %109 = math.tanh %108 : vector<16x128xf32>
    %cst_61 = arith.constant 5.000000e-01 : f32
    %110 = vector.broadcast %cst_61 : f32 to vector<16x128xf32>
    %111 = arith.mulf %110, %109 : vector<16x128xf32>
    %cst_62 = arith.constant 5.000000e-01 : f32
    %112 = vector.broadcast %cst_62 : f32 to vector<16x128xf32>
    %113 = arith.addf %111, %112 : vector<16x128xf32>
    %114 = arith.mulf %103, %78 : vector<16x128xf32>
    %115 = arith.mulf %95, %105 : vector<16x128xf32>
    %116 = arith.addf %114, %115 : vector<16x128xf32>
    %117 = math.tanh %116 : vector<16x128xf32>
    %118 = arith.mulf %113, %117 : vector<16x128xf32>
    %c2_i32 = arith.constant 2 : i32
    %c0_63 = arith.constant 0 : index
    %c512_64 = arith.constant 512 : index
    %119 = vector.load %arg2[%c0_63, %c512_64] : memref<128x1792xbf16, #tpu.memory_space<vmem>>, vector<128x512xbf16>
    %120 = arith.index_cast %c2_i32 : i32 to index
    %c0_65 = arith.constant 0 : index
    %c0_66 = arith.constant 0 : index
    %121 = vector.load %arg6[%120, %c0_65, %c0_66] : memref<8x16x512xf32, #tpu.memory_space<vmem>>, vector<1x16x512xf32>
    %122 = vector.shape_cast %121 : vector<1x16x512xf32> to vector<16x512xf32>
    %123 = arith.truncf %118 : vector<16x128xf32> to vector<16x128xbf16>
    %cst_67 = arith.constant dense<0.000000e+00> : vector<16x512xf32>
    %124 = tpu.matmul %123, %119, %cst_67 {dimension_numbers = #tpu.dot_dimension_numbers<[1], [0], [0], [1], [0, 0, 1, 1], [], []>} : vector<16x128xbf16>, vector<128x512xbf16>, vector<16x512xf32> -> vector<16x512xf32>
    %125 = arith.addf %122, %124 : vector<16x512xf32>
    %126 = vector.extract_strided_slice %125 {offsets = [0, 0], sizes = [16, 128], strides = [1, 1]} : vector<16x512xf32> to vector<16x128xf32>
    %cst_68 = arith.constant 5.000000e-01 : f32
    %127 = vector.broadcast %cst_68 : f32 to vector<16x128xf32>
    %128 = arith.mulf %127, %126 : vector<16x128xf32>
    %129 = math.tanh %128 : vector<16x128xf32>
    %cst_69 = arith.constant 5.000000e-01 : f32
    %130 = vector.broadcast %cst_69 : f32 to vector<16x128xf32>
    %131 = arith.mulf %130, %129 : vector<16x128xf32>
    %cst_70 = arith.constant 5.000000e-01 : f32
    %132 = vector.broadcast %cst_70 : f32 to vector<16x128xf32>
    %133 = arith.addf %131, %132 : vector<16x128xf32>
    %134 = vector.extract_strided_slice %125 {offsets = [0, 128], sizes = [16, 128], strides = [1, 1]} : vector<16x512xf32> to vector<16x128xf32>
    %cst_71 = arith.constant 5.000000e-01 : f32
    %135 = vector.broadcast %cst_71 : f32 to vector<16x128xf32>
    %136 = arith.mulf %135, %134 : vector<16x128xf32>
    %137 = math.tanh %136 : vector<16x128xf32>
    %cst_72 = arith.constant 5.000000e-01 : f32
    %138 = vector.broadcast %cst_72 : f32 to vector<16x128xf32>
    %139 = arith.mulf %138, %137 : vector<16x128xf32>
    %cst_73 = arith.constant 5.000000e-01 : f32
    %140 = vector.broadcast %cst_73 : f32 to vector<16x128xf32>
    %141 = arith.addf %139, %140 : vector<16x128xf32>
    %142 = vector.extract_strided_slice %125 {offsets = [0, 256], sizes = [16, 128], strides = [1, 1]} : vector<16x512xf32> to vector<16x128xf32>
    %143 = math.tanh %142 : vector<16x128xf32>
    %144 = vector.extract_strided_slice %125 {offsets = [0, 384], sizes = [16, 128], strides = [1, 1]} : vector<16x512xf32> to vector<16x128xf32>
    %cst_74 = arith.constant 5.000000e-01 : f32
    %145 = vector.broadcast %cst_74 : f32 to vector<16x128xf32>
    %146 = arith.mulf %145, %144 : vector<16x128xf32>
    %147 = math.tanh %146 : vector<16x128xf32>
    %cst_75 = arith.constant 5.000000e-01 : f32
    %148 = vector.broadcast %cst_75 : f32 to vector<16x128xf32>
    %149 = arith.mulf %148, %147 : vector<16x128xf32>
    %cst_76 = arith.constant 5.000000e-01 : f32
    %150 = vector.broadcast %cst_76 : f32 to vector<16x128xf32>
    %151 = arith.addf %149, %150 : vector<16x128xf32>
    %152 = arith.mulf %141, %116 : vector<16x128xf32>
    %153 = arith.mulf %133, %143 : vector<16x128xf32>
    %154 = arith.addf %152, %153 : vector<16x128xf32>
    %155 = math.tanh %154 : vector<16x128xf32>
    %156 = arith.mulf %151, %155 : vector<16x128xf32>
    %c3_i32 = arith.constant 3 : i32
    %c0_77 = arith.constant 0 : index
    %c512_78 = arith.constant 512 : index
    %157 = vector.load %arg2[%c0_77, %c512_78] : memref<128x1792xbf16, #tpu.memory_space<vmem>>, vector<128x512xbf16>
    %158 = arith.index_cast %c3_i32 : i32 to index
    %c0_79 = arith.constant 0 : index
    %c0_80 = arith.constant 0 : index
    %159 = vector.load %arg6[%158, %c0_79, %c0_80] : memref<8x16x512xf32, #tpu.memory_space<vmem>>, vector<1x16x512xf32>
    %160 = vector.shape_cast %159 : vector<1x16x512xf32> to vector<16x512xf32>
    %161 = arith.truncf %156 : vector<16x128xf32> to vector<16x128xbf16>
    %cst_81 = arith.constant dense<0.000000e+00> : vector<16x512xf32>
    %162 = tpu.matmul %161, %157, %cst_81 {dimension_numbers = #tpu.dot_dimension_numbers<[1], [0], [0], [1], [0, 0, 1, 1], [], []>} : vector<16x128xbf16>, vector<128x512xbf16>, vector<16x512xf32> -> vector<16x512xf32>
    %163 = arith.addf %160, %162 : vector<16x512xf32>
    %164 = vector.extract_strided_slice %163 {offsets = [0, 0], sizes = [16, 128], strides = [1, 1]} : vector<16x512xf32> to vector<16x128xf32>
    %cst_82 = arith.constant 5.000000e-01 : f32
    %165 = vector.broadcast %cst_82 : f32 to vector<16x128xf32>
    %166 = arith.mulf %165, %164 : vector<16x128xf32>
    %167 = math.tanh %166 : vector<16x128xf32>
    %cst_83 = arith.constant 5.000000e-01 : f32
    %168 = vector.broadcast %cst_83 : f32 to vector<16x128xf32>
    %169 = arith.mulf %168, %167 : vector<16x128xf32>
    %cst_84 = arith.constant 5.000000e-01 : f32
    %170 = vector.broadcast %cst_84 : f32 to vector<16x128xf32>
    %171 = arith.addf %169, %170 : vector<16x128xf32>
    %172 = vector.extract_strided_slice %163 {offsets = [0, 128], sizes = [16, 128], strides = [1, 1]} : vector<16x512xf32> to vector<16x128xf32>
    %cst_85 = arith.constant 5.000000e-01 : f32
    %173 = vector.broadcast %cst_85 : f32 to vector<16x128xf32>
    %174 = arith.mulf %173, %172 : vector<16x128xf32>
    %175 = math.tanh %174 : vector<16x128xf32>
    %cst_86 = arith.constant 5.000000e-01 : f32
    %176 = vector.broadcast %cst_86 : f32 to vector<16x128xf32>
    %177 = arith.mulf %176, %175 : vector<16x128xf32>
    %cst_87 = arith.constant 5.000000e-01 : f32
    %178 = vector.broadcast %cst_87 : f32 to vector<16x128xf32>
    %179 = arith.addf %177, %178 : vector<16x128xf32>
    %180 = vector.extract_strided_slice %163 {offsets = [0, 256], sizes = [16, 128], strides = [1, 1]} : vector<16x512xf32> to vector<16x128xf32>
    %181 = math.tanh %180 : vector<16x128xf32>
    %182 = vector.extract_strided_slice %163 {offsets = [0, 384], sizes = [16, 128], strides = [1, 1]} : vector<16x512xf32> to vector<16x128xf32>
    %cst_88 = arith.constant 5.000000e-01 : f32
    %183 = vector.broadcast %cst_88 : f32 to vector<16x128xf32>
    %184 = arith.mulf %183, %182 : vector<16x128xf32>
    %185 = math.tanh %184 : vector<16x128xf32>
    %cst_89 = arith.constant 5.000000e-01 : f32
    %186 = vector.broadcast %cst_89 : f32 to vector<16x128xf32>
    %187 = arith.mulf %186, %185 : vector<16x128xf32>
    %cst_90 = arith.constant 5.000000e-01 : f32
    %188 = vector.broadcast %cst_90 : f32 to vector<16x128xf32>
    %189 = arith.addf %187, %188 : vector<16x128xf32>
    %190 = arith.mulf %179, %154 : vector<16x128xf32>
    %191 = arith.mulf %171, %181 : vector<16x128xf32>
    %192 = arith.addf %190, %191 : vector<16x128xf32>
    %193 = math.tanh %192 : vector<16x128xf32>
    %194 = arith.mulf %189, %193 : vector<16x128xf32>
    %c4_i32 = arith.constant 4 : i32
    %c0_91 = arith.constant 0 : index
    %c512_92 = arith.constant 512 : index
    %195 = vector.load %arg2[%c0_91, %c512_92] : memref<128x1792xbf16, #tpu.memory_space<vmem>>, vector<128x512xbf16>
    %196 = arith.index_cast %c4_i32 : i32 to index
    %c0_93 = arith.constant 0 : index
    %c0_94 = arith.constant 0 : index
    %197 = vector.load %arg6[%196, %c0_93, %c0_94] : memref<8x16x512xf32, #tpu.memory_space<vmem>>, vector<1x16x512xf32>
    %198 = vector.shape_cast %197 : vector<1x16x512xf32> to vector<16x512xf32>
    %199 = arith.truncf %194 : vector<16x128xf32> to vector<16x128xbf16>
    %cst_95 = arith.constant dense<0.000000e+00> : vector<16x512xf32>
    %200 = tpu.matmul %199, %195, %cst_95 {dimension_numbers = #tpu.dot_dimension_numbers<[1], [0], [0], [1], [0, 0, 1, 1], [], []>} : vector<16x128xbf16>, vector<128x512xbf16>, vector<16x512xf32> -> vector<16x512xf32>
    %201 = arith.addf %198, %200 : vector<16x512xf32>
    %202 = vector.extract_strided_slice %201 {offsets = [0, 0], sizes = [16, 128], strides = [1, 1]} : vector<16x512xf32> to vector<16x128xf32>
    %cst_96 = arith.constant 5.000000e-01 : f32
    %203 = vector.broadcast %cst_96 : f32 to vector<16x128xf32>
    %204 = arith.mulf %203, %202 : vector<16x128xf32>
    %205 = math.tanh %204 : vector<16x128xf32>
    %cst_97 = arith.constant 5.000000e-01 : f32
    %206 = vector.broadcast %cst_97 : f32 to vector<16x128xf32>
    %207 = arith.mulf %206, %205 : vector<16x128xf32>
    %cst_98 = arith.constant 5.000000e-01 : f32
    %208 = vector.broadcast %cst_98 : f32 to vector<16x128xf32>
    %209 = arith.addf %207, %208 : vector<16x128xf32>
    %210 = vector.extract_strided_slice %201 {offsets = [0, 128], sizes = [16, 128], strides = [1, 1]} : vector<16x512xf32> to vector<16x128xf32>
    %cst_99 = arith.constant 5.000000e-01 : f32
    %211 = vector.broadcast %cst_99 : f32 to vector<16x128xf32>
    %212 = arith.mulf %211, %210 : vector<16x128xf32>
    %213 = math.tanh %212 : vector<16x128xf32>
    %cst_100 = arith.constant 5.000000e-01 : f32
    %214 = vector.broadcast %cst_100 : f32 to vector<16x128xf32>
    %215 = arith.mulf %214, %213 : vector<16x128xf32>
    %cst_101 = arith.constant 5.000000e-01 : f32
    %216 = vector.broadcast %cst_101 : f32 to vector<16x128xf32>
    %217 = arith.addf %215, %216 : vector<16x128xf32>
    %218 = vector.extract_strided_slice %201 {offsets = [0, 256], sizes = [16, 128], strides = [1, 1]} : vector<16x512xf32> to vector<16x128xf32>
    %219 = math.tanh %218 : vector<16x128xf32>
    %220 = vector.extract_strided_slice %201 {offsets = [0, 384], sizes = [16, 128], strides = [1, 1]} : vector<16x512xf32> to vector<16x128xf32>
    %cst_102 = arith.constant 5.000000e-01 : f32
    %221 = vector.broadcast %cst_102 : f32 to vector<16x128xf32>
    %222 = arith.mulf %221, %220 : vector<16x128xf32>
    %223 = math.tanh %222 : vector<16x128xf32>
    %cst_103 = arith.constant 5.000000e-01 : f32
    %224 = vector.broadcast %cst_103 : f32 to vector<16x128xf32>
    %225 = arith.mulf %224, %223 : vector<16x128xf32>
    %cst_104 = arith.constant 5.000000e-01 : f32
    %226 = vector.broadcast %cst_104 : f32 to vector<16x128xf32>
    %227 = arith.addf %225, %226 : vector<16x128xf32>
    %228 = arith.mulf %217, %192 : vector<16x128xf32>
    %229 = arith.mulf %209, %219 : vector<16x128xf32>
    %230 = arith.addf %228, %229 : vector<16x128xf32>
    %231 = math.tanh %230 : vector<16x128xf32>
    %232 = arith.mulf %227, %231 : vector<16x128xf32>
    %c5_i32 = arith.constant 5 : i32
    %c0_105 = arith.constant 0 : index
    %c512_106 = arith.constant 512 : index
    %233 = vector.load %arg2[%c0_105, %c512_106] : memref<128x1792xbf16, #tpu.memory_space<vmem>>, vector<128x512xbf16>
    %234 = arith.index_cast %c5_i32 : i32 to index
    %c0_107 = arith.constant 0 : index
    %c0_108 = arith.constant 0 : index
    %235 = vector.load %arg6[%234, %c0_107, %c0_108] : memref<8x16x512xf32, #tpu.memory_space<vmem>>, vector<1x16x512xf32>
    %236 = vector.shape_cast %235 : vector<1x16x512xf32> to vector<16x512xf32>
    %237 = arith.truncf %232 : vector<16x128xf32> to vector<16x128xbf16>
    %cst_109 = arith.constant dense<0.000000e+00> : vector<16x512xf32>
    %238 = tpu.matmul %237, %233, %cst_109 {dimension_numbers = #tpu.dot_dimension_numbers<[1], [0], [0], [1], [0, 0, 1, 1], [], []>} : vector<16x128xbf16>, vector<128x512xbf16>, vector<16x512xf32> -> vector<16x512xf32>
    %239 = arith.addf %236, %238 : vector<16x512xf32>
    %240 = vector.extract_strided_slice %239 {offsets = [0, 0], sizes = [16, 128], strides = [1, 1]} : vector<16x512xf32> to vector<16x128xf32>
    %cst_110 = arith.constant 5.000000e-01 : f32
    %241 = vector.broadcast %cst_110 : f32 to vector<16x128xf32>
    %242 = arith.mulf %241, %240 : vector<16x128xf32>
    %243 = math.tanh %242 : vector<16x128xf32>
    %cst_111 = arith.constant 5.000000e-01 : f32
    %244 = vector.broadcast %cst_111 : f32 to vector<16x128xf32>
    %245 = arith.mulf %244, %243 : vector<16x128xf32>
    %cst_112 = arith.constant 5.000000e-01 : f32
    %246 = vector.broadcast %cst_112 : f32 to vector<16x128xf32>
    %247 = arith.addf %245, %246 : vector<16x128xf32>
    %248 = vector.extract_strided_slice %239 {offsets = [0, 128], sizes = [16, 128], strides = [1, 1]} : vector<16x512xf32> to vector<16x128xf32>
    %cst_113 = arith.constant 5.000000e-01 : f32
    %249 = vector.broadcast %cst_113 : f32 to vector<16x128xf32>
    %250 = arith.mulf %249, %248 : vector<16x128xf32>
    %251 = math.tanh %250 : vector<16x128xf32>
    %cst_114 = arith.constant 5.000000e-01 : f32
    %252 = vector.broadcast %cst_114 : f32 to vector<16x128xf32>
    %253 = arith.mulf %252, %251 : vector<16x128xf32>
    %cst_115 = arith.constant 5.000000e-01 : f32
    %254 = vector.broadcast %cst_115 : f32 to vector<16x128xf32>
    %255 = arith.addf %253, %254 : vector<16x128xf32>
    %256 = vector.extract_strided_slice %239 {offsets = [0, 256], sizes = [16, 128], strides = [1, 1]} : vector<16x512xf32> to vector<16x128xf32>
    %257 = math.tanh %256 : vector<16x128xf32>
    %258 = vector.extract_strided_slice %239 {offsets = [0, 384], sizes = [16, 128], strides = [1, 1]} : vector<16x512xf32> to vector<16x128xf32>
    %cst_116 = arith.constant 5.000000e-01 : f32
    %259 = vector.broadcast %cst_116 : f32 to vector<16x128xf32>
    %260 = arith.mulf %259, %258 : vector<16x128xf32>
    %261 = math.tanh %260 : vector<16x128xf32>
    %cst_117 = arith.constant 5.000000e-01 : f32
    %262 = vector.broadcast %cst_117 : f32 to vector<16x128xf32>
    %263 = arith.mulf %262, %261 : vector<16x128xf32>
    %cst_118 = arith.constant 5.000000e-01 : f32
    %264 = vector.broadcast %cst_118 : f32 to vector<16x128xf32>
    %265 = arith.addf %263, %264 : vector<16x128xf32>
    %266 = arith.mulf %255, %230 : vector<16x128xf32>
    %267 = arith.mulf %247, %257 : vector<16x128xf32>
    %268 = arith.addf %266, %267 : vector<16x128xf32>
    %269 = math.tanh %268 : vector<16x128xf32>
    %270 = arith.mulf %265, %269 : vector<16x128xf32>
    %c6_i32 = arith.constant 6 : i32
    %c0_119 = arith.constant 0 : index
    %c512_120 = arith.constant 512 : index
    %271 = vector.load %arg2[%c0_119, %c512_120] : memref<128x1792xbf16, #tpu.memory_space<vmem>>, vector<128x512xbf16>
    %272 = arith.index_cast %c6_i32 : i32 to index
    %c0_121 = arith.constant 0 : index
    %c0_122 = arith.constant 0 : index
    %273 = vector.load %arg6[%272, %c0_121, %c0_122] : memref<8x16x512xf32, #tpu.memory_space<vmem>>, vector<1x16x512xf32>
    %274 = vector.shape_cast %273 : vector<1x16x512xf32> to vector<16x512xf32>
    %275 = arith.truncf %270 : vector<16x128xf32> to vector<16x128xbf16>
    %cst_123 = arith.constant dense<0.000000e+00> : vector<16x512xf32>
    %276 = tpu.matmul %275, %271, %cst_123 {dimension_numbers = #tpu.dot_dimension_numbers<[1], [0], [0], [1], [0, 0, 1, 1], [], []>} : vector<16x128xbf16>, vector<128x512xbf16>, vector<16x512xf32> -> vector<16x512xf32>
    %277 = arith.addf %274, %276 : vector<16x512xf32>
    %278 = vector.extract_strided_slice %277 {offsets = [0, 0], sizes = [16, 128], strides = [1, 1]} : vector<16x512xf32> to vector<16x128xf32>
    %cst_124 = arith.constant 5.000000e-01 : f32
    %279 = vector.broadcast %cst_124 : f32 to vector<16x128xf32>
    %280 = arith.mulf %279, %278 : vector<16x128xf32>
    %281 = math.tanh %280 : vector<16x128xf32>
    %cst_125 = arith.constant 5.000000e-01 : f32
    %282 = vector.broadcast %cst_125 : f32 to vector<16x128xf32>
    %283 = arith.mulf %282, %281 : vector<16x128xf32>
    %cst_126 = arith.constant 5.000000e-01 : f32
    %284 = vector.broadcast %cst_126 : f32 to vector<16x128xf32>
    %285 = arith.addf %283, %284 : vector<16x128xf32>
    %286 = vector.extract_strided_slice %277 {offsets = [0, 128], sizes = [16, 128], strides = [1, 1]} : vector<16x512xf32> to vector<16x128xf32>
    %cst_127 = arith.constant 5.000000e-01 : f32
    %287 = vector.broadcast %cst_127 : f32 to vector<16x128xf32>
    %288 = arith.mulf %287, %286 : vector<16x128xf32>
    %289 = math.tanh %288 : vector<16x128xf32>
    %cst_128 = arith.constant 5.000000e-01 : f32
    %290 = vector.broadcast %cst_128 : f32 to vector<16x128xf32>
    %291 = arith.mulf %290, %289 : vector<16x128xf32>
    %cst_129 = arith.constant 5.000000e-01 : f32
    %292 = vector.broadcast %cst_129 : f32 to vector<16x128xf32>
    %293 = arith.addf %291, %292 : vector<16x128xf32>
    %294 = vector.extract_strided_slice %277 {offsets = [0, 256], sizes = [16, 128], strides = [1, 1]} : vector<16x512xf32> to vector<16x128xf32>
    %295 = math.tanh %294 : vector<16x128xf32>
    %296 = vector.extract_strided_slice %277 {offsets = [0, 384], sizes = [16, 128], strides = [1, 1]} : vector<16x512xf32> to vector<16x128xf32>
    %cst_130 = arith.constant 5.000000e-01 : f32
    %297 = vector.broadcast %cst_130 : f32 to vector<16x128xf32>
    %298 = arith.mulf %297, %296 : vector<16x128xf32>
    %299 = math.tanh %298 : vector<16x128xf32>
    %cst_131 = arith.constant 5.000000e-01 : f32
    %300 = vector.broadcast %cst_131 : f32 to vector<16x128xf32>
    %301 = arith.mulf %300, %299 : vector<16x128xf32>
    %cst_132 = arith.constant 5.000000e-01 : f32
    %302 = vector.broadcast %cst_132 : f32 to vector<16x128xf32>
    %303 = arith.addf %301, %302 : vector<16x128xf32>
    %304 = arith.mulf %293, %268 : vector<16x128xf32>
    %305 = arith.mulf %285, %295 : vector<16x128xf32>
    %306 = arith.addf %304, %305 : vector<16x128xf32>
    %307 = math.tanh %306 : vector<16x128xf32>
    %308 = arith.mulf %303, %307 : vector<16x128xf32>
    %c7_i32 = arith.constant 7 : i32
    %c0_133 = arith.constant 0 : index
    %c512_134 = arith.constant 512 : index
    %309 = vector.load %arg2[%c0_133, %c512_134] : memref<128x1792xbf16, #tpu.memory_space<vmem>>, vector<128x512xbf16>
    %310 = arith.index_cast %c7_i32 : i32 to index
    %c0_135 = arith.constant 0 : index
    %c0_136 = arith.constant 0 : index
    %311 = vector.load %arg6[%310, %c0_135, %c0_136] : memref<8x16x512xf32, #tpu.memory_space<vmem>>, vector<1x16x512xf32>
    %312 = vector.shape_cast %311 : vector<1x16x512xf32> to vector<16x512xf32>
    %313 = arith.truncf %308 : vector<16x128xf32> to vector<16x128xbf16>
    %cst_137 = arith.constant dense<0.000000e+00> : vector<16x512xf32>
    %314 = tpu.matmul %313, %309, %cst_137 {dimension_numbers = #tpu.dot_dimension_numbers<[1], [0], [0], [1], [0, 0, 1, 1], [], []>} : vector<16x128xbf16>, vector<128x512xbf16>, vector<16x512xf32> -> vector<16x512xf32>
    %315 = arith.addf %312, %314 : vector<16x512xf32>
    %316 = vector.extract_strided_slice %315 {offsets = [0, 0], sizes = [16, 128], strides = [1, 1]} : vector<16x512xf32> to vector<16x128xf32>
    %cst_138 = arith.constant 5.000000e-01 : f32
    %317 = vector.broadcast %cst_138 : f32 to vector<16x128xf32>
    %318 = arith.mulf %317, %316 : vector<16x128xf32>
    %319 = math.tanh %318 : vector<16x128xf32>
    %cst_139 = arith.constant 5.000000e-01 : f32
    %320 = vector.broadcast %cst_139 : f32 to vector<16x128xf32>
    %321 = arith.mulf %320, %319 : vector<16x128xf32>
    %cst_140 = arith.constant 5.000000e-01 : f32
    %322 = vector.broadcast %cst_140 : f32 to vector<16x128xf32>
    %323 = arith.addf %321, %322 : vector<16x128xf32>
    %324 = vector.extract_strided_slice %315 {offsets = [0, 128], sizes = [16, 128], strides = [1, 1]} : vector<16x512xf32> to vector<16x128xf32>
    %cst_141 = arith.constant 5.000000e-01 : f32
    %325 = vector.broadcast %cst_141 : f32 to vector<16x128xf32>
    %326 = arith.mulf %325, %324 : vector<16x128xf32>
    %327 = math.tanh %326 : vector<16x128xf32>
    %cst_142 = arith.constant 5.000000e-01 : f32
    %328 = vector.broadcast %cst_142 : f32 to vector<16x128xf32>
    %329 = arith.mulf %328, %327 : vector<16x128xf32>
    %cst_143 = arith.constant 5.000000e-01 : f32
    %330 = vector.broadcast %cst_143 : f32 to vector<16x128xf32>
    %331 = arith.addf %329, %330 : vector<16x128xf32>
    %332 = vector.extract_strided_slice %315 {offsets = [0, 256], sizes = [16, 128], strides = [1, 1]} : vector<16x512xf32> to vector<16x128xf32>
    %333 = math.tanh %332 : vector<16x128xf32>
    %334 = vector.extract_strided_slice %315 {offsets = [0, 384], sizes = [16, 128], strides = [1, 1]} : vector<16x512xf32> to vector<16x128xf32>
    %cst_144 = arith.constant 5.000000e-01 : f32
    %335 = vector.broadcast %cst_144 : f32 to vector<16x128xf32>
    %336 = arith.mulf %335, %334 : vector<16x128xf32>
    %337 = math.tanh %336 : vector<16x128xf32>
    %cst_145 = arith.constant 5.000000e-01 : f32
    %338 = vector.broadcast %cst_145 : f32 to vector<16x128xf32>
    %339 = arith.mulf %338, %337 : vector<16x128xf32>
    %cst_146 = arith.constant 5.000000e-01 : f32
    %340 = vector.broadcast %cst_146 : f32 to vector<16x128xf32>
    %341 = arith.addf %339, %340 : vector<16x128xf32>
    %342 = arith.mulf %331, %306 : vector<16x128xf32>
    %343 = arith.mulf %323, %333 : vector<16x128xf32>
    %344 = arith.addf %342, %343 : vector<16x128xf32>
    %345 = math.tanh %344 : vector<16x128xf32>
    %346 = arith.mulf %341, %345 : vector<16x128xf32>
    %c8_i32 = arith.constant 8 : i32
    %347 = arith.truncf %346 : vector<16x128xf32> to vector<16x128xbf16>
    %c0_147 = arith.constant 0 : index
    %c1024 = arith.constant 1024 : index
    %348 = vector.load %arg2[%c0_147, %c1024] : memref<128x1792xbf16, #tpu.memory_space<vmem>>, vector<128x128xbf16>
    %cst_148 = arith.constant dense<0.000000e+00> : vector<16x128xf32>
    %349 = tpu.matmul %347, %348, %cst_148 {dimension_numbers = #tpu.dot_dimension_numbers<[1], [0], [0], [1], [0, 0, 1, 1], [], []>} : vector<16x128xbf16>, vector<128x128xbf16>, vector<16x128xf32> -> vector<16x128xf32>
    %c0_149 = arith.constant 0 : index
    %c0_150 = arith.constant 0 : index
    %350 = vector.load %arg4[%c0_149, %c0_150] : memref<40x128xf32, #tpu.memory_space<vmem>>, vector<16x128xf32>
    %351 = arith.addf %349, %350 : vector<16x128xf32>
    %352 = arith.truncf %351 : vector<16x128xf32> to vector<16x128xbf16>
    %c0_151 = arith.constant 0 : index
    %c0_152 = arith.constant 0 : index
    %353 = vector.load %arg3[%c0_151, %c0_152] : memref<40x16xbf16, #tpu.memory_space<vmem>>, vector<16x16xbf16>
    %cst_153 = arith.constant dense<0.000000e+00> : vector<16x128xf32>
    %354 = tpu.matmul %353, %352, %cst_153 {dimension_numbers = #tpu.dot_dimension_numbers<[1], [0], [0], [1], [0, 0, 1, 1], [], []>} : vector<16x16xbf16>, vector<16x128xbf16>, vector<16x128xf32> -> vector<16x128xf32>
    %355 = arith.mulf %354, %351 : vector<16x128xf32>
    %356 = arith.truncf %355 : vector<16x128xf32> to vector<16x128xbf16>
    %c0_154 = arith.constant 0 : index
    %c1152 = arith.constant 1152 : index
    %357 = vector.load %arg2[%c0_154, %c1152] : memref<128x1792xbf16, #tpu.memory_space<vmem>>, vector<128x128xbf16>
    %cst_155 = arith.constant dense<0.000000e+00> : vector<16x128xf32>
    %358 = tpu.matmul %356, %357, %cst_155 {dimension_numbers = #tpu.dot_dimension_numbers<[1], [0], [0], [1], [0, 0, 1, 1], [], []>} : vector<16x128xbf16>, vector<128x128xbf16>, vector<16x128xf32> -> vector<16x128xf32>
    %359 = math.exp %358 : vector<16x128xf32>
    %c16_156 = arith.constant 16 : index
    %c0_157 = arith.constant 0 : index
    %360 = vector.load %arg3[%c16_156, %c0_157] : memref<40x16xbf16, #tpu.memory_space<vmem>>, vector<16x16xbf16>
    %361 = arith.truncf %359 : vector<16x128xf32> to vector<16x128xbf16>
    %cst_158 = arith.constant dense<0.000000e+00> : vector<16x128xf32>
    %362 = tpu.matmul %360, %361, %cst_158 {dimension_numbers = #tpu.dot_dimension_numbers<[1], [0], [0], [1], [0, 0, 1, 1], [], []>} : vector<16x16xbf16>, vector<16x128xbf16>, vector<16x128xf32> -> vector<16x128xf32>
    %c16_159 = arith.constant 16 : index
    %c0_160 = arith.constant 0 : index
    %363 = vector.load %arg4[%c16_159, %c0_160] : memref<40x128xf32, #tpu.memory_space<vmem>>, vector<16x128xf32>
    %364 = arith.addf %362, %363 : vector<16x128xf32>
    %365 = tpu.reciprocal %364 {approx = true} : vector<16x128xf32> -> vector<16x128xf32>
    %366 = arith.mulf %359, %365 : vector<16x128xf32>
    %367 = arith.truncf %366 : vector<16x128xf32> to vector<16x128xbf16>
    %c0_161 = arith.constant 0 : index
    %c1280 = arith.constant 1280 : index
    %368 = vector.load %arg2[%c0_161, %c1280] : memref<128x1792xbf16, #tpu.memory_space<vmem>>, vector<128x128xbf16>
    %cst_162 = arith.constant dense<0.000000e+00> : vector<16x128xf32>
    %369 = tpu.matmul %367, %368, %cst_162 {dimension_numbers = #tpu.dot_dimension_numbers<[1], [0], [0], [1], [0, 0, 1, 1], [], []>} : vector<16x128xbf16>, vector<128x128xbf16>, vector<16x128xf32> -> vector<16x128xf32>
    %370 = arith.mulf %369, %351 : vector<16x128xf32>
    %371 = arith.addf %346, %370 : vector<16x128xf32>
    %c32_163 = arith.constant 32 : index
    %c0_164 = arith.constant 0 : index
    %372 = vector.load %arg3[%c32_163, %c0_164] : memref<40x16xbf16, #tpu.memory_space<vmem>>, vector<8x16xbf16>
    %373 = arith.truncf %371 : vector<16x128xf32> to vector<16x128xbf16>
    %cst_165 = arith.constant dense<0.000000e+00> : vector<8x128xf32>
    %374 = tpu.matmul %372, %373, %cst_165 {dimension_numbers = #tpu.dot_dimension_numbers<[1], [0], [0], [1], [0, 0, 1, 1], [], []>} : vector<8x16xbf16>, vector<16x128xbf16>, vector<8x128xf32> -> vector<8x128xf32>
    %c0_166 = arith.constant 0 : index
    %c0_167 = arith.constant 0 : index
    %375 = vector.load %arg1[%c0_166, %c0_167] : memref<8x128xbf16, #tpu.memory_space<vmem>>, vector<8x128xbf16>
    %c0_168 = arith.constant 0 : index
    %c1408 = arith.constant 1408 : index
    %376 = vector.load %arg2[%c0_168, %c1408] : memref<128x1792xbf16, #tpu.memory_space<vmem>>, vector<128x128xbf16>
    %cst_169 = arith.constant dense<0.000000e+00> : vector<8x128xf32>
    %377 = tpu.matmul %375, %376, %cst_169 {dimension_numbers = #tpu.dot_dimension_numbers<[1], [0], [0], [1], [0, 0, 1, 1], [], []>} : vector<8x128xbf16>, vector<128x128xbf16>, vector<8x128xf32> -> vector<8x128xf32>
    %c32_170 = arith.constant 32 : index
    %c0_171 = arith.constant 0 : index
    %378 = vector.load %arg4[%c32_170, %c0_171] : memref<40x128xf32, #tpu.memory_space<vmem>>, vector<8x128xf32>
    %379 = arith.addf %377, %378 : vector<8x128xf32>
    %cst_172 = arith.constant 0.000000e+00 : f32
    %380 = vector.broadcast %cst_172 : f32 to vector<8x128xf32>
    %381 = arith.maximumf %379, %380 : vector<8x128xf32>
    %382 = arith.truncf %374 : vector<8x128xf32> to vector<8x128xbf16>
    %c0_173 = arith.constant 0 : index
    %c1536 = arith.constant 1536 : index
    %383 = vector.load %arg2[%c0_173, %c1536] : memref<128x1792xbf16, #tpu.memory_space<vmem>>, vector<128x128xbf16>
    %cst_174 = arith.constant dense<0.000000e+00> : vector<8x128xf32>
    %384 = tpu.matmul %382, %383, %cst_174 {dimension_numbers = #tpu.dot_dimension_numbers<[1], [0], [0], [1], [0, 0, 1, 1], [], []>} : vector<8x128xbf16>, vector<128x128xbf16>, vector<8x128xf32> -> vector<8x128xf32>
    %385 = arith.truncf %381 : vector<8x128xf32> to vector<8x128xbf16>
    %c0_175 = arith.constant 0 : index
    %c1664 = arith.constant 1664 : index
    %386 = vector.load %arg2[%c0_175, %c1664] : memref<128x1792xbf16, #tpu.memory_space<vmem>>, vector<128x128xbf16>
    %cst_176 = arith.constant dense<0.000000e+00> : vector<8x128xf32>
    %387 = tpu.matmul %385, %386, %cst_176 {dimension_numbers = #tpu.dot_dimension_numbers<[1], [0], [0], [1], [0, 0, 1, 1], [], []>} : vector<8x128xbf16>, vector<128x128xbf16>, vector<8x128xf32> -> vector<8x128xf32>
    %388 = arith.addf %384, %387 : vector<8x128xf32>
    %c0_177 = arith.constant 0 : index
    %c0_178 = arith.constant 0 : index
    %389 = vector.load %arg5[%c0_177, %c0_178] : memref<8x128xf32, #tpu.memory_space<vmem>>, vector<8x128xf32>
    tpu.vector_store %arg5[%c0_177, %c0_178], %388 {strides = array<i32>} : memref<8x128xf32, #tpu.memory_space<vmem>>, vector<8x128xf32>,
    return
  }
}

</mosaic_0001>

<bundles_post_ra>
// kernel: _csl_forward.1
= control target key start
LH: loop header
LB: loop body
LE: loop exit
PB: predicated region body
PF: predicated region fallthrough
CT: control target
= control target key end

     0   :  { %10 = vsyncpa [#allocation4], 0  ;;  %s3252_s21 = smov [#allocation3]   ;;  %s3253_s23 = smov 896   ;;  %s4244_s0 = inlined_call_operand.vmem [shape: bf16[128,128], index: 0, kind: input, shape index: {}]   ;;  %s4245_s1 = inlined_call_operand.vmem [shape: bf16[8,128], index: 1, kind: input, shape index: {}]   ;;  %s4246_s2 = inlined_call_operand.hbm [shape: bf16[128,1792], index: 2, kind: input, shape index: {}]   ;;  %s4247_s3 = inlined_call_operand.vmem [shape: bf16[40,16], index: 3, kind: input, shape index: {}]   ;;  %s4248_s4 = inlined_call_operand.vmem [shape: f32[40,128], index: 4, kind: input, shape index: {}]   ;;  %s4249_s5 = inlined_call_operand.vmem [shape: f32[8,128], index: 5, kind: output, shape index: {}]  }
   0x1   :  { %s19_s20 = sshll.u32 %s4246_s2, 4  ;;  %s21_s22 = sshll.u32 %s3252_s21, 4  ;;  %s20_s20 = int_to_ptr.hbm [resolvable:$true] %s19_s20  ;;  %s22_s22 = int_to_ptr.vmem [resolvable:$true] %s21_s22 }
   0x2   :  { %s3254_s24 = smov 56  }
   0x3   :  { %27 = dma.hbm_to_vmem [thread:$0]  %s20_s20, 14336, %s22_s22, [#allocation4], %s3253_s23, %s3253_s23, %s3254_s24  }
   0x4   :  { %3250 = dma.done.wait [#allocation4], 14336  }
   0x5   :  { %3251 = vsyncadd [#allocation4], 4294952960  ;;  %v2559_v0 = vld [vmem:[#allocation3 + $0x310] sm:$0xf]  ;;  %v2962_v1 = vld [vmem:[#allocation3 + $0x344] sm:$0xf0] }
   0x6   :  { %v2960_v2 = vld [vmem:[#allocation3 + $0x314] sm:$0xf]  ;;  %v3289_v3 = vor.u32 %v2962_v1, %v2559_v0  ;;  %v2561_v4 = vld [vmem:[#allocation3 + $0x348] sm:$0xf0]  ;;  %v2567_v5 = vld [vmem:[#allocation3 + $0x318] sm:$0xf] }
   0x7   :  { %v2963_v6 = vld [vmem:[#allocation3 + $0x34c] sm:$0xf0]  ;;  %v3291_v7 = vor.u32 %v2960_v2, %v2561_v4  ;;  %v2961_v9 = vld [vmem:[#allocation3 + $0x31c] sm:$0xf]  ;;  %v2569_v10 = vld [vmem:[#allocation3 + $0x350] sm:$0xf0] }
   0x8   :  { %v3293_v8 = vor.u32 %v2963_v6, %v2567_v5  ;;  %v2543_v11 = vld [vmem:[#allocation3 + $0x2a0] sm:$0xf]  ;;  %237 = vmatpush.bf16.msra.mxu0 %v3289_v3  ;;  %v3296_v12 = vor.u32 %v2961_v9, %v2569_v10  ;;  %v2958_v13 = vld [vmem:[#allocation3 + $0x2d4] sm:$0xf0]  ;;  %v2956_v14 = vld [vmem:[#allocation3 + $0x2a4] sm:$0xf] }
   0x9   :  { %v2545_v15 = vld [vmem:[#allocation3 + $0x2d8] sm:$0xf0]  ;;  %251 = vmatpush.bf16.msra.mxu1 %v3291_v7  ;;  %v3300_v16 = vor.u32 %v2958_v13, %v2543_v11  ;;  %v2551_v18 = vld [vmem:[#allocation3 + $0x2a8] sm:$0xf]  ;;  %v2959_v19 = vld [vmem:[#allocation3 + $0x2dc] sm:$0xf0] }
   0xa   :  { %265 = vmatpush.bf16.msra.mxu2 %v3293_v8  ;;  %v3302_v17 = vor.u32 %v2956_v14, %v2545_v15  ;;  %v2957_v20 = vld [vmem:[#allocation3 + $0x2ac] sm:$0xf]  ;;  %279 = vmatpush.bf16.msra.mxu3 %v3296_v12  ;;  %v3305_v21 = vor.u32 %v2959_v19, %v2551_v18  ;;  %v2553_v22 = vld [vmem:[#allocation3 + $0x2e0] sm:$0xf0]  ;;  %v2527_v23 = vld [vmem:[#allocation3 + $0x230] sm:$0xf] }
   0xb   :  { %v2954_v24 = vld [vmem:[#allocation3 + $0x264] sm:$0xf0]  ;;  %v3307_v25 = vor.u32 %v2957_v20, %v2553_v22  ;;  %v2952_v26 = vld [vmem:[#allocation3 + $0x234] sm:$0xf]  ;;  %v2529_v27 = vld [vmem:[#allocation3 + $0x268] sm:$0xf0] }
   0xc   :  { %v2535_v28 = vld [vmem:[#allocation3 + $0x238] sm:$0xf]  ;;  %238 = vmatpush.bf16.msra.mxu0 %v3300_v16  ;;  %v3310_v29 = vor.u32 %v2954_v24, %v2527_v23  ;;  %v2955_v30 = vld [vmem:[#allocation3 + $0x26c] sm:$0xf0]  ;;  %v2953_v31 = vld [vmem:[#allocation3 + $0x23c] sm:$0xf]  ;;  %v3314_v33 = vor.u32 %v2952_v26, %v2529_v27 }
   0xd   :  { %v2537_v32 = vld [vmem:[#allocation3 + $0x270] sm:$0xf0]  ;;  %252 = vmatpush.bf16.msra.mxu1 %v3302_v17  ;;  %v3316_v34 = vor.u32 %v2955_v30, %v2535_v28  ;;  %v2511_v35 = vld [vmem:[#allocation3 + $0x1c0] sm:$0xf]  ;;  %v2950_v36 = vld [vmem:[#allocation3 + $0x1f4] sm:$0xf0] }
   0xe   :  { %266 = vmatpush.bf16.msra.mxu2 %v3305_v21  ;;  %v2948_v37 = vld [vmem:[#allocation3 + $0x1c4] sm:$0xf]  ;;  %280 = vmatpush.bf16.msra.mxu3 %v3307_v25  ;;  %v3319_v38 = vor.u32 %v2953_v31, %v2537_v32  ;;  %v2513_v39 = vld [vmem:[#allocation3 + $0x1f8] sm:$0xf0]  ;;  %v2519_v40 = vld [vmem:[#allocation3 + $0x1c8] sm:$0xf]  ;;  %v3322_v44 = vor.u32 %v2950_v36, %v2511_v35 }
   0xf   :  { %v2951_v41 = vld [vmem:[#allocation3 + $0x1fc] sm:$0xf0]  ;;  %v2949_v42 = vld [vmem:[#allocation3 + $0x1cc] sm:$0xf]  ;;  %v2521_v43 = vld [vmem:[#allocation3 + $0x200] sm:$0xf0]  ;;  %v3326_v45 = vor.u32 %v2948_v37, %v2513_v39 }
  0x10   :  { %239 = vmatpush.bf16.msra.mxu0 %v3310_v29  ;;  %v3328_v46 = vor.u32 %v2951_v41, %v2519_v40  ;;  %v2495_v47 = vld [vmem:[#allocation3 + $0x150] sm:$0xf]  ;;  %v2946_v48 = vld [vmem:[#allocation3 + $0x184] sm:$0xf0]  ;;  %v2944_v49 = vld [vmem:[#allocation3 + $0x154] sm:$0xf]  ;;  %v3331_v50 = vor.u32 %v2949_v42, %v2521_v43 }
  0x11   :  { %253 = vmatpush.bf16.msra.mxu1 %v3314_v33  ;;  %v2497_v51 = vld [vmem:[#allocation3 + $0x188] sm:$0xf0]  ;;  %v2503_v52 = vld [vmem:[#allocation3 + $0x158] sm:$0xf]  ;;  %v2947_v53 = vld [vmem:[#allocation3 + $0x18c] sm:$0xf0]  ;;  %v3334_v56 = vor.u32 %v2946_v48, %v2495_v47 }
  0x12   :  { %267 = vmatpush.bf16.msra.mxu2 %v3316_v34  ;;  %281 = vmatpush.bf16.msra.mxu3 %v3319_v38  ;;  %v2945_v54 = vld [vmem:[#allocation3 + $0x15c] sm:$0xf]  ;;  %v2505_v55 = vld [vmem:[#allocation3 + $0x190] sm:$0xf0]  ;;  %v3338_v57 = vor.u32 %v2944_v49, %v2497_v51  ;;  %v3340_v58 = vor.u32 %v2947_v53, %v2503_v52  ;;  %v2479_v59 = vld [vmem:[#allocation3 + $0xe0] sm:$0xf] }
  0x13   :  { %v2942_v60 = vld [vmem:[#allocation3 + $0x114] sm:$0xf0]  ;;  %v2940_v61 = vld [vmem:[#allocation3 + $0xe4] sm:$0xf]  ;;  %v3343_v62 = vor.u32 %v2945_v54, %v2505_v55  ;;  %v2481_v63 = vld [vmem:[#allocation3 + $0x118] sm:$0xf0] }
  0x14   :  { %240 = vmatpush.bf16.msra.mxu0 %v3322_v44  ;;  %v2487_v0 = vld [vmem:[#allocation3 + $0xe8] sm:$0xf]  ;;  %v2943_v1 = vld [vmem:[#allocation3 + $0x11c] sm:$0xf0]  ;;  %v2941_v2 = vld [vmem:[#allocation3 + $0xec] sm:$0xf]  ;;  %v3346_v5 = vor.u32 %v2942_v60, %v2479_v59  ;;  %v3350_v6 = vor.u32 %v2940_v61, %v2481_v63 }
  0x15   :  { %254 = vmatpush.bf16.msra.mxu1 %v3326_v45  ;;  %v2489_v4 = vld [vmem:[#allocation3 + $0x120] sm:$0xf0]  ;;  %v3352_v9 = vor.u32 %v2943_v1, %v2487_v0  ;;  %v2463_v10 = vld [vmem:[#allocation3 + $0x70] sm:$0xf]  ;;  %v2938_v11 = vld [vmem:[#allocation3 + $0xa4] sm:$0xf0] }
  0x16   :  { %268 = vmatpush.bf16.msra.mxu2 %v3328_v46  ;;  %282 = vmatpush.bf16.msra.mxu3 %v3331_v50  ;;  %v2936_v13 = vld [vmem:[#allocation3 + $0x74] sm:$0xf]  ;;  %v3355_v14 = vor.u32 %v2941_v2, %v2489_v4  ;;  %v2465_v15 = vld [vmem:[#allocation3 + $0xa8] sm:$0xf0]  ;;  %v2471_v18 = vld [vmem:[#allocation3 + $0x78] sm:$0xf]  ;;  %v3358_v23 = vor.u32 %v2938_v11, %v2463_v10 }
  0x17   :  { %v2939_v19 = vld [vmem:[#allocation3 + $0xac] sm:$0xf0]  ;;  %v2937_v20 = vld [vmem:[#allocation3 + $0x7c] sm:$0xf]  ;;  %v2473_v22 = vld [vmem:[#allocation3 + $0xb0] sm:$0xf0]  ;;  %v3362_v24 = vor.u32 %v2936_v13, %v2465_v15 }
  0x18   :  { %241 = vmatpush.bf16.msra.mxu0 %v3334_v56  ;;  %v3364_v26 = vor.u32 %v2939_v19, %v2471_v18  ;;  %v2447_v27 = vld [vmem:[#allocation3] sm:$0xf]  ;;  %v2934_v28 = vld [vmem:[#allocation3 + $0x34] sm:$0xf0]  ;;  %v2932_v30 = vld [vmem:[#allocation3 + $0x4] sm:$0xf]  ;;  %v3367_v31 = vor.u32 %v2937_v20, %v2473_v22 }
  0x19   :  { %255 = vmatpush.bf16.msra.mxu1 %v3338_v57  ;;  %v2449_v32 = vld [vmem:[#allocation3 + $0x38] sm:$0xf0]  ;;  %v2455_v35 = vld [vmem:[#allocation3 + $0x8] sm:$0xf]  ;;  %v2935_v36 = vld [vmem:[#allocation3 + $0x3c] sm:$0xf0]  ;;  %v3370_v40 = vor.u32 %v2934_v28, %v2447_v27 }
  0x1a   :  { %269 = vmatpush.bf16.msra.mxu2 %v3340_v58  ;;  %283 = vmatpush.bf16.msra.mxu3 %v3343_v62  ;;  %v2933_v37 = vld [vmem:[#allocation3 + $0xc] sm:$0xf]  ;;  %v2457_v39 = vld [vmem:[#allocation3 + $0x40] sm:$0xf0]  ;;  %v3374_v41 = vor.u32 %v2932_v30, %v2449_v32  ;;  %v3376_v42 = vor.u32 %v2935_v36, %v2455_v35  ;;  %v2966_v49 = vld [vmem:[%s4244_s0 + $0x10] sm:$0xff]  ;;  %vm1964_vm0 = vcmask 130048  }
  0x1b   :  { %v3379_v43 = vor.u32 %v2933_v37, %v2457_v39  ;;  %v2964_v47 = vld [vmem:[%s4244_s0] sm:$0xff]  ;;  %v2965_v48 = vld [vmem:[%s4244_s0 + $0x8] sm:$0xff]  ;;  %v2967_v51 = vld [vmem:[%s4244_s0 + $0x18] sm:$0xff] }
  0x1c   :  { %242 = vmatpush.bf16.msra.mxu0 %v3346_v5  ;;  %v2968_v52 = vld [vmem:[%s4244_s0 + $0x20] sm:$0xff]  ;;  %v2969_v53 = vld [vmem:[%s4244_s0 + $0x28] sm:$0xff]  ;;  %v2970_v54 = vld [vmem:[%s4244_s0 + $0x30] sm:$0xff] }
  0x1d   :  { %256 = vmatpush.bf16.msra.mxu1 %v3350_v6  ;;  %v2707_v55 = vld [vmem:[#allocation3 + $0x2b8] sm:$0xf]  ;;  %v2709_v59 = vld [vmem:[#allocation3 + $0x2f0] sm:$0xf0]  ;;  %v2683_v63 = vld [vmem:[#allocation3 + $0x240] sm:$0xf] }
  0x1e   :  { %270 = vmatpush.bf16.msra.mxu2 %v3352_v9  ;;  %284 = vmatpush.bf16.msra.mxu3 %v3355_v14  ;;  %v2994_v0 = vld [vmem:[#allocation3 + $0x274] sm:$0xf0]  ;;  %v2992_v1 = vld [vmem:[#allocation3 + $0x244] sm:$0xf]  ;;  %v2685_v4 = vld [vmem:[#allocation3 + $0x278] sm:$0xf0] }
  0x1f   :  { %v2693_v10 = vld [vmem:[#allocation3 + $0x280] sm:$0xf0]  ;;  %v3654_v11 = vor.u32 %v2994_v0, %v2683_v63  ;;  %v3658_v13 = vor.u32 %v2992_v1, %v2685_v4  ;;  %v2667_v15 = vld [vmem:[#allocation3 + $0x1d0] sm:$0xf]  ;;  %v2990_v18 = vld [vmem:[#allocation3 + $0x204] sm:$0xf0] }
  0x20   :  { %243 = vmatpush.bf16.msra.mxu0 %v3358_v23  ;;  %v2988_v19 = vld [vmem:[#allocation3 + $0x1d4] sm:$0xf]  ;;  %v2669_v22 = vld [vmem:[#allocation3 + $0x208] sm:$0xf0]  ;;  %v3666_v28 = vor.u32 %v2990_v18, %v2667_v15  ;;  %v2651_v32 = vld [vmem:[#allocation3 + $0x160] sm:$0xf] }
  0x21   :  { %257 = vmatpush.bf16.msra.mxu1 %v3362_v24  ;;  %v2677_v27 = vld [vmem:[#allocation3 + $0x210] sm:$0xf0]  ;;  %v3670_v30 = vor.u32 %v2988_v19, %v2669_v22  ;;  %v2986_v35 = vld [vmem:[#allocation3 + $0x194] sm:$0xf0]  ;;  %v2984_v36 = vld [vmem:[#allocation3 + $0x164] sm:$0xf] }
  0x22   :  { %271 = vmatpush.bf16.msra.mxu2 %v3364_v26  ;;  %285 = vmatpush.bf16.msra.mxu3 %v3367_v31  ;;  %v2627_v63 = vld [vmem:[#allocation3 + $0x88] sm:$0xf]  ;;  %v2979_v0 = vld [vmem:[#allocation3 + $0xbc] sm:$0xf0]  ;;  %v2977_v1 = vld [vmem:[#allocation3 + $0x8c] sm:$0xf] }
  0x23   :  { %v2629_v4 = vld [vmem:[#allocation3 + $0xc0] sm:$0xf0]  ;;  %v3720_v15 = vor.u32 %v2979_v0, %v2627_v63  ;;  %v2603_v18 = vld [vmem:[#allocation3 + $0x10] sm:$0xf]  ;;  %v2974_v19 = vld [vmem:[#allocation3 + $0x44] sm:$0xf0] }
  0x24   :  { %244 = vmatpush.bf16.msra.mxu0 %v3370_v40  ;;  %v2972_v22 = vld [vmem:[#allocation3 + $0x14] sm:$0xf] }
  0x25   :  { %258 = vmatpush.bf16.msra.mxu1 %v3374_v41 }
  0x26   :  { %272 = vmatpush.bf16.msra.mxu2 %v3376_v42  ;;  %286 = vmatpush.bf16.msra.mxu3 %v3379_v43 }
  0x27   :  { %245 = vmatmul.bf16.vlgmr.msra.gmra.mxu0 %v2964_v47 }
  0x28   :  { %309 = vmatpush.bf16.msrb.mxu0 %v3289_v3  ;;  %259 = vmatmul.bf16.vlgmr.msra.gmra.mxu1 %v2964_v47 }
  0x29   :  { %323 = vmatpush.bf16.msrb.mxu1 %v3291_v7  ;;  %273 = vmatmul.bf16.vlgmr.msra.gmra.mxu2 %v2964_v47 }
  0x2a   :  { %337 = vmatpush.bf16.msrb.mxu2 %v3293_v8  ;;  %351 = vmatpush.bf16.msrb.mxu3 %v3296_v12 }
  0x2b   :  { %287 = vmatmul.bf16.vlgmr.msra.gmra.mxu3 %v2964_v47  ;;  %v2985_v47 = vld [vmem:[#allocation3 + $0x16c] sm:$0xf] }
  0x2c   :  { %310 = vmatpush.bf16.msrb.mxu0 %v3300_v16 }
  0x2d   :  { %324 = vmatpush.bf16.msrb.mxu1 %v3302_v17 }
  0x2e   :  { %338 = vmatpush.bf16.msrb.mxu2 %v3305_v21  ;;  %352 = vmatpush.bf16.msrb.mxu3 %v3307_v25 }
  0x30   :  { %311 = vmatpush.bf16.msrb.mxu0 %v3310_v29 }
  0x31   :  { %325 = vmatpush.bf16.msrb.mxu1 %v3314_v33 }
  0x32   :  { %339 = vmatpush.bf16.msrb.mxu2 %v3316_v34  ;;  %353 = vmatpush.bf16.msrb.mxu3 %v3319_v38 }
  0x34   :  { %312 = vmatpush.bf16.msrb.mxu0 %v3322_v44 }
  0x35   :  { %326 = vmatpush.bf16.msrb.mxu1 %v3326_v45 }
  0x36   :  { %340 = vmatpush.bf16.msrb.mxu2 %v3328_v46  ;;  %354 = vmatpush.bf16.msrb.mxu3 %v3331_v50 }
  0x38   :  { %313 = vmatpush.bf16.msrb.mxu0 %v3334_v56 }
  0x39   :  { %327 = vmatpush.bf16.msrb.mxu1 %v3338_v57 }
  0x3a   :  { %341 = vmatpush.bf16.msrb.mxu2 %v3340_v58  ;;  %355 = vmatpush.bf16.msrb.mxu3 %v3343_v62 }
  0x3c   :  { %314 = vmatpush.bf16.msrb.mxu0 %v3346_v5 }
  0x3d   :  { %328 = vmatpush.bf16.msrb.mxu1 %v3350_v6 }
  0x3e   :  { %342 = vmatpush.bf16.msrb.mxu2 %v3352_v9  ;;  %356 = vmatpush.bf16.msrb.mxu3 %v3355_v14 }
  0x40   :  { %315 = vmatpush.bf16.msrb.mxu0 %v3358_v23 }
  0x41   :  { %329 = vmatpush.bf16.msrb.mxu1 %v3362_v24 }
  0x42   :  { %343 = vmatpush.bf16.msrb.mxu2 %v3364_v26  ;;  %357 = vmatpush.bf16.msrb.mxu3 %v3367_v31 }
  0x44   :  { %316 = vmatpush.bf16.msrb.mxu0 %v3370_v40 }
  0x45   :  { %330 = vmatpush.bf16.msrb.mxu1 %v3374_v41 }
  0x46   :  { %344 = vmatpush.bf16.msrb.mxu2 %v3376_v42  ;;  %358 = vmatpush.bf16.msrb.mxu3 %v3379_v43 }
  0x47   :  { %317 = vmatmul.bf16.vlgmr.msrb.gmra.mxu0 %v2965_v48 }
  0x48   :  { %382 = vmatpush.bf16.msra.mxu0 %v3289_v3  ;;  %331 = vmatmul.bf16.vlgmr.msrb.gmra.mxu1 %v2965_v48 }
  0x49   :  { %396 = vmatpush.bf16.msra.mxu1 %v3291_v7  ;;  %345 = vmatmul.bf16.vlgmr.msrb.gmra.mxu2 %v2965_v48 }
  0x4a   :  { %410 = vmatpush.bf16.msra.mxu2 %v3293_v8  ;;  %424 = vmatpush.bf16.msra.mxu3 %v3296_v12 }
  0x4b   :  { %359 = vmatmul.bf16.vlgmr.msrb.gmra.mxu3 %v2965_v48  ;;  %v2661_v48 = vld [vmem:[#allocation3 + $0x1a0] sm:$0xf0] }
  0x4c   :  { %383 = vmatpush.bf16.msra.mxu0 %v3300_v16 }
  0x4d   :  { %397 = vmatpush.bf16.msra.mxu1 %v3302_v17 }
  0x4e   :  { %411 = vmatpush.bf16.msra.mxu2 %v3305_v21  ;;  %425 = vmatpush.bf16.msra.mxu3 %v3307_v25 }
  0x50   :  { %384 = vmatpush.bf16.msra.mxu0 %v3310_v29 }
  0x51   :  { %398 = vmatpush.bf16.msra.mxu1 %v3314_v33 }
  0x52   :  { %412 = vmatpush.bf16.msra.mxu2 %v3316_v34  ;;  %426 = vmatpush.bf16.msra.mxu3 %v3319_v38 }
  0x54   :  { %385 = vmatpush.bf16.msra.mxu0 %v3322_v44 }
  0x55   :  { %399 = vmatpush.bf16.msra.mxu1 %v3326_v45 }
  0x56   :  { %413 = vmatpush.bf16.msra.mxu2 %v3328_v46  ;;  %427 = vmatpush.bf16.msra.mxu3 %v3331_v50 }
  0x58   :  { %386 = vmatpush.bf16.msra.mxu0 %v3334_v56 }
  0x59   :  { %400 = vmatpush.bf16.msra.mxu1 %v3338_v57 }
  0x5a   :  { %414 = vmatpush.bf16.msra.mxu2 %v3340_v58  ;;  %428 = vmatpush.bf16.msra.mxu3 %v3343_v62 }
  0x5c   :  { %387 = vmatpush.bf16.msra.mxu0 %v3346_v5 }
  0x5d   :  { %401 = vmatpush.bf16.msra.mxu1 %v3350_v6 }
  0x5e   :  { %415 = vmatpush.bf16.msra.mxu2 %v3352_v9  ;;  %429 = vmatpush.bf16.msra.mxu3 %v3355_v14 }
  0x60   :  { %388 = vmatpush.bf16.msra.mxu0 %v3358_v23 }
  0x61   :  { %402 = vmatpush.bf16.msra.mxu1 %v3362_v24 }
  0x62   :  { %416 = vmatpush.bf16.msra.mxu2 %v3364_v26  ;;  %430 = vmatpush.bf16.msra.mxu3 %v3367_v31 }
  0x64   :  { %389 = vmatpush.bf16.msra.mxu0 %v3370_v40 }
  0x65   :  { %403 = vmatpush.bf16.msra.mxu1 %v3374_v41 }
  0x66   :  { %417 = vmatpush.bf16.msra.mxu2 %v3376_v42  ;;  %431 = vmatpush.bf16.msra.mxu3 %v3379_v43 }
  0x67   :  { %390 = vmatmul.bf16.vlgmr.msra.gmra.mxu0 %v2966_v49 }
  0x68   :  { %455 = vmatpush.bf16.msrb.mxu0 %v3289_v3  ;;  %404 = vmatmul.bf16.vlgmr.msra.gmra.mxu1 %v2966_v49 }
  0x69   :  { %469 = vmatpush.bf16.msrb.mxu1 %v3291_v7  ;;  %418 = vmatmul.bf16.vlgmr.msra.gmra.mxu2 %v2966_v49 }
  0x6a   :  { %483 = vmatpush.bf16.msrb.mxu2 %v3293_v8  ;;  %497 = vmatpush.bf16.msrb.mxu3 %v3296_v12 }
  0x6b   :  { %432 = vmatmul.bf16.vlgmr.msra.gmra.mxu3 %v2966_v49  ;;  %v3682_v49 = vor.u32 %v2986_v35, %v2651_v32  ;;  %v2973_v32 = vld [vmem:[#allocation3 + $0x1c] sm:$0xf]  ;;  %v2613_v35 = vld [vmem:[#allocation3 + $0x50] sm:$0xf0] }
  0x6c   :  { %456 = vmatpush.bf16.msrb.mxu0 %v3300_v16 }
  0x6d   :  { %470 = vmatpush.bf16.msrb.mxu1 %v3302_v17 }
  0x6e   :  { %484 = vmatpush.bf16.msrb.mxu2 %v3305_v21  ;;  %498 = vmatpush.bf16.msrb.mxu3 %v3307_v25 }
  0x70   :  { %457 = vmatpush.bf16.msrb.mxu0 %v3310_v29 }
  0x71   :  { %471 = vmatpush.bf16.msrb.mxu1 %v3314_v33 }
  0x72   :  { %485 = vmatpush.bf16.msrb.mxu2 %v3316_v34  ;;  %499 = vmatpush.bf16.msrb.mxu3 %v3319_v38 }
  0x74   :  { %458 = vmatpush.bf16.msrb.mxu0 %v3322_v44 }
  0x75   :  { %472 = vmatpush.bf16.msrb.mxu1 %v3326_v45 }
  0x76   :  { %486 = vmatpush.bf16.msrb.mxu2 %v3328_v46  ;;  %500 = vmatpush.bf16.msrb.mxu3 %v3331_v50 }
  0x78   :  { %459 = vmatpush.bf16.msrb.mxu0 %v3334_v56 }
  0x79   :  { %473 = vmatpush.bf16.msrb.mxu1 %v3338_v57 }
  0x7a   :  { %487 = vmatpush.bf16.msrb.mxu2 %v3340_v58  ;;  %501 = vmatpush.bf16.msrb.mxu3 %v3343_v62 }
  0x7c   :  { %460 = vmatpush.bf16.msrb.mxu0 %v3346_v5 }
  0x7d   :  { %474 = vmatpush.bf16.msrb.mxu1 %v3350_v6 }
  0x7e   :  { %488 = vmatpush.bf16.msrb.mxu2 %v3352_v9  ;;  %502 = vmatpush.bf16.msrb.mxu3 %v3355_v14 }
  0x80   :  { %461 = vmatpush.bf16.msrb.mxu0 %v3358_v23 }
  0x81   :  { %475 = vmatpush.bf16.msrb.mxu1 %v3362_v24 }
  0x82   :  { %489 = vmatpush.bf16.msrb.mxu2 %v3364_v26  ;;  %503 = vmatpush.bf16.msrb.mxu3 %v3367_v31 }
  0x84   :  { %462 = vmatpush.bf16.msrb.mxu0 %v3370_v40 }
  0x85   :  { %476 = vmatpush.bf16.msrb.mxu1 %v3374_v41 }
  0x86   :  { %490 = vmatpush.bf16.msrb.mxu2 %v3376_v42  ;;  %504 = vmatpush.bf16.msrb.mxu3 %v3379_v43 }
  0x87   :  { %463 = vmatmul.bf16.vlgmr.msrb.gmra.mxu0 %v2967_v51 }
  0x88   :  { %528 = vmatpush.bf16.msra.mxu0 %v3289_v3  ;;  %477 = vmatmul.bf16.vlgmr.msrb.gmra.mxu1 %v2967_v51 }
  0x89   :  { %542 = vmatpush.bf16.msra.mxu1 %v3291_v7  ;;  %491 = vmatmul.bf16.vlgmr.msrb.gmra.mxu2 %v2967_v51 }
  0x8a   :  { %556 = vmatpush.bf16.msra.mxu2 %v3293_v8  ;;  %570 = vmatpush.bf16.msra.mxu3 %v3296_v12 }
  0x8b   :  { %505 = vmatmul.bf16.vlgmr.msrb.gmra.mxu3 %v2967_v51 }
  0x8c   :  { %529 = vmatpush.bf16.msra.mxu0 %v3300_v16 }
  0x8d   :  { %543 = vmatpush.bf16.msra.mxu1 %v3302_v17 }
  0x8e   :  { %557 = vmatpush.bf16.msra.mxu2 %v3305_v21  ;;  %571 = vmatpush.bf16.msra.mxu3 %v3307_v25 }
  0x90   :  { %530 = vmatpush.bf16.msra.mxu0 %v3310_v29 }
  0x91   :  { %544 = vmatpush.bf16.msra.mxu1 %v3314_v33 }
  0x92   :  { %558 = vmatpush.bf16.msra.mxu2 %v3316_v34  ;;  %572 = vmatpush.bf16.msra.mxu3 %v3319_v38 }
  0x94   :  { %531 = vmatpush.bf16.msra.mxu0 %v3322_v44 }
  0x95   :  { %545 = vmatpush.bf16.msra.mxu1 %v3326_v45 }
  0x96   :  { %559 = vmatpush.bf16.msra.mxu2 %v3328_v46  ;;  %573 = vmatpush.bf16.msra.mxu3 %v3331_v50 }
  0x98   :  { %532 = vmatpush.bf16.msra.mxu0 %v3334_v56 }
  0x99   :  { %546 = vmatpush.bf16.msra.mxu1 %v3338_v57 }
  0x9a   :  { %560 = vmatpush.bf16.msra.mxu2 %v3340_v58  ;;  %574 = vmatpush.bf16.msra.mxu3 %v3343_v62 }
  0x9c   :  { %533 = vmatpush.bf16.msra.mxu0 %v3346_v5 }
  0x9d   :  { %547 = vmatpush.bf16.msra.mxu1 %v3350_v6 }
  0x9e   :  { %561 = vmatpush.bf16.msra.mxu2 %v3352_v9  ;;  %575 = vmatpush.bf16.msra.mxu3 %v3355_v14 }
  0xa0   :  { %534 = vmatpush.bf16.msra.mxu0 %v3358_v23 }
  0xa1   :  { %548 = vmatpush.bf16.msra.mxu1 %v3362_v24 }
  0xa2   :  { %562 = vmatpush.bf16.msra.mxu2 %v3364_v26  ;;  %576 = vmatpush.bf16.msra.mxu3 %v3367_v31 }
  0xa4   :  { %535 = vmatpush.bf16.msra.mxu0 %v3370_v40  ;;  %v3674_v37 = vpop.f32.mrf.mxu0 }
  0xa5   :  { %549 = vmatpush.bf16.msra.mxu1 %v3374_v41 }
  0xa6   :  { %563 = vmatpush.bf16.msra.mxu2 %v3376_v42  ;;  %577 = vmatpush.bf16.msra.mxu3 %v3379_v43 }
  0xa7   :  { %536 = vmatmul.bf16.vlgmr.msra.gmra.mxu0 %v2968_v52 }
  0xa8   :  { %601 = vmatpush.bf16.msrb.mxu0 %v3289_v3  ;;  %550 = vmatmul.bf16.vlgmr.msra.gmra.mxu1 %v2968_v52 }
  0xa9   :  { %615 = vmatpush.bf16.msrb.mxu1 %v3291_v7  ;;  %564 = vmatmul.bf16.vlgmr.msra.gmra.mxu2 %v2968_v52 }
  0xaa   :  { %629 = vmatpush.bf16.msrb.mxu2 %v3293_v8  ;;  %643 = vmatpush.bf16.msrb.mxu3 %v3296_v12 }
  0xab   :  { %578 = vmatmul.bf16.vlgmr.msra.gmra.mxu3 %v2968_v52 }
  0xac   :  { %602 = vmatpush.bf16.msrb.mxu0 %v3300_v16 }
  0xad   :  { %616 = vmatpush.bf16.msrb.mxu1 %v3302_v17 }
  0xae   :  { %630 = vmatpush.bf16.msrb.mxu2 %v3305_v21  ;;  %644 = vmatpush.bf16.msrb.mxu3 %v3307_v25 }
  0xb0   :  { %603 = vmatpush.bf16.msrb.mxu0 %v3310_v29 }
  0xb1   :  { %617 = vmatpush.bf16.msrb.mxu1 %v3314_v33 }
  0xb2   :  { %631 = vmatpush.bf16.msrb.mxu2 %v3316_v34  ;;  %645 = vmatpush.bf16.msrb.mxu3 %v3319_v38 }
  0xb4   :  { %604 = vmatpush.bf16.msrb.mxu0 %v3322_v44 }
  0xb5   :  { %618 = vmatpush.bf16.msrb.mxu1 %v3326_v45 }
  0xb6   :  { %632 = vmatpush.bf16.msrb.mxu2 %v3328_v46  ;;  %646 = vmatpush.bf16.msrb.mxu3 %v3331_v50 }
  0xb8   :  { %605 = vmatpush.bf16.msrb.mxu0 %v3334_v56 }
  0xb9   :  { %619 = vmatpush.bf16.msrb.mxu1 %v3338_v57 }
  0xba   :  { %633 = vmatpush.bf16.msrb.mxu2 %v3340_v58  ;;  %647 = vmatpush.bf16.msrb.mxu3 %v3343_v62 }
  0xbc   :  { %606 = vmatpush.bf16.msrb.mxu0 %v3346_v5 }
  0xbd   :  { %620 = vmatpush.bf16.msrb.mxu1 %v3350_v6 }
  0xbe   :  { %634 = vmatpush.bf16.msrb.mxu2 %v3352_v9  ;;  %648 = vmatpush.bf16.msrb.mxu3 %v3355_v14 }
  0xc0   :  { %607 = vmatpush.bf16.msrb.mxu0 %v3358_v23 }
  0xc1   :  { %621 = vmatpush.bf16.msrb.mxu1 %v3362_v24 }
  0xc2   :  { %635 = vmatpush.bf16.msrb.mxu2 %v3364_v26  ;;  %649 = vmatpush.bf16.msrb.mxu3 %v3367_v31 }
  0xc4   :  { %608 = vmatpush.bf16.msrb.mxu0 %v3370_v40 }
  0xc5   :  { %622 = vmatpush.bf16.msrb.mxu1 %v3374_v41 }
  0xc6   :  { %636 = vmatpush.bf16.msrb.mxu2 %v3376_v42  ;;  %650 = vmatpush.bf16.msrb.mxu3 %v3379_v43 }
  0xc7   :  { %609 = vmatmul.bf16.vlgmr.msrb.gmra.mxu0 %v2969_v53 }
  0xc8   :  { %674 = vmatpush.bf16.msra.mxu0 %v3289_v3  ;;  %623 = vmatmul.bf16.vlgmr.msrb.gmra.mxu1 %v2969_v53 }
  0xc9   :  { %688 = vmatpush.bf16.msra.mxu1 %v3291_v7  ;;  %637 = vmatmul.bf16.vlgmr.msrb.gmra.mxu2 %v2969_v53 }
  0xca   :  { %702 = vmatpush.bf16.msra.mxu2 %v3293_v8  ;;  %716 = vmatpush.bf16.msra.mxu3 %v3296_v12 }
  0xcb   :  { %651 = vmatmul.bf16.vlgmr.msrb.gmra.mxu3 %v2969_v53  ;;  %v2635_v53 = vld [vmem:[#allocation3 + $0xf0] sm:$0xf] }
  0xcc   :  { %675 = vmatpush.bf16.msra.mxu0 %v3300_v16 }
  0xcd   :  { %689 = vmatpush.bf16.msra.mxu1 %v3302_v17 }
  0xce   :  { %703 = vmatpush.bf16.msra.mxu2 %v3305_v21  ;;  %717 = vmatpush.bf16.msra.mxu3 %v3307_v25 }
  0xd0   :  { %676 = vmatpush.bf16.msra.mxu0 %v3310_v29 }
  0xd1   :  { %690 = vmatpush.bf16.msra.mxu1 %v3314_v33 }
  0xd2   :  { %704 = vmatpush.bf16.msra.mxu2 %v3316_v34  ;;  %718 = vmatpush.bf16.msra.mxu3 %v3319_v38 }
  0xd4   :  { %677 = vmatpush.bf16.msra.mxu0 %v3322_v44 }
  0xd5   :  { %691 = vmatpush.bf16.msra.mxu1 %v3326_v45 }
  0xd6   :  { %705 = vmatpush.bf16.msra.mxu2 %v3328_v46  ;;  %719 = vmatpush.bf16.msra.mxu3 %v3331_v50 }
  0xd8   :  { %678 = vmatpush.bf16.msra.mxu0 %v3334_v56 }
  0xd9   :  { %692 = vmatpush.bf16.msra.mxu1 %v3338_v57 }
  0xda   :  { %706 = vmatpush.bf16.msra.mxu2 %v3340_v58  ;;  %720 = vmatpush.bf16.msra.mxu3 %v3343_v62 }
  0xdc   :  { %679 = vmatpush.bf16.msra.mxu0 %v3346_v5 }
  0xdd   :  { %693 = vmatpush.bf16.msra.mxu1 %v3350_v6 }
  0xde   :  { %707 = vmatpush.bf16.msra.mxu2 %v3352_v9  ;;  %721 = vmatpush.bf16.msra.mxu3 %v3355_v14 }
  0xe0   :  { %680 = vmatpush.bf16.msra.mxu0 %v3358_v23 }
  0xe1   :  { %694 = vmatpush.bf16.msra.mxu1 %v3362_v24 }
  0xe2   :  { %708 = vmatpush.bf16.msra.mxu2 %v3364_v26  ;;  %722 = vmatpush.bf16.msra.mxu3 %v3367_v31 }
  0xe4   :  { %681 = vmatpush.bf16.msra.mxu0 %v3370_v40 }
  0xe5   :  { %695 = vmatpush.bf16.msra.mxu1 %v3374_v41 }
  0xe6   :  { %709 = vmatpush.bf16.msra.mxu2 %v3376_v42  ;;  %723 = vmatpush.bf16.msra.mxu3 %v3379_v43 }
  0xe7   :  { %682 = vmatmul.bf16.vlgmr.msra.gmra.mxu0 %v2970_v54 }
  0xe8   :  { %747 = vmatpush.bf16.msrb.mxu0 %v3289_v3  ;;  %696 = vmatmul.bf16.vlgmr.msra.gmra.mxu1 %v2970_v54  ;;  %v2715_v3 = vld [vmem:[#allocation3 + $0x320] sm:$0xf] }
  0xe9   :  { %761 = vmatpush.bf16.msrb.mxu1 %v3291_v7  ;;  %710 = vmatmul.bf16.vlgmr.msra.gmra.mxu2 %v2970_v54  ;;  %v3002_v7 = vld [vmem:[#allocation3 + $0x354] sm:$0xf0] }
  0xea   :  { %775 = vmatpush.bf16.msrb.mxu2 %v3293_v8  ;;  %789 = vmatpush.bf16.msrb.mxu3 %v3296_v12  ;;  %v3000_v8 = vld [vmem:[#allocation3 + $0x324] sm:$0xf]  ;;  %v2717_v12 = vld [vmem:[#allocation3 + $0x358] sm:$0xf0] }
  0xeb   :  { %724 = vmatmul.bf16.vlgmr.msra.gmra.mxu3 %v2970_v54  ;;  %v2982_v54 = vld [vmem:[#allocation3 + $0x124] sm:$0xf0] }
  0xec   :  { %748 = vmatpush.bf16.msrb.mxu0 %v3300_v16  ;;  %v2723_v16 = vld [vmem:[#allocation3 + $0x328] sm:$0xf] }
  0xed   :  { %762 = vmatpush.bf16.msrb.mxu1 %v3302_v17  ;;  %v3003_v17 = vld [vmem:[#allocation3 + $0x35c] sm:$0xf0] }
  0xee   :  { %776 = vmatpush.bf16.msrb.mxu2 %v3305_v21  ;;  %790 = vmatpush.bf16.msrb.mxu3 %v3307_v25  ;;  %v3001_v21 = vld [vmem:[#allocation3 + $0x32c] sm:$0xf]  ;;  %v2725_v25 = vld [vmem:[#allocation3 + $0x360] sm:$0xf0] }
  0xf0   :  { %749 = vmatpush.bf16.msrb.mxu0 %v3310_v29  ;;  %v3626_v29 = vor.u32 %v3002_v7, %v2715_v3  ;;  %v2980_v3 = vld [vmem:[#allocation3 + $0xf4] sm:$0xf]  ;;  %v3691_v7 = vor.u32 %v2985_v47, %v2661_v48 }
  0xf1   :  { %763 = vmatpush.bf16.msrb.mxu1 %v3314_v33  ;;  %v2699_v33 = vld [vmem:[#allocation3 + $0x2b0] sm:$0xf] }
  0xf2   :  { %777 = vmatpush.bf16.msrb.mxu2 %v3316_v34  ;;  %791 = vmatpush.bf16.msrb.mxu3 %v3319_v38  ;;  %v3628_v34 = vor.u32 %v3000_v8, %v2717_v12  ;;  %v3630_v38 = vor.u32 %v3003_v17, %v2723_v16  ;;  %v2637_v8 = vld [vmem:[#allocation3 + $0x128] sm:$0xf0]  ;;  %v2643_v12 = vld [vmem:[#allocation3 + $0xf8] sm:$0xf]  ;;  %v2983_v16 = vld [vmem:[#allocation3 + $0x12c] sm:$0xf0] }
  0xf3   :  { %v2981_v17 = vld [vmem:[#allocation3 + $0xfc] sm:$0xf] }
  0xf4   :  { %750 = vmatpush.bf16.msrb.mxu0 %v3322_v44  ;;  %v2998_v44 = vld [vmem:[#allocation3 + $0x2e4] sm:$0xf0] }
  0xf5   :  { %764 = vmatpush.bf16.msrb.mxu1 %v3326_v45  ;;  %v2996_v45 = vld [vmem:[#allocation3 + $0x2b4] sm:$0xf]  ;;  %v3642_v60 = vor.u32 %v2998_v44, %v2699_v33  ;;  %v3696_v33 = vpop.f32.mrf.mxu2  ;;  %v3700_v44 = vor.u32 %v2980_v3, %v2637_v8  ;;  %v3255_v3 = vmov 0  }
  0xf6   :  { %778 = vmatpush.bf16.msrb.mxu2 %v3328_v46  ;;  %792 = vmatpush.bf16.msrb.mxu3 %v3331_v50  ;;  %v2701_v46 = vld [vmem:[#allocation3 + $0x2e8] sm:$0xf0]  ;;  %v3633_v50 = vor.u32 %v3001_v21, %v2725_v25  ;;  %v2645_v21 = vld [vmem:[#allocation3 + $0x130] sm:$0xf0]  ;;  %v3694_v25 = vor.u32 %v2982_v54, %v2635_v53 }
  0xf7   :  { %v3646_v61 = vor.u32 %v2996_v45, %v2701_v46  ;;  %v3702_v45 = vor.u32 %v2983_v16, %v2643_v12  ;;  %v2619_v46 = vld [vmem:[#allocation3 + $0x80] sm:$0xf] }
  0xf8   :  { %751 = vmatpush.bf16.msrb.mxu0 %v3334_v56  ;;  %v2999_v56 = vld [vmem:[#allocation3 + $0x2ec] sm:$0xf0] }
  0xf9   :  { %765 = vmatpush.bf16.msrb.mxu1 %v3338_v57  ;;  %v2971_v57 = vld [vmem:[%s4244_s0 + $0x38] sm:$0xff] }
  0xfa   :  { %779 = vmatpush.bf16.msrb.mxu2 %v3340_v58  ;;  %793 = vmatpush.bf16.msrb.mxu3 %v3343_v62  ;;  %v2997_v58 = vld [vmem:[#allocation3 + $0x2bc] sm:$0xf]  ;;  %v3648_v62 = vor.u32 %v2999_v56, %v2707_v55  ;;  %v2978_v55 = vld [vmem:[#allocation3 + $0xb4] sm:$0xf0]  ;;  %v2976_v56 = vld [vmem:[#allocation3 + $0x84] sm:$0xf] }
  0xfb   :  { %v3651_v2 = vor.u32 %v2997_v58, %v2709_v59  ;;  %v3707_v58 = vor.u32 %v2981_v17, %v2645_v21  ;;  %v2621_v59 = vld [vmem:[#allocation3 + $0xb8] sm:$0xf0] }
  0xfc   :  { %752 = vmatpush.bf16.msrb.mxu0 %v3346_v5  ;;  %v2691_v5 = vld [vmem:[#allocation3 + $0x248] sm:$0xf] }
  0xfd   :  { %766 = vmatpush.bf16.msrb.mxu1 %v3350_v6  ;;  %v2995_v6 = vld [vmem:[#allocation3 + $0x27c] sm:$0xf0]  ;;  %v3737_v47 = vpop.f32.mrf.mxu2 }
  0xfe   :  { %780 = vmatpush.bf16.msrb.mxu2 %v3352_v9  ;;  %794 = vmatpush.bf16.msrb.mxu3 %v3355_v14  ;;  %v2993_v9 = vld [vmem:[#allocation3 + $0x24c] sm:$0xf]  ;;  %v3660_v14 = vor.u32 %v2995_v6, %v2691_v5  ;;  %v3709_v5 = vpop.f32.mrf.mxu0  ;;  %v3712_v6 = vor.u32 %v2978_v55, %v2619_v46 }
  0xff   :  { %v3663_v20 = vor.u32 %v2993_v9, %v2693_v10  ;;  %v3718_v10 = vor.u32 %v2976_v56, %v2621_v59 }
 0x100   :  { %753 = vmatpush.bf16.msrb.mxu0 %v3358_v23  ;;  %v2675_v23 = vld [vmem:[#allocation3 + $0x1d8] sm:$0xf] }
 0x101   :  { %767 = vmatpush.bf16.msrb.mxu1 %v3362_v24  ;;  %v2991_v24 = vld [vmem:[#allocation3 + $0x20c] sm:$0xf0] }
 0x102   :  { %781 = vmatpush.bf16.msrb.mxu2 %v3364_v26  ;;  %795 = vmatpush.bf16.msrb.mxu3 %v3367_v31  ;;  %v2989_v26 = vld [vmem:[#allocation3 + $0x1dc] sm:$0xf]  ;;  %v3672_v31 = vor.u32 %v2991_v24, %v2675_v23  ;;  %v3723_v23 = vor.u32 %v2977_v1, %v2629_v4  ;;  %v2605_v24 = vld [vmem:[#allocation3 + $0x48] sm:$0xf0] }
 0x103   :  { %v3677_v39 = vor.u32 %v2989_v26, %v2677_v27  ;;  %v2611_v26 = vld [vmem:[#allocation3 + $0x18] sm:$0xf]  ;;  %v2975_v27 = vld [vmem:[#allocation3 + $0x4c] sm:$0xf0] }
 0x104   :  { %754 = vmatpush.bf16.msrb.mxu0 %v3370_v40  ;;  %v2653_v40 = vld [vmem:[#allocation3 + $0x198] sm:$0xf0] }
 0x105   :  { %768 = vmatpush.bf16.msrb.mxu1 %v3374_v41  ;;  %v2659_v41 = vld [vmem:[#allocation3 + $0x168] sm:$0xf]  ;;  %v3686_v51 = vor.u32 %v2984_v36, %v2653_v40  ;;  %v3726_v36 = vor.u32 %v2974_v19, %v2603_v18  ;;  %v3730_v40 = vor.u32 %v2972_v22, %v2605_v24  ;;  %v3754_v8 = vpop.f32.mrf.mxu2 }
 0x106   :  { %782 = vmatpush.bf16.msrb.mxu2 %v3376_v42  ;;  %796 = vmatpush.bf16.msrb.mxu3 %v3379_v43  ;;  %v2987_v42 = vld [vmem:[#allocation3 + $0x19c] sm:$0xf0]  ;;  %v3679_v43 = vpop.f32.mrf.mxu1  ;;  %v3741_v53 = vpop.f32.mrf.mxu0 }
 0x107   :  { %755 = vmatmul.bf16.vlgmr.msrb.gmra.mxu0 %v2971_v57  ;;  %v3688_v52 = vor.u32 %v2987_v42, %v2659_v41  ;;  %v3732_v41 = vor.u32 %v2975_v27, %v2611_v26  ;;  %v3735_v42 = vor.u32 %v2973_v32, %v2613_v35 }
 0x108   :  { %1012 = vmatpush.bf16.msra.mxu0 %v3626_v29  ;;  %769 = vmatmul.bf16.vlgmr.msrb.gmra.mxu1 %v2971_v57 }
 0x109   :  { %1026 = vmatpush.bf16.msra.mxu1 %v3628_v34  ;;  %783 = vmatmul.bf16.vlgmr.msrb.gmra.mxu2 %v2971_v57 }
 0x10a   :  { %1040 = vmatpush.bf16.msra.mxu2 %v3630_v38  ;;  %1054 = vmatpush.bf16.msra.mxu3 %v3633_v50 }
 0x10b   :  { %797 = vmatmul.bf16.vlgmr.msrb.gmra.mxu3 %v2971_v57  ;;  %v3704_v57 = vpop.f32.mrf.mxu3 }
 0x10c   :  { %1013 = vmatpush.bf16.msra.mxu0 %v3642_v60 }
 0x10d   :  { %1027 = vmatpush.bf16.msra.mxu1 %v3646_v61  ;;  %v3771_v21 = vpop.f32.mrf.mxu2 }
 0x10e   :  { %1041 = vmatpush.bf16.msra.mxu2 %v3648_v62  ;;  %1055 = vmatpush.bf16.msra.mxu3 %v3651_v2  ;;  %v3714_v9 = vpop.f32.mrf.mxu1  ;;  %v3760_v16 = vpop.f32.mrf.mxu0 }
 0x110   :  { %1014 = vmatpush.bf16.msra.mxu0 %v3654_v11 }
 0x111   :  { %1028 = vmatpush.bf16.msra.mxu1 %v3658_v13 }
 0x112   :  { %1042 = vmatpush.bf16.msra.mxu2 %v3660_v14  ;;  %1056 = vmatpush.bf16.msra.mxu3 %v3663_v20 }
 0x113   :  { %v3739_v48 = vpop.f32.mrf.mxu3 }
 0x114   :  { %1015 = vmatpush.bf16.msra.mxu0 %v3666_v28 }
 0x115   :  { %1029 = vmatpush.bf16.msra.mxu1 %v3670_v30  ;;  %v3787_v59 = vpop.f32.mrf.mxu2 }
 0x116   :  { %1043 = vmatpush.bf16.msra.mxu2 %v3672_v31  ;;  %1057 = vmatpush.bf16.msra.mxu3 %v3677_v39  ;;  %v3744_v54 = vpop.f32.mrf.mxu1  ;;  %v3776_v55 = vpop.f32.mrf.mxu0  ;;  %4251 = vst [vmem:[#allocation7_spill] sm:$0xff] %v3787_v59 }
 0x118   :  { %1016 = vmatpush.bf16.msra.mxu0 %v3682_v49 }
 0x119   :  { %1030 = vmatpush.bf16.msra.mxu1 %v3686_v51 }
 0x11a   :  { %1044 = vmatpush.bf16.msra.mxu2 %v3688_v52  ;;  %1058 = vmatpush.bf16.msra.mxu3 %v3691_v7 }
 0x11b   :  { %v3757_v12 = vpop.f32.mrf.mxu3 }
 0x11c   :  { %1017 = vmatpush.bf16.msra.mxu0 %v3694_v25 }
 0x11d   :  { %1031 = vmatpush.bf16.msra.mxu1 %v3700_v44  ;;  %v3808_v4 = vpop.f32.mrf.mxu2 }
 0x11e   :  { %1045 = vmatpush.bf16.msra.mxu2 %v3702_v45  ;;  %1059 = vmatpush.bf16.msra.mxu3 %v3707_v58  ;;  %v3764_v17 = vpop.f32.mrf.mxu1  ;;  %v3795_v0 = vpop.f32.mrf.mxu0  ;;  %4255 = vst [vmem:[#allocation11_spill] sm:$0xff] %v3808_v4 }
 0x11f   :  { %4253 = vst [vmem:[#allocation9_spill] sm:$0xff] %v3795_v0 }
 0x120   :  { %1018 = vmatpush.bf16.msra.mxu0 %v3712_v6 }
 0x121   :  { %1032 = vmatpush.bf16.msra.mxu1 %v3718_v10 }
 0x122   :  { %1046 = vmatpush.bf16.msra.mxu2 %v3720_v15  ;;  %1060 = vmatpush.bf16.msra.mxu3 %v3723_v23 }
 0x123   :  { %v3774_v46 = vpop.f32.mrf.mxu3 }
 0x124   :  { %1019 = vmatpush.bf16.msra.mxu0 %v3726_v36 }
 0x125   :  { %1033 = vmatpush.bf16.msra.mxu1 %v3730_v40  ;;  %v3824_v24 = vpop.f32.mrf.mxu2 }
 0x126   :  { %1047 = vmatpush.bf16.msra.mxu2 %v3732_v41  ;;  %1061 = vmatpush.bf16.msra.mxu3 %v3735_v42  ;;  %v3780_v56 = vpop.f32.mrf.mxu1  ;;  %v3814_v19 = vpop.f32.mrf.mxu0  ;;  %4259 = vst [vmem:[#allocation15_spill] sm:$0xff] %v3824_v24 }
 0x127   :  { %1020 = vmatmul.bf16.vlgmr.msra.gmra.mxu0 %v3255_v3  ;;  %4250 = vst [vmem:[#allocation6_spill] sm:$0xff] %v3780_v56 }
 0x128   :  { %1121 = vmatpush.bf16.msrb.mxu0 %v3626_v29  ;;  %1034 = vmatmul.bf16.vlgmr.msra.gmra.mxu1 %v3255_v3  ;;  %4257 = vst [vmem:[#allocation13_spill] sm:$0xff] %v3814_v19 }
 0x129   :  { %1135 = vmatpush.bf16.msrb.mxu1 %v3628_v34  ;;  %1048 = vmatmul.bf16.vlgmr.msra.gmra.mxu2 %v3255_v3 }
 0x12a   :  { %1062 = vmatmul.bf16.vlgmr.msra.gmra.mxu3 %v3255_v3  ;;  %1149 = vmatpush.bf16.msrb.mxu2 %v3630_v38 }
 0x12b   :  { %1163 = vmatpush.bf16.msrb.mxu3 %v3633_v50  ;;  %v3790_v63 = vpop.f32.mrf.mxu3 }
 0x12c   :  { %1122 = vmatpush.bf16.msrb.mxu0 %v3642_v60  ;;  %4252 = vst [vmem:[#allocation8_spill] sm:$0xff] %v3790_v63 }
 0x12d   :  { %1136 = vmatpush.bf16.msrb.mxu1 %v3646_v61  ;;  %v3843_v35 = vpop.f32.mrf.mxu2 }
 0x12e   :  { %1150 = vmatpush.bf16.msrb.mxu2 %v3648_v62  ;;  %v3797_v1 = vpop.f32.mrf.mxu1  ;;  %v3831_v27 = vpop.f32.mrf.mxu0  ;;  %4263 = vst [vmem:[#allocation19_spill] sm:$0xff] %v3843_v35 }
 0x12f   :  { %1164 = vmatpush.bf16.msrb.mxu3 %v3651_v2  ;;  %4254 = vst [vmem:[#allocation10_spill] sm:$0xff] %v3797_v1 }
 0x130   :  { %1123 = vmatpush.bf16.msrb.mxu0 %v3654_v11  ;;  %4261 = vst [vmem:[#allocation17_spill] sm:$0xff] %v3831_v27 }
 0x131   :  { %1137 = vmatpush.bf16.msrb.mxu1 %v3658_v13 }
 0x132   :  { %1151 = vmatpush.bf16.msrb.mxu2 %v3660_v14 }
 0x133   :  { %1165 = vmatpush.bf16.msrb.mxu3 %v3663_v20  ;;  %v3812_v18 = vpop.f32.mrf.mxu3 }
 0x134   :  { %1124 = vmatpush.bf16.msrb.mxu0 %v3666_v28  ;;  %4256 = vst [vmem:[#allocation12_spill] sm:$0xff] %v3812_v18 }
 0x135   :  { %1138 = vmatpush.bf16.msrb.mxu1 %v3670_v30 }
 0x136   :  { %1152 = vmatpush.bf16.msrb.mxu2 %v3672_v31  ;;  %v3817_v22 = vpop.f32.mrf.mxu1 }
 0x137   :  { %1166 = vmatpush.bf16.msrb.mxu3 %v3677_v39  ;;  %4258 = vst [vmem:[#allocation14_spill] sm:$0xff] %v3817_v22 }
 0x138   :  { %1125 = vmatpush.bf16.msrb.mxu0 %v3682_v49 }
 0x139   :  { %1139 = vmatpush.bf16.msrb.mxu1 %v3686_v51 }
 0x13a   :  { %1153 = vmatpush.bf16.msrb.mxu2 %v3688_v52 }
 0x13b   :  { %1167 = vmatpush.bf16.msrb.mxu3 %v3691_v7  ;;  %v3828_v26 = vpop.f32.mrf.mxu3 }
 0x13c   :  { %1126 = vmatpush.bf16.msrb.mxu0 %v3694_v25  ;;  %4260 = vst [vmem:[#allocation16_spill] sm:$0xff] %v3828_v26  ;;  %v3847_v26 = vpop.f32.mrf.mxu0 }
 0x13d   :  { %1140 = vmatpush.bf16.msrb.mxu1 %v3700_v44  ;;  %4265 = vst [vmem:[#allocation21_spill] sm:$0xff] %v3847_v26 }
 0x13e   :  { %1154 = vmatpush.bf16.msrb.mxu2 %v3702_v45  ;;  %v3834_v32 = vpop.f32.mrf.mxu1 }
 0x13f   :  { %1168 = vmatpush.bf16.msrb.mxu3 %v3707_v58  ;;  %4262 = vst [vmem:[#allocation18_spill] sm:$0xff] %v3834_v32 }
 0x140   :  { %1127 = vmatpush.bf16.msrb.mxu0 %v3712_v6 }
 0x141   :  { %1141 = vmatpush.bf16.msrb.mxu1 %v3718_v10 }
 0x142   :  { %1155 = vmatpush.bf16.msrb.mxu2 %v3720_v15 }
 0x143   :  { %1169 = vmatpush.bf16.msrb.mxu3 %v3723_v23  ;;  %v3845_v3 = vpop.f32.mrf.mxu3 }
 0x144   :  { %1128 = vmatpush.bf16.msrb.mxu0 %v3726_v36  ;;  %4264 = vst [vmem:[#allocation20_spill] sm:$0xff] %v3845_v3  ;;  %v3859_v3 = vpop.f32.mrf.mxu2 }
 0x145   :  { %1142 = vmatpush.bf16.msrb.mxu1 %v3730_v40  ;;  %4267 = vst [vmem:[#allocation23_spill] sm:$0xff] %v3859_v3 }
 0x146   :  { %1156 = vmatpush.bf16.msrb.mxu2 %v3732_v41  ;;  %v3850_v32 = vpop.f32.mrf.mxu1 }
 0x147   :  { %1170 = vmatpush.bf16.msrb.mxu3 %v3735_v42  ;;  %4266 = vst [vmem:[#allocation22_spill] sm:$0xff] %v3850_v32  ;;  %v3865_v32 = vpop.f32.mrf.mxu0 }
 0x148   :  { %1230 = vmatpush.bf16.msra.mxu0 %v3626_v29  ;;  %4269 = vst [vmem:[#allocation25_spill] sm:$0xff] %v3865_v32 }
 0x149   :  { %1244 = vmatpush.bf16.msra.mxu1 %v3628_v34 }
 0x14a   :  { %1258 = vmatpush.bf16.msra.mxu2 %v3630_v38 }
 0x14b   :  { %1272 = vmatpush.bf16.msra.mxu3 %v3633_v50  ;;  %v3861_v26 = vpop.f32.mrf.mxu3 }
 0x14c   :  { %1231 = vmatpush.bf16.msra.mxu0 %v3642_v60  ;;  %4268 = vst [vmem:[#allocation24_spill] sm:$0xff] %v3861_v26  ;;  %v3869_v27 = vpop.f32.mrf.mxu2 }
 0x14d   :  { %1245 = vmatpush.bf16.msra.mxu1 %v3646_v61  ;;  %4271 = vst [vmem:[#allocation27_spill] sm:$0xff] %v3869_v27 }
 0x14e   :  { %1259 = vmatpush.bf16.msra.mxu2 %v3648_v62  ;;  %v3867_v35 = vpop.f32.mrf.mxu1 }
 0x14f   :  { %1273 = vmatpush.bf16.msra.mxu3 %v3651_v2  ;;  %4270 = vst [vmem:[#allocation26_spill] sm:$0xff] %v3867_v35  ;;  %v3873_v22 = vpop.f32.mrf.mxu0 }
 0x150   :  { %1232 = vmatpush.bf16.msra.mxu0 %v3654_v11  ;;  %4273 = vst [vmem:[#allocation29_spill] sm:$0xff] %v3873_v22 }
 0x151   :  { %1246 = vmatpush.bf16.msra.mxu1 %v3658_v13 }
 0x152   :  { %1260 = vmatpush.bf16.msra.mxu2 %v3660_v14 }
 0x153   :  { %1274 = vmatpush.bf16.msra.mxu3 %v3663_v20  ;;  %v3871_v24 = vpop.f32.mrf.mxu3 }
 0x154   :  { %1233 = vmatpush.bf16.msra.mxu0 %v3666_v28  ;;  %4272 = vst [vmem:[#allocation28_spill] sm:$0xff] %v3871_v24  ;;  %v3877_v18 = vpop.f32.mrf.mxu2 }
 0x155   :  { %1247 = vmatpush.bf16.msra.mxu1 %v3670_v30  ;;  %4275 = vst [vmem:[#allocation31_spill] sm:$0xff] %v3877_v18 }
 0x156   :  { %1261 = vmatpush.bf16.msra.mxu2 %v3672_v31  ;;  %v3875_v19 = vpop.f32.mrf.mxu1 }
 0x157   :  { %1275 = vmatpush.bf16.msra.mxu3 %v3677_v39  ;;  %4274 = vst [vmem:[#allocation30_spill] sm:$0xff] %v3875_v19  ;;  %v3881_v26 = vpop.f32.mrf.mxu0 }
 0x158   :  { %1234 = vmatpush.bf16.msra.mxu0 %v3682_v49  ;;  %4277 = vst [vmem:[#allocation33_spill] sm:$0xff] %v3881_v26 }
 0x159   :  { %1248 = vmatpush.bf16.msra.mxu1 %v3686_v51 }
 0x15a   :  { %1262 = vmatpush.bf16.msra.mxu2 %v3688_v52 }
 0x15b   :  { %1276 = vmatpush.bf16.msra.mxu3 %v3691_v7  ;;  %v3879_v3 = vpop.f32.mrf.mxu3 }
 0x15c   :  { %1235 = vmatpush.bf16.msra.mxu0 %v3694_v25  ;;  %4276 = vst [vmem:[#allocation32_spill] sm:$0xff] %v3879_v3  ;;  %v3885_v63 = vpop.f32.mrf.mxu2 }
 0x15d   :  { %1249 = vmatpush.bf16.msra.mxu1 %v3700_v44  ;;  %4279 = vst [vmem:[#allocation35_spill] sm:$0xff] %v3885_v63 }
 0x15e   :  { %1263 = vmatpush.bf16.msra.mxu2 %v3702_v45  ;;  %v3883_v4 = vpop.f32.mrf.mxu1 }
 0x15f   :  { %1277 = vmatpush.bf16.msra.mxu3 %v3707_v58  ;;  %4278 = vst [vmem:[#allocation34_spill] sm:$0xff] %v3883_v4 }
 0x160   :  { %1236 = vmatpush.bf16.msra.mxu0 %v3712_v6 }
 0x161   :  { %1250 = vmatpush.bf16.msra.mxu1 %v3718_v10 }
 0x162   :  { %1264 = vmatpush.bf16.msra.mxu2 %v3720_v15 }
 0x163   :  { %1278 = vmatpush.bf16.msra.mxu3 %v3723_v23  ;;  %v3887_v32 = vpop.f32.mrf.mxu3 }
 0x164   :  { %1237 = vmatpush.bf16.msra.mxu0 %v3726_v36  ;;  %4280 = vst [vmem:[#allocation36_spill] sm:$0xff] %v3887_v32  ;;  %v3889_v35 = vpop.f32.mrf.mxu0 }
 0x165   :  { %1251 = vmatpush.bf16.msra.mxu1 %v3730_v40  ;;  %4281 = vst [vmem:[#allocation37_spill] sm:$0xff] %v3889_v35 }
 0x166   :  { %1265 = vmatpush.bf16.msra.mxu2 %v3732_v41  ;;  %v3891_v27 = vpop.f32.mrf.mxu1 }
 0x167   :  { %1279 = vmatpush.bf16.msra.mxu3 %v3735_v42  ;;  %4282 = vst [vmem:[#allocation38_spill] sm:$0xff] %v3891_v27 }
 0x16c   :  { %v3893_v24 = vpop.f32.mrf.mxu2  ;;  %v3897_v19 = vpop.f32.mrf.mxu0 }
 0x16d   :  { %4283 = vst [vmem:[#allocation39_spill] sm:$0xff] %v3893_v24 }
 0x16e   :  { %v3895_v22 = vpop.f32.mrf.mxu3  ;;  %4285 = vst [vmem:[#allocation41_spill] sm:$0xff] %v3897_v19  ;;  %v3899_v18 = vpop.f32.mrf.mxu1 }
 0x16f   :  { %4284 = vst [vmem:[#allocation40_spill] sm:$0xff] %v3895_v22 }
 0x170   :  { %4286 = vst [vmem:[#allocation42_spill] sm:$0xff] %v3899_v18 }
 0x174   :  { %v3901_v3 = vpop.f32.mrf.mxu2 }
 0x175   :  { %4287 = vst [vmem:[#allocation43_spill] sm:$0xff] %v3901_v3 }
 0x176   :  { %v3903_v26 = vpop.f32.mrf.mxu3 }
 0x177   :  { %4288 = vst [vmem:[#allocation44_spill] sm:$0xff] %v3903_v26 }
 0x184   :  { %v3905_v4 = vpop.f32.mrf.mxu0 }
 0x185   :  { %4289 = vst [vmem:[#allocation45_spill] sm:$0xff] %v3905_v4  ;;  %v3907_v63 = vpop.f32.mrf.mxu1 }
 0x186   :  { %4290 = vst [vmem:[#allocation46_spill] sm:$0xff] %v3907_v63 }
 0x18c   :  { %v3909_v32 = vpop.f32.mrf.mxu2  ;;  %v3913_v27 = vpop.f32.mrf.mxu0 }
 0x18d   :  { %4291 = vst [vmem:[#allocation47_spill] sm:$0xff] %v3909_v32  ;;  %v3915_v24 = vpop.f32.mrf.mxu1 }
 0x18e   :  { %v3911_v35 = vpop.f32.mrf.mxu3  ;;  %4293 = vst [vmem:[#allocation49_spill] sm:$0xff] %v3913_v27 }
 0x18f   :  { %4292 = vst [vmem:[#allocation48_spill] sm:$0xff] %v3911_v35 }
 0x190   :  { %4294 = vst [vmem:[#allocation50_spill] sm:$0xff] %v3915_v24 }
 0x194   :  { %v3917_v22 = vpop.f32.mrf.mxu2 }
 0x195   :  { %4295 = vst [vmem:[#allocation51_spill] sm:$0xff] %v3917_v22 }
 0x196   :  { %v3919_v19 = vpop.f32.mrf.mxu3 }
 0x197   :  { %4296 = vst [vmem:[#allocation52_spill] sm:$0xff] %v3919_v19 }
 0x1a4   :  { %v1021_v18 = vpop.f32.mrf.mxu0 }
 0x1a5   :  { %v1068_v3 = vadd.f32 %v1021_v18, %v3674_v37  ;;  %v1035_v26 = vpop.f32.mrf.mxu1 }
 0x1a6   :  { %v1069_v4 = vadd.f32 %v1035_v26, %v3679_v43 }
 0x1a7   :  { %v1076_v1 = vmul.f32 0.5, %v1068_v3 }
 0x1a8   :  { %v1084_v63 = vmul.f32 0.5, %v1069_v4 }
 0x1a9   :  { %3058 = vtanh.f32 %v1076_v1 }
 0x1aa   :  { %3060 = vtanh.f32 %v1084_v63 }
 0x1ac   :  { %v1049_v32 = vpop.f32.mrf.mxu2  ;;  %v1023_v0 = vpop.f32.mrf.mxu0 }
 0x1ad   :  { %v1070_v35 = vadd.f32 %v1049_v32, %v3696_v33  ;;  %v1063_v27 = vpop.f32.mrf.mxu3  ;;  %v1072_v24 = vadd.f32 %v1023_v0, %v3709_v5  ;;  %v1037_v22 = vpop.f32.mrf.mxu1 }
 0x1ae   :  { %v1073_v19 = vadd.f32 %v1037_v22, %v3714_v9  ;;  %v1071_v1 = vadd.f32 %v1063_v27, %v3704_v57 }
 0x1af   :  { %v3059_v59 = vpop.eup %3058  ;;  %3062 = vtanh.f32 %v1070_v35  ;;  %v1077_v37 = vmul.f32 0.5, %v1072_v24 }
 0x1b0   :  { %v3061_v18 = vpop.eup %3060  ;;  %v1080_v56 = vmul.f32 0.5, %v3059_v59  ;;  %v1085_v43 = vmul.f32 0.5, %v1073_v19  ;;  %v1094_v3 = vmul.f32 0.5, %v1071_v1 }
 0x1b1   :  { %v1088_v26 = vmul.f32 0.5, %v3061_v18  ;;  %3064 = vtanh.f32 %v1077_v37 }
 0x1b2   :  { %3066 = vtanh.f32 %v1085_v43  ;;  %v1082_v33 = vadd.f32 0.5, %v1080_v56 }
 0x1b3   :  { %v1090_v4 = vadd.f32 0.5, %v1088_v26 }
 0x1b4   :  { %v1051_v63 = vpop.f32.mrf.mxu2 }
 0x1b5   :  { %v1074_v32 = vadd.f32 %v1051_v63, %v3737_v47  ;;  %v1065_v5 = vpop.f32.mrf.mxu3  ;;  %v3063_v0 = vpop.eup %3062  ;;  %v1102_v59 = vmul.f32 0.0, %v1090_v4 }
 0x1b6   :  { %v1075_v9 = vadd.f32 %v1065_v5, %v3739_v48  ;;  %v1104_v19 = vmul.f32 %v3063_v0, %v1082_v33 }
 0x1b7   :  { %3068 = vtanh.f32 %v1074_v32  ;;  %v3065_v24 = vpop.eup %3064 }
 0x1b8   :  { %v1095_v22 = vmul.f32 0.5, %v1075_v9  ;;  %v3067_v35 = vpop.eup %3066  ;;  %3070 = vtanh.f32 %v1094_v3  ;;  %v1081_v57 = vmul.f32 0.5, %v3065_v24  ;;  %v3929_v18 = vadd.f32 %v1104_v19, %v1102_v59 }
 0x1b9   :  { %v1089_v27 = vmul.f32 0.5, %v3067_v35 }
 0x1ba   :  { %3072 = vtanh.f32 %v1095_v22  ;;  %v1083_v37 = vadd.f32 0.5, %v1081_v57 }
 0x1bb   :  { %v1091_v47 = vadd.f32 0.5, %v1089_v27  ;;  %3074 = vtanh.f32 %v3929_v18 }
 0x1bd   :  { %v3069_v56 = vpop.eup %3068  ;;  %v1103_v26 = vmul.f32 0.0, %v1091_v47 }
 0x1be   :  { %v1105_v43 = vmul.f32 %v3069_v56, %v1083_v37  ;;  %v3071_v1 = vpop.eup %3070 }
 0x1bf   :  { %v1098_v33 = vmul.f32 0.5, %v3071_v1 }
 0x1c0   :  { %v3073_v63 = vpop.eup %3072  ;;  %v3932_v48 = vadd.f32 %v1105_v43, %v1103_v26 }
 0x1c1   :  { %v1099_v4 = vmul.f32 0.5, %v3073_v63  ;;  %v3075_v32 = vpop.eup %3074  ;;  %v1100_v5 = vadd.f32 0.5, %v1098_v33 }
 0x1c2   :  { %3076 = vtanh.f32 %v3932_v48 }
 0x1c3   :  { %v1101_v0 = vadd.f32 0.5, %v1099_v4  ;;  %v1110_v9 = vmul.f32 %v3075_v32, %v1100_v5 }
 0x1c8   :  { %v3077_v3 = vpop.eup %3076 }
 0x1c9   :  { %v1111_v22 = vmul.f32 %v3077_v3, %v1101_v0 }
 0x1cb   :  { %v1120_v24 = vpack.c.bf16 %v1111_v22, %v1110_v9 }
 0x1cd   :  { %1129 = vmatmul.bf16.vlgmr.msrb.gmra.mxu0 %v1120_v24  ;;  %1143 = vmatmul.bf16.vlgmr.msrb.gmra.mxu1 %v1120_v24 }
 0x1ce   :  { %1157 = vmatmul.bf16.vlgmr.msrb.gmra.mxu2 %v1120_v24  ;;  %1171 = vmatmul.bf16.vlgmr.msrb.gmra.mxu3 %v1120_v24 }
 0x1cf   :  { %1339 = vmatpush.bf16.msrb.mxu0 %v3626_v29  ;;  %1353 = vmatpush.bf16.msrb.mxu1 %v3628_v34 }
 0x1d0   :  { %1367 = vmatpush.bf16.msrb.mxu2 %v3630_v38  ;;  %1381 = vmatpush.bf16.msrb.mxu3 %v3633_v50 }
 0x1d3   :  { %1340 = vmatpush.bf16.msrb.mxu0 %v3642_v60  ;;  %1354 = vmatpush.bf16.msrb.mxu1 %v3646_v61 }
 0x1d4   :  { %1368 = vmatpush.bf16.msrb.mxu2 %v3648_v62  ;;  %1382 = vmatpush.bf16.msrb.mxu3 %v3651_v2 }
 0x1d7   :  { %1341 = vmatpush.bf16.msrb.mxu0 %v3654_v11  ;;  %1355 = vmatpush.bf16.msrb.mxu1 %v3658_v13 }
 0x1d8   :  { %1369 = vmatpush.bf16.msrb.mxu2 %v3660_v14  ;;  %1383 = vmatpush.bf16.msrb.mxu3 %v3663_v20 }
 0x1db   :  { %1342 = vmatpush.bf16.msrb.mxu0 %v3666_v28  ;;  %1356 = vmatpush.bf16.msrb.mxu1 %v3670_v30 }
 0x1dc   :  { %1370 = vmatpush.bf16.msrb.mxu2 %v3672_v31  ;;  %1384 = vmatpush.bf16.msrb.mxu3 %v3677_v39 }
 0x1df   :  { %1343 = vmatpush.bf16.msrb.mxu0 %v3682_v49  ;;  %1357 = vmatpush.bf16.msrb.mxu1 %v3686_v51 }
 0x1e0   :  { %1371 = vmatpush.bf16.msrb.mxu2 %v3688_v52  ;;  %1385 = vmatpush.bf16.msrb.mxu3 %v3691_v7 }
 0x1e3   :  { %1344 = vmatpush.bf16.msrb.mxu0 %v3694_v25  ;;  %1358 = vmatpush.bf16.msrb.mxu1 %v3700_v44 }
 0x1e4   :  { %1372 = vmatpush.bf16.msrb.mxu2 %v3702_v45  ;;  %1386 = vmatpush.bf16.msrb.mxu3 %v3707_v58 }
 0x1e7   :  { %1345 = vmatpush.bf16.msrb.mxu0 %v3712_v6  ;;  %1359 = vmatpush.bf16.msrb.mxu1 %v3718_v10 }
 0x1e8   :  { %1373 = vmatpush.bf16.msrb.mxu2 %v3720_v15  ;;  %1387 = vmatpush.bf16.msrb.mxu3 %v3723_v23 }
 0x1eb   :  { %1346 = vmatpush.bf16.msrb.mxu0 %v3726_v36  ;;  %1360 = vmatpush.bf16.msrb.mxu1 %v3730_v40 }
 0x1ec   :  { %1374 = vmatpush.bf16.msrb.mxu2 %v3732_v41  ;;  %1388 = vmatpush.bf16.msrb.mxu3 %v3735_v42 }
 0x24a   :  { %v1130_v59 = vpop.f32.mrf.mxu0  ;;  %v1144_v19 = vpop.f32.mrf.mxu1 }
 0x24b   :  { %v1177_v35 = vadd.f32 %v1130_v59, %v3741_v53  ;;  %v1178_v57 = vadd.f32 %v1144_v19, %v3744_v54 }
 0x24d   :  { %v1185_v27 = vmul.f32 0.5, %v1177_v35  ;;  %v1193_v37 = vmul.f32 0.5, %v1178_v57 }
 0x24f   :  { %3078 = vtanh.f32 %v1185_v27 }
 0x250   :  { %3080 = vtanh.f32 %v1193_v37 }
 0x251   :  { %v1158_v56 = vpop.f32.mrf.mxu2  ;;  %v1172_v47 = vpop.f32.mrf.mxu3 }
 0x252   :  { %v1179_v43 = vadd.f32 %v1158_v56, %v3754_v8  ;;  %v1132_v26 = vpop.f32.mrf.mxu0  ;;  %v1146_v1 = vpop.f32.mrf.mxu1  ;;  %v1180_v0 = vadd.f32 %v1172_v47, %v3757_v12 }
 0x253   :  { %v1181_v63 = vadd.f32 %v1132_v26, %v3760_v16  ;;  %v1182_v33 = vadd.f32 %v1146_v1, %v3764_v17 }
 0x254   :  { %3082 = vtanh.f32 %v1179_v43  ;;  %v1203_v19 = vmul.f32 0.5, %v1180_v0 }
 0x255   :  { %v3079_v4 = vpop.eup %3078  ;;  %v1186_v32 = vmul.f32 0.5, %v1181_v63  ;;  %v1194_v53 = vmul.f32 0.5, %v1182_v33 }
 0x256   :  { %v3081_v5 = vpop.eup %3080  ;;  %v1189_v54 = vmul.f32 0.5, %v3079_v4 }
 0x257   :  { %v1197_v3 = vmul.f32 0.5, %v3081_v5  ;;  %3084 = vtanh.f32 %v1186_v32 }
 0x258   :  { %3086 = vtanh.f32 %v1194_v53  ;;  %v1191_v9 = vadd.f32 0.5, %v1189_v54 }
 0x259   :  { %v1199_v22 = vadd.f32 0.5, %v1197_v3  ;;  %v1160_v8 = vpop.f32.mrf.mxu2  ;;  %v1174_v24 = vpop.f32.mrf.mxu3 }
 0x25a   :  { %v3083_v59 = vpop.eup %3082  ;;  %v1183_v16 = vadd.f32 %v1160_v8, %v3771_v21  ;;  %v1184_v17 = vadd.f32 %v1174_v24, %v3774_v46 }
 0x25b   :  { %v1211_v27 = vmul.f32 %v1199_v22, %v3929_v18  ;;  %v1213_v37 = vmul.f32 %v3083_v59, %v1191_v9 }
 0x25c   :  { %3088 = vtanh.f32 %v1183_v16  ;;  %v1204_v35 = vmul.f32 0.5, %v1184_v17 }
 0x25d   :  { %v3085_v57 = vpop.eup %3084  ;;  %3090 = vtanh.f32 %v1203_v19  ;;  %v3976_v26 = vadd.f32 %v1213_v37, %v1211_v27  ;;  %v4297_v19 = vld [vmem:[#allocation6_spill] sm:$0xff]  ;;  %v4298_v37 = vld [vmem:[#allocation7_spill] sm:$0xff] }
 0x25e   :  { %v3087_v12 = vpop.eup %3086  ;;  %v1190_v56 = vmul.f32 0.5, %v3085_v57  ;;  %3092 = vtanh.f32 %v1204_v35 }
 0x25f   :  { %v1198_v47 = vmul.f32 0.5, %v3087_v12  ;;  %3094 = vtanh.f32 %v3976_v26 }
 0x260   :  { %v1192_v43 = vadd.f32 0.5, %v1190_v56 }
 0x261   :  { %v1200_v1 = vadd.f32 0.5, %v1198_v47 }
 0x262   :  { %v3089_v63 = vpop.eup %3088 }
 0x263   :  { %v1212_v21 = vmul.f32 %v1200_v1, %v3932_v48  ;;  %v1214_v33 = vmul.f32 %v3089_v63, %v1192_v43  ;;  %v3091_v46 = vpop.eup %3090  ;;  %v4299_v43 = vld [vmem:[#allocation9_spill] sm:$0xff]  ;;  %v4300_v63 = vld [vmem:[#allocation10_spill] sm:$0xff] }
 0x264   :  { %v3093_v4 = vpop.eup %3092  ;;  %v1207_v18 = vmul.f32 0.5, %v3091_v46 }
 0x265   :  { %v3980_v32 = vadd.f32 %v1214_v33, %v1212_v21  ;;  %v1208_v53 = vmul.f32 0.5, %v3093_v4  ;;  %v3095_v5 = vpop.eup %3094 }
 0x266   :  { %v1209_v54 = vadd.f32 0.5, %v1207_v18 }
 0x267   :  { %3096 = vtanh.f32 %v3980_v32  ;;  %v1210_v0 = vadd.f32 0.5, %v1208_v53  ;;  %v4301_v53 = vld [vmem:[#allocation8_spill] sm:$0xff] }
 0x268   :  { %v1219_v9 = vmul.f32 %v3095_v5, %v1209_v54 }
 0x26d   :  { %v3097_v3 = vpop.eup %3096 }
 0x26e   :  { %v1220_v22 = vmul.f32 %v3097_v3, %v1210_v0 }
 0x270   :  { %v1229_v8 = vpack.c.bf16 %v1220_v22, %v1219_v9 }
 0x272   :  { %1238 = vmatmul.bf16.vlgmr.msra.gmra.mxu0 %v1229_v8  ;;  %1252 = vmatmul.bf16.vlgmr.msra.gmra.mxu1 %v1229_v8 }
 0x273   :  { %1266 = vmatmul.bf16.vlgmr.msra.gmra.mxu2 %v1229_v8  ;;  %1280 = vmatmul.bf16.vlgmr.msra.gmra.mxu3 %v1229_v8 }
 0x274   :  { %1448 = vmatpush.bf16.msra.mxu0 %v3626_v29  ;;  %1462 = vmatpush.bf16.msra.mxu1 %v3628_v34 }
 0x275   :  { %1476 = vmatpush.bf16.msra.mxu2 %v3630_v38  ;;  %1490 = vmatpush.bf16.msra.mxu3 %v3633_v50 }
 0x278   :  { %1449 = vmatpush.bf16.msra.mxu0 %v3642_v60  ;;  %1463 = vmatpush.bf16.msra.mxu1 %v3646_v61 }
 0x279   :  { %1477 = vmatpush.bf16.msra.mxu2 %v3648_v62  ;;  %1491 = vmatpush.bf16.msra.mxu3 %v3651_v2 }
 0x27c   :  { %1450 = vmatpush.bf16.msra.mxu0 %v3654_v11  ;;  %1464 = vmatpush.bf16.msra.mxu1 %v3658_v13 }
 0x27d   :  { %1478 = vmatpush.bf16.msra.mxu2 %v3660_v14  ;;  %1492 = vmatpush.bf16.msra.mxu3 %v3663_v20 }
 0x280   :  { %1451 = vmatpush.bf16.msra.mxu0 %v3666_v28  ;;  %1465 = vmatpush.bf16.msra.mxu1 %v3670_v30 }
 0x281   :  { %1479 = vmatpush.bf16.msra.mxu2 %v3672_v31  ;;  %1493 = vmatpush.bf16.msra.mxu3 %v3677_v39 }
 0x284   :  { %1452 = vmatpush.bf16.msra.mxu0 %v3682_v49  ;;  %1466 = vmatpush.bf16.msra.mxu1 %v3686_v51 }
 0x285   :  { %1480 = vmatpush.bf16.msra.mxu2 %v3688_v52  ;;  %1494 = vmatpush.bf16.msra.mxu3 %v3691_v7 }
 0x288   :  { %1453 = vmatpush.bf16.msra.mxu0 %v3694_v25  ;;  %1467 = vmatpush.bf16.msra.mxu1 %v3700_v44 }
 0x289   :  { %1481 = vmatpush.bf16.msra.mxu2 %v3702_v45  ;;  %1495 = vmatpush.bf16.msra.mxu3 %v3707_v58 }
 0x28c   :  { %1454 = vmatpush.bf16.msra.mxu0 %v3712_v6  ;;  %1468 = vmatpush.bf16.msra.mxu1 %v3718_v10 }
 0x28d   :  { %1482 = vmatpush.bf16.msra.mxu2 %v3720_v15  ;;  %1496 = vmatpush.bf16.msra.mxu3 %v3723_v23 }
 0x290   :  { %1455 = vmatpush.bf16.msra.mxu0 %v3726_v36  ;;  %1469 = vmatpush.bf16.msra.mxu1 %v3730_v40 }
 0x291   :  { %1483 = vmatpush.bf16.msra.mxu2 %v3732_v41  ;;  %1497 = vmatpush.bf16.msra.mxu3 %v3735_v42 }
 0x2ef   :  { %v1239_v48 = vpop.f32.mrf.mxu0  ;;  %v1253_v24 = vpop.f32.mrf.mxu1 }
 0x2f0   :  { %v1286_v59 = vadd.f32 %v1239_v48, %v3776_v55  ;;  %v1287_v16 = vadd.f32 %v1253_v24, %v4297_v19  ;;  %v4302_v24 = vld [vmem:[#allocation11_spill] sm:$0xff]  ;;  %v4303_v19 = vld [vmem:[#allocation12_spill] sm:$0xff] }
 0x2f2   :  { %v1294_v17 = vmul.f32 0.5, %v1286_v59  ;;  %v1302_v35 = vmul.f32 0.5, %v1287_v16 }
 0x2f4   :  { %3098 = vtanh.f32 %v1294_v17 }
 0x2f5   :  { %3100 = vtanh.f32 %v1302_v35 }
 0x2f6   :  { %v1267_v57 = vpop.f32.mrf.mxu2  ;;  %v1281_v27 = vpop.f32.mrf.mxu3 }
 0x2f7   :  { %v1288_v12 = vadd.f32 %v1267_v57, %v4298_v37  ;;  %v1241_v56 = vpop.f32.mrf.mxu0  ;;  %v1255_v47 = vpop.f32.mrf.mxu1  ;;  %v1289_v5 = vadd.f32 %v1281_v27, %v4301_v53 }
 0x2f8   :  { %v1290_v1 = vadd.f32 %v1241_v56, %v4299_v43  ;;  %v1291_v21 = vadd.f32 %v1255_v47, %v4300_v63 }
 0x2f9   :  { %3102 = vtanh.f32 %v1288_v12  ;;  %v1312_v48 = vmul.f32 0.5, %v1289_v5 }
 0x2fa   :  { %v3099_v33 = vpop.eup %3098  ;;  %v1295_v46 = vmul.f32 0.5, %v1290_v1  ;;  %v1303_v55 = vmul.f32 0.5, %v1291_v21 }
 0x2fb   :  { %v3101_v4 = vpop.eup %3100  ;;  %v1298_v18 = vmul.f32 0.5, %v3099_v33 }
 0x2fc   :  { %v1306_v54 = vmul.f32 0.5, %v3101_v4  ;;  %3104 = vtanh.f32 %v1295_v46 }
 0x2fd   :  { %3106 = vtanh.f32 %v1303_v55  ;;  %v1300_v0 = vadd.f32 0.5, %v1298_v18 }
 0x2fe   :  { %v1308_v3 = vadd.f32 0.5, %v1306_v54  ;;  %v1269_v9 = vpop.f32.mrf.mxu2  ;;  %v1283_v22 = vpop.f32.mrf.mxu3 }
 0x2ff   :  { %v3103_v8 = vpop.eup %3102  ;;  %v1292_v59 = vadd.f32 %v1269_v9, %v4302_v24  ;;  %v1293_v16 = vadd.f32 %v1283_v22, %v4303_v19 }
 0x300   :  { %v1320_v57 = vmul.f32 %v1308_v3, %v3976_v26  ;;  %v1322_v37 = vmul.f32 %v3103_v8, %v1300_v0 }
 0x301   :  { %3108 = vtanh.f32 %v1292_v59  ;;  %v1313_v17 = vmul.f32 0.5, %v1293_v16  ;;  %v4305_v59 = vld [vmem:[#allocation14_spill] sm:$0xff] }
 0x302   :  { %v3105_v35 = vpop.eup %3104  ;;  %3110 = vtanh.f32 %v1312_v48  ;;  %v4024_v43 = vadd.f32 %v1322_v37, %v1320_v57  ;;  %v4304_v48 = vld [vmem:[#allocation13_spill] sm:$0xff]  ;;  %v4306_v37 = vld [vmem:[#allocation15_spill] sm:$0xff] }
 0x303   :  { %v3107_v27 = vpop.eup %3106  ;;  %v1299_v12 = vmul.f32 0.5, %v3105_v35  ;;  %3112 = vtanh.f32 %v1313_v17 }
 0x304   :  { %v1307_v56 = vmul.f32 0.5, %v3107_v27  ;;  %3114 = vtanh.f32 %v4024_v43 }
 0x305   :  { %v1301_v47 = vadd.f32 0.5, %v1299_v12 }
 0x306   :  { %v1309_v1 = vadd.f32 0.5, %v1307_v56 }
 0x307   :  { %v3109_v63 = vpop.eup %3108 }
 0x308   :  { %v1321_v21 = vmul.f32 %v1309_v1, %v3980_v32  ;;  %v1323_v33 = vmul.f32 %v3109_v63, %v1301_v47  ;;  %v3111_v46 = vpop.eup %3110  ;;  %v4307_v47 = vld [vmem:[#allocation17_spill] sm:$0xff]  ;;  %v4308_v63 = vld [vmem:[#allocation18_spill] sm:$0xff] }
 0x309   :  { %v3113_v55 = vpop.eup %3112  ;;  %v1316_v26 = vmul.f32 0.5, %v3111_v46 }
 0x30a   :  { %v4028_v4 = vadd.f32 %v1323_v33, %v1321_v21  ;;  %v1317_v18 = vmul.f32 0.5, %v3113_v55  ;;  %v3115_v53 = vpop.eup %3114 }
 0x30b   :  { %v1318_v5 = vadd.f32 0.5, %v1316_v26 }
 0x30c   :  { %3116 = vtanh.f32 %v4028_v4  ;;  %v1319_v54 = vadd.f32 0.5, %v1317_v18 }
 0x30d   :  { %v1328_v3 = vmul.f32 %v3115_v53, %v1318_v5  ;;  %v4309_v53 = vld [vmem:[#allocation16_spill] sm:$0xff] }
 0x312   :  { %v3117_v0 = vpop.eup %3116 }
 0x313   :  { %v1329_v9 = vmul.f32 %v3117_v0, %v1319_v54 }
 0x315   :  { %v1338_v22 = vpack.c.bf16 %v1329_v9, %v1328_v3 }
 0x317   :  { %1347 = vmatmul.bf16.vlgmr.msrb.gmra.mxu0 %v1338_v22  ;;  %1361 = vmatmul.bf16.vlgmr.msrb.gmra.mxu1 %v1338_v22 }
 0x318   :  { %1375 = vmatmul.bf16.vlgmr.msrb.gmra.mxu2 %v1338_v22  ;;  %1389 = vmatmul.bf16.vlgmr.msrb.gmra.mxu3 %v1338_v22 }
 0x319   :  { %1557 = vmatpush.bf16.msrb.mxu0 %v3626_v29  ;;  %1571 = vmatpush.bf16.msrb.mxu1 %v3628_v34 }
 0x31a   :  { %1585 = vmatpush.bf16.msrb.mxu2 %v3630_v38  ;;  %1599 = vmatpush.bf16.msrb.mxu3 %v3633_v50 }
 0x31d   :  { %1558 = vmatpush.bf16.msrb.mxu0 %v3642_v60  ;;  %1572 = vmatpush.bf16.msrb.mxu1 %v3646_v61 }
 0x31e   :  { %1586 = vmatpush.bf16.msrb.mxu2 %v3648_v62  ;;  %1600 = vmatpush.bf16.msrb.mxu3 %v3651_v2 }
 0x321   :  { %1559 = vmatpush.bf16.msrb.mxu0 %v3654_v11  ;;  %1573 = vmatpush.bf16.msrb.mxu1 %v3658_v13 }
 0x322   :  { %1587 = vmatpush.bf16.msrb.mxu2 %v3660_v14  ;;  %1601 = vmatpush.bf16.msrb.mxu3 %v3663_v20 }
 0x325   :  { %1560 = vmatpush.bf16.msrb.mxu0 %v3666_v28  ;;  %1574 = vmatpush.bf16.msrb.mxu1 %v3670_v30 }
 0x326   :  { %1588 = vmatpush.bf16.msrb.mxu2 %v3672_v31  ;;  %1602 = vmatpush.bf16.msrb.mxu3 %v3677_v39 }
 0x329   :  { %1561 = vmatpush.bf16.msrb.mxu0 %v3682_v49  ;;  %1575 = vmatpush.bf16.msrb.mxu1 %v3686_v51 }
 0x32a   :  { %1589 = vmatpush.bf16.msrb.mxu2 %v3688_v52  ;;  %1603 = vmatpush.bf16.msrb.mxu3 %v3691_v7 }
 0x32d   :  { %1562 = vmatpush.bf16.msrb.mxu0 %v3694_v25  ;;  %1576 = vmatpush.bf16.msrb.mxu1 %v3700_v44 }
 0x32e   :  { %1590 = vmatpush.bf16.msrb.mxu2 %v3702_v45  ;;  %1604 = vmatpush.bf16.msrb.mxu3 %v3707_v58 }
 0x331   :  { %1563 = vmatpush.bf16.msrb.mxu0 %v3712_v6  ;;  %1577 = vmatpush.bf16.msrb.mxu1 %v3718_v10 }
 0x332   :  { %1591 = vmatpush.bf16.msrb.mxu2 %v3720_v15  ;;  %1605 = vmatpush.bf16.msrb.mxu3 %v3723_v23 }
 0x335   :  { %1564 = vmatpush.bf16.msrb.mxu0 %v3726_v36  ;;  %1578 = vmatpush.bf16.msrb.mxu1 %v3730_v40 }
 0x336   :  { %1592 = vmatpush.bf16.msrb.mxu2 %v3732_v41  ;;  %1606 = vmatpush.bf16.msrb.mxu3 %v3735_v42 }
 0x394   :  { %v1348_v32 = vpop.f32.mrf.mxu0  ;;  %v1362_v8 = vpop.f32.mrf.mxu1 }
 0x395   :  { %v1395_v24 = vadd.f32 %v1348_v32, %v4304_v48  ;;  %v1396_v19 = vadd.f32 %v1362_v8, %v4305_v59  ;;  %v4310_v48 = vld [vmem:[#allocation19_spill] sm:$0xff]  ;;  %v4311_v59 = vld [vmem:[#allocation20_spill] sm:$0xff] }
 0x397   :  { %v1403_v16 = vmul.f32 0.5, %v1395_v24  ;;  %v1411_v17 = vmul.f32 0.5, %v1396_v19 }
 0x399   :  { %3118 = vtanh.f32 %v1403_v16 }
 0x39a   :  { %3120 = vtanh.f32 %v1411_v17 }
 0x39b   :  { %v1376_v35 = vpop.f32.mrf.mxu2  ;;  %v1390_v57 = vpop.f32.mrf.mxu3 }
 0x39c   :  { %v1397_v27 = vadd.f32 %v1376_v35, %v4306_v37  ;;  %v1350_v12 = vpop.f32.mrf.mxu0  ;;  %v1364_v56 = vpop.f32.mrf.mxu1  ;;  %v1398_v5 = vadd.f32 %v1390_v57, %v4309_v53 }
 0x39d   :  { %v1399_v1 = vadd.f32 %v1350_v12, %v4307_v47  ;;  %v1400_v21 = vadd.f32 %v1364_v56, %v4308_v63 }
 0x39e   :  { %3122 = vtanh.f32 %v1397_v27  ;;  %v1421_v8 = vmul.f32 0.5, %v1398_v5 }
 0x39f   :  { %v3119_v33 = vpop.eup %3118  ;;  %v1404_v46 = vmul.f32 0.5, %v1399_v1  ;;  %v1412_v55 = vmul.f32 0.5, %v1400_v21 }
 0x3a0   :  { %v3121_v26 = vpop.eup %3120  ;;  %v1407_v18 = vmul.f32 0.5, %v3119_v33 }
 0x3a1   :  { %v1415_v54 = vmul.f32 0.5, %v3121_v26  ;;  %3124 = vtanh.f32 %v1404_v46 }
 0x3a2   :  { %3126 = vtanh.f32 %v1412_v55  ;;  %v1409_v0 = vadd.f32 0.5, %v1407_v18 }
 0x3a3   :  { %v1417_v3 = vadd.f32 0.5, %v1415_v54  ;;  %v1378_v9 = vpop.f32.mrf.mxu2  ;;  %v1392_v22 = vpop.f32.mrf.mxu3 }
 0x3a4   :  { %v3123_v32 = vpop.eup %3122  ;;  %v1401_v24 = vadd.f32 %v1378_v9, %v4310_v48  ;;  %v1402_v19 = vadd.f32 %v1392_v22, %v4311_v59 }
 0x3a5   :  { %v1429_v35 = vmul.f32 %v1417_v3, %v4024_v43  ;;  %v1431_v37 = vmul.f32 %v3123_v32, %v1409_v0 }
 0x3a6   :  { %3128 = vtanh.f32 %v1401_v24  ;;  %v1422_v16 = vmul.f32 0.5, %v1402_v19  ;;  %v4313_v24 = vld [vmem:[#allocation22_spill] sm:$0xff] }
 0x3a7   :  { %v3125_v17 = vpop.eup %3124  ;;  %3130 = vtanh.f32 %v1421_v8  ;;  %v4072_v47 = vadd.f32 %v1431_v37, %v1429_v35  ;;  %v4312_v8 = vld [vmem:[#allocation21_spill] sm:$0xff]  ;;  %v4314_v37 = vld [vmem:[#allocation23_spill] sm:$0xff] }
 0x3a8   :  { %v3127_v57 = vpop.eup %3126  ;;  %v1408_v27 = vmul.f32 0.5, %v3125_v17  ;;  %3132 = vtanh.f32 %v1422_v16 }
 0x3a9   :  { %v1416_v12 = vmul.f32 0.5, %v3127_v57  ;;  %3134 = vtanh.f32 %v4072_v47 }
 0x3aa   :  { %v1410_v56 = vadd.f32 0.5, %v1408_v27 }
 0x3ab   :  { %v1418_v1 = vadd.f32 0.5, %v1416_v12 }
 0x3ac   :  { %v3129_v63 = vpop.eup %3128 }
 0x3ad   :  { %v1430_v21 = vmul.f32 %v1418_v1, %v4028_v4  ;;  %v1432_v33 = vmul.f32 %v3129_v63, %v1410_v56  ;;  %v3131_v46 = vpop.eup %3130  ;;  %v4315_v56 = vld [vmem:[#allocation25_spill] sm:$0xff]  ;;  %v4316_v63 = vld [vmem:[#allocation26_spill] sm:$0xff] }
 0x3ae   :  { %v3133_v55 = vpop.eup %3132  ;;  %v1425_v43 = vmul.f32 0.5, %v3131_v46 }
 0x3af   :  { %v4076_v26 = vadd.f32 %v1432_v33, %v1430_v21  ;;  %v1426_v18 = vmul.f32 0.5, %v3133_v55  ;;  %v3135_v53 = vpop.eup %3134 }
 0x3b0   :  { %v1427_v5 = vadd.f32 0.5, %v1425_v43 }
 0x3b1   :  { %3136 = vtanh.f32 %v4076_v26  ;;  %v1428_v54 = vadd.f32 0.5, %v1426_v18 }
 0x3b2   :  { %v1437_v3 = vmul.f32 %v3135_v53, %v1427_v5  ;;  %v4317_v53 = vld [vmem:[#allocation24_spill] sm:$0xff] }
 0x3b7   :  { %v3137_v0 = vpop.eup %3136 }
 0x3b8   :  { %v1438_v9 = vmul.f32 %v3137_v0, %v1428_v54 }
 0x3ba   :  { %v1447_v22 = vpack.c.bf16 %v1438_v9, %v1437_v3 }
 0x3bc   :  { %1456 = vmatmul.bf16.vlgmr.msra.gmra.mxu0 %v1447_v22  ;;  %1470 = vmatmul.bf16.vlgmr.msra.gmra.mxu1 %v1447_v22 }
 0x3bd   :  { %1484 = vmatmul.bf16.vlgmr.msra.gmra.mxu2 %v1447_v22  ;;  %1498 = vmatmul.bf16.vlgmr.msra.gmra.mxu3 %v1447_v22 }
 0x3be   :  { %1666 = vmatpush.bf16.msra.mxu0 %v3626_v29  ;;  %1680 = vmatpush.bf16.msra.mxu1 %v3628_v34 }
 0x3bf   :  { %1694 = vmatpush.bf16.msra.mxu2 %v3630_v38  ;;  %1708 = vmatpush.bf16.msra.mxu3 %v3633_v50 }
 0x3c2   :  { %1667 = vmatpush.bf16.msra.mxu0 %v3642_v60  ;;  %1681 = vmatpush.bf16.msra.mxu1 %v3646_v61 }
 0x3c3   :  { %1695 = vmatpush.bf16.msra.mxu2 %v3648_v62  ;;  %1709 = vmatpush.bf16.msra.mxu3 %v3651_v2 }
 0x3c6   :  { %1668 = vmatpush.bf16.msra.mxu0 %v3654_v11  ;;  %1682 = vmatpush.bf16.msra.mxu1 %v3658_v13 }
 0x3c7   :  { %1696 = vmatpush.bf16.msra.mxu2 %v3660_v14  ;;  %1710 = vmatpush.bf16.msra.mxu3 %v3663_v20 }
 0x3ca   :  { %1669 = vmatpush.bf16.msra.mxu0 %v3666_v28  ;;  %1683 = vmatpush.bf16.msra.mxu1 %v3670_v30 }
 0x3cb   :  { %1697 = vmatpush.bf16.msra.mxu2 %v3672_v31  ;;  %1711 = vmatpush.bf16.msra.mxu3 %v3677_v39 }
 0x3ce   :  { %1670 = vmatpush.bf16.msra.mxu0 %v3682_v49  ;;  %1684 = vmatpush.bf16.msra.mxu1 %v3686_v51 }
 0x3cf   :  { %1698 = vmatpush.bf16.msra.mxu2 %v3688_v52  ;;  %1712 = vmatpush.bf16.msra.mxu3 %v3691_v7 }
 0x3d2   :  { %1671 = vmatpush.bf16.msra.mxu0 %v3694_v25  ;;  %1685 = vmatpush.bf16.msra.mxu1 %v3700_v44 }
 0x3d3   :  { %1699 = vmatpush.bf16.msra.mxu2 %v3702_v45  ;;  %1713 = vmatpush.bf16.msra.mxu3 %v3707_v58 }
 0x3d6   :  { %1672 = vmatpush.bf16.msra.mxu0 %v3712_v6  ;;  %1686 = vmatpush.bf16.msra.mxu1 %v3718_v10 }
 0x3d7   :  { %1700 = vmatpush.bf16.msra.mxu2 %v3720_v15  ;;  %1714 = vmatpush.bf16.msra.mxu3 %v3723_v23 }
 0x3da   :  { %1673 = vmatpush.bf16.msra.mxu0 %v3726_v36  ;;  %1687 = vmatpush.bf16.msra.mxu1 %v3730_v40 }
 0x3db   :  { %1701 = vmatpush.bf16.msra.mxu2 %v3732_v41  ;;  %1715 = vmatpush.bf16.msra.mxu3 %v3735_v42 }
 0x439   :  { %v1457_v4 = vpop.f32.mrf.mxu0  ;;  %v1471_v32 = vpop.f32.mrf.mxu1 }
 0x43a   :  { %v1504_v48 = vadd.f32 %v1457_v4, %v4312_v8  ;;  %v1505_v59 = vadd.f32 %v1471_v32, %v4313_v24  ;;  %v4318_v8 = vld [vmem:[#allocation27_spill] sm:$0xff]  ;;  %v4319_v24 = vld [vmem:[#allocation28_spill] sm:$0xff] }
 0x43c   :  { %v1512_v19 = vmul.f32 0.5, %v1504_v48  ;;  %v1520_v16 = vmul.f32 0.5, %v1505_v59 }
 0x43e   :  { %3138 = vtanh.f32 %v1512_v19 }
 0x43f   :  { %3140 = vtanh.f32 %v1520_v16 }
 0x440   :  { %v1485_v17 = vpop.f32.mrf.mxu2  ;;  %v1499_v35 = vpop.f32.mrf.mxu3 }
 0x441   :  { %v1506_v57 = vadd.f32 %v1485_v17, %v4314_v37  ;;  %v1459_v27 = vpop.f32.mrf.mxu0  ;;  %v1473_v12 = vpop.f32.mrf.mxu1  ;;  %v1507_v5 = vadd.f32 %v1499_v35, %v4317_v53 }
 0x442   :  { %v1508_v1 = vadd.f32 %v1459_v27, %v4315_v56  ;;  %v1509_v21 = vadd.f32 %v1473_v12, %v4316_v63 }
 0x443   :  { %3142 = vtanh.f32 %v1506_v57  ;;  %v1530_v32 = vmul.f32 0.5, %v1507_v5 }
 0x444   :  { %v3139_v33 = vpop.eup %3138  ;;  %v1513_v46 = vmul.f32 0.5, %v1508_v1  ;;  %v1521_v55 = vmul.f32 0.5, %v1509_v21 }
 0x445   :  { %v3141_v43 = vpop.eup %3140  ;;  %v1516_v18 = vmul.f32 0.5, %v3139_v33 }
 0x446   :  { %v1524_v54 = vmul.f32 0.5, %v3141_v43  ;;  %3144 = vtanh.f32 %v1513_v46 }
 0x447   :  { %3146 = vtanh.f32 %v1521_v55  ;;  %v1518_v0 = vadd.f32 0.5, %v1516_v18 }
 0x448   :  { %v1526_v3 = vadd.f32 0.5, %v1524_v54  ;;  %v1487_v9 = vpop.f32.mrf.mxu2  ;;  %v1501_v22 = vpop.f32.mrf.mxu3 }
 0x449   :  { %v3143_v4 = vpop.eup %3142  ;;  %v1510_v48 = vadd.f32 %v1487_v9, %v4318_v8  ;;  %v1511_v59 = vadd.f32 %v1501_v22, %v4319_v24 }
 0x44a   :  { %v1538_v17 = vmul.f32 %v1526_v3, %v4072_v47  ;;  %v1540_v37 = vmul.f32 %v3143_v4, %v1518_v0 }
 0x44b   :  { %3148 = vtanh.f32 %v1510_v48  ;;  %v1531_v19 = vmul.f32 0.5, %v1511_v59 }
 0x44c   :  { %v3145_v16 = vpop.eup %3144  ;;  %3150 = vtanh.f32 %v1530_v32  ;;  %v4120_v56 = vadd.f32 %v1540_v37, %v1538_v17  ;;  %v4327_v32 = vld [vmem:[#allocation36_spill] sm:$0xff] }
 0x44d   :  { %v3147_v35 = vpop.eup %3146  ;;  %v1517_v57 = vmul.f32 0.5, %v3145_v16  ;;  %3152 = vtanh.f32 %v1531_v19 }
 0x44e   :  { %v1525_v27 = vmul.f32 0.5, %v3147_v35  ;;  %3154 = vtanh.f32 %v4120_v56 }
 0x44f   :  { %v1519_v12 = vadd.f32 0.5, %v1517_v57 }
 0x450   :  { %v1527_v1 = vadd.f32 0.5, %v1525_v27 }
 0x451   :  { %v3149_v63 = vpop.eup %3148 }
 0x452   :  { %v1539_v21 = vmul.f32 %v1527_v1, %v4076_v26  ;;  %v1541_v33 = vmul.f32 %v3149_v63, %v1519_v12  ;;  %v3151_v46 = vpop.eup %3150  ;;  %v4326_v26 = vld [vmem:[#allocation35_spill] sm:$0xff] }
 0x453   :  { %v3153_v55 = vpop.eup %3152  ;;  %v1534_v47 = vmul.f32 0.5, %v3151_v46 }
 0x454   :  { %v4124_v43 = vadd.f32 %v1541_v33, %v1539_v21  ;;  %v1535_v18 = vmul.f32 0.5, %v3153_v55  ;;  %v3155_v53 = vpop.eup %3154 }
 0x455   :  { %v1536_v5 = vadd.f32 0.5, %v1534_v47 }
 0x456   :  { %3156 = vtanh.f32 %v4124_v43  ;;  %v1537_v54 = vadd.f32 0.5, %v1535_v18 }
 0x457   :  { %v1546_v3 = vmul.f32 %v3155_v53, %v1536_v5 }
 0x45c   :  { %v3157_v0 = vpop.eup %3156 }
 0x45d   :  { %v1547_v9 = vmul.f32 %v3157_v0, %v1537_v54 }
 0x45f   :  { %v1556_v22 = vpack.c.bf16 %v1547_v9, %v1546_v3 }
 0x461   :  { %1565 = vmatmul.bf16.vlgmr.msrb.gmra.mxu0 %v1556_v22  ;;  %1579 = vmatmul.bf16.vlgmr.msrb.gmra.mxu1 %v1556_v22 }
 0x462   :  { %1593 = vmatmul.bf16.vlgmr.msrb.gmra.mxu2 %v1556_v22  ;;  %1607 = vmatmul.bf16.vlgmr.msrb.gmra.mxu3 %v1556_v22  ;;  %v4328_v22 = vld [vmem:[#allocation37_spill] sm:$0xff] }
 0x463   :  { %1775 = vmatpush.bf16.msrb.mxu0 %v3626_v29  ;;  %1789 = vmatpush.bf16.msrb.mxu1 %v3628_v34 }
 0x464   :  { %1803 = vmatpush.bf16.msrb.mxu2 %v3630_v38  ;;  %1817 = vmatpush.bf16.msrb.mxu3 %v3633_v50  ;;  %v4320_v38 = vld [vmem:[#allocation29_spill] sm:$0xff] }
 0x467   :  { %1776 = vmatpush.bf16.msrb.mxu0 %v3642_v60  ;;  %1790 = vmatpush.bf16.msrb.mxu1 %v3646_v61  ;;  %v4321_v60 = vld [vmem:[#allocation30_spill] sm:$0xff] }
 0x468   :  { %1804 = vmatpush.bf16.msrb.mxu2 %v3648_v62  ;;  %1818 = vmatpush.bf16.msrb.mxu3 %v3651_v2 }
 0x46b   :  { %1777 = vmatpush.bf16.msrb.mxu0 %v3654_v11  ;;  %1791 = vmatpush.bf16.msrb.mxu1 %v3658_v13 }
 0x46c   :  { %1805 = vmatpush.bf16.msrb.mxu2 %v3660_v14  ;;  %1819 = vmatpush.bf16.msrb.mxu3 %v3663_v20  ;;  %v4322_v14 = vld [vmem:[#allocation31_spill] sm:$0xff] }
 0x46f   :  { %1778 = vmatpush.bf16.msrb.mxu0 %v3666_v28  ;;  %1792 = vmatpush.bf16.msrb.mxu1 %v3670_v30 }
 0x470   :  { %1806 = vmatpush.bf16.msrb.mxu2 %v3672_v31  ;;  %1820 = vmatpush.bf16.msrb.mxu3 %v3677_v39  ;;  %v4323_v31 = vld [vmem:[#allocation33_spill] sm:$0xff] }
 0x473   :  { %1779 = vmatpush.bf16.msrb.mxu0 %v3682_v49  ;;  %1793 = vmatpush.bf16.msrb.mxu1 %v3686_v51  ;;  %v4324_v49 = vld [vmem:[#allocation34_spill] sm:$0xff] }
 0x474   :  { %1807 = vmatpush.bf16.msrb.mxu2 %v3688_v52  ;;  %1821 = vmatpush.bf16.msrb.mxu3 %v3691_v7 }
 0x477   :  { %1780 = vmatpush.bf16.msrb.mxu0 %v3694_v25  ;;  %1794 = vmatpush.bf16.msrb.mxu1 %v3700_v44 }
 0x478   :  { %1808 = vmatpush.bf16.msrb.mxu2 %v3702_v45  ;;  %1822 = vmatpush.bf16.msrb.mxu3 %v3707_v58  ;;  %v4325_v58 = vld [vmem:[#allocation32_spill] sm:$0xff] }
 0x47b   :  { %1781 = vmatpush.bf16.msrb.mxu0 %v3712_v6  ;;  %1795 = vmatpush.bf16.msrb.mxu1 %v3718_v10 }
 0x47c   :  { %1809 = vmatpush.bf16.msrb.mxu2 %v3720_v15  ;;  %1823 = vmatpush.bf16.msrb.mxu3 %v3723_v23 }
 0x47f   :  { %1782 = vmatpush.bf16.msrb.mxu0 %v3726_v36  ;;  %1796 = vmatpush.bf16.msrb.mxu1 %v3730_v40 }
 0x480   :  { %1810 = vmatpush.bf16.msrb.mxu2 %v3732_v41  ;;  %1824 = vmatpush.bf16.msrb.mxu3 %v3735_v42 }
 0x4de   :  { %v1566_v29 = vpop.f32.mrf.mxu0  ;;  %v1580_v34 = vpop.f32.mrf.mxu1 }
 0x4df   :  { %v1613_v50 = vadd.f32 %v1566_v29, %v4320_v38  ;;  %v1614_v61 = vadd.f32 %v1580_v34, %v4321_v60  ;;  %v4329_v34 = vld [vmem:[#allocation38_spill] sm:$0xff] }
 0x4e1   :  { %v1621_v62 = vmul.f32 0.5, %v1613_v50  ;;  %v1629_v2 = vmul.f32 0.5, %v1614_v61 }
 0x4e3   :  { %3158 = vtanh.f32 %v1621_v62 }
 0x4e4   :  { %3160 = vtanh.f32 %v1629_v2  ;;  %v4330_v2 = vld [vmem:[#allocation39_spill] sm:$0xff] }
 0x4e5   :  { %v1594_v11 = vpop.f32.mrf.mxu2  ;;  %v1608_v13 = vpop.f32.mrf.mxu3 }
 0x4e6   :  { %v1615_v20 = vadd.f32 %v1594_v11, %v4322_v14  ;;  %v1568_v28 = vpop.f32.mrf.mxu0  ;;  %v1582_v30 = vpop.f32.mrf.mxu1  ;;  %v1616_v6 = vadd.f32 %v1608_v13, %v4325_v58 }
 0x4e7   :  { %v1617_v39 = vadd.f32 %v1568_v28, %v4323_v31  ;;  %v1618_v51 = vadd.f32 %v1582_v30, %v4324_v49  ;;  %v4332_v30 = vld [vmem:[#allocation42_spill] sm:$0xff] }
 0x4e8   :  { %3162 = vtanh.f32 %v1615_v20  ;;  %v1639_v42 = vmul.f32 0.5, %v1616_v6  ;;  %v4331_v20 = vld [vmem:[#allocation41_spill] sm:$0xff] }
 0x4e9   :  { %v3159_v52 = vpop.eup %3158  ;;  %v1622_v7 = vmul.f32 0.5, %v1617_v39  ;;  %v1630_v25 = vmul.f32 0.5, %v1618_v51 }
 0x4ea   :  { %v3161_v44 = vpop.eup %3160  ;;  %v1625_v45 = vmul.f32 0.5, %v3159_v52 }
 0x4eb   :  { %v1633_v10 = vmul.f32 0.5, %v3161_v44  ;;  %3164 = vtanh.f32 %v1622_v7 }
 0x4ec   :  { %3166 = vtanh.f32 %v1630_v25  ;;  %v1627_v15 = vadd.f32 0.5, %v1625_v45  ;;  %v4333_v25 = vld [vmem:[#allocation40_spill] sm:$0xff] }
 0x4ed   :  { %v1635_v23 = vadd.f32 0.5, %v1633_v10  ;;  %v1596_v36 = vpop.f32.mrf.mxu2  ;;  %v1610_v40 = vpop.f32.mrf.mxu3 }
 0x4ee   :  { %v3163_v41 = vpop.eup %3162  ;;  %v1619_v4 = vadd.f32 %v1596_v36, %v4326_v26  ;;  %v1620_v8 = vadd.f32 %v1610_v40, %v4327_v32  ;;  %v4334_v40 = vld [vmem:[#allocation43_spill] sm:$0xff] }
 0x4ef   :  { %v1647_v59 = vmul.f32 %v1635_v23, %v4120_v56  ;;  %v1649_v19 = vmul.f32 %v3163_v41, %v1627_v15 }
 0x4f0   :  { %3168 = vtanh.f32 %v1619_v4  ;;  %v1640_v48 = vmul.f32 0.5, %v1620_v8 }
 0x4f1   :  { %v3165_v24 = vpop.eup %3164  ;;  %3170 = vtanh.f32 %v1639_v42  ;;  %v1651_v57 = vadd.f32 %v1649_v19, %v1647_v59  ;;  %v4335_v42 = vld [vmem:[#allocation44_spill] sm:$0xff] }
 0x4f2   :  { %v3167_v16 = vpop.eup %3166  ;;  %v1626_v17 = vmul.f32 0.5, %v3165_v24  ;;  %3172 = vtanh.f32 %v1640_v48 }
 0x4f3   :  { %v1634_v37 = vmul.f32 0.5, %v3167_v16  ;;  %3174 = vtanh.f32 %v1651_v57 }
 0x4f4   :  { %v1628_v35 = vadd.f32 0.5, %v1626_v17 }
 0x4f5   :  { %v1636_v27 = vadd.f32 0.5, %v1634_v37 }
 0x4f6   :  { %v3169_v12 = vpop.eup %3168 }
 0x4f7   :  { %v1648_v1 = vmul.f32 %v1636_v27, %v4124_v43  ;;  %v1650_v63 = vmul.f32 %v3169_v12, %v1628_v35  ;;  %v3171_v21 = vpop.eup %3170 }
 0x4f8   :  { %v3173_v33 = vpop.eup %3172  ;;  %v1643_v55 = vmul.f32 0.5, %v3171_v21 }
 0x4f9   :  { %v1652_v46 = vadd.f32 %v1650_v63, %v1648_v1  ;;  %v1644_v56 = vmul.f32 0.5, %v3173_v33  ;;  %v3175_v47 = vpop.eup %3174 }
 0x4fa   :  { %v1645_v18 = vadd.f32 0.5, %v1643_v55 }
 0x4fb   :  { %3176 = vtanh.f32 %v1652_v46  ;;  %v1646_v53 = vadd.f32 0.5, %v1644_v56 }
 0x4fc   :  { %v1655_v54 = vmul.f32 %v3175_v47, %v1645_v18 }
 0x501   :  { %v3177_v5 = vpop.eup %3176 }
 0x502   :  { %v1656_v0 = vmul.f32 %v3177_v5, %v1646_v53 }
 0x504   :  { %v1665_v3 = vpack.c.bf16 %v1656_v0, %v1655_v54  ;;  %v3011_v0 = vld [vmem:[#allocation3 + $0x364] sm:$0xf0] }
 0x506   :  { %1674 = vmatmul.bf16.vlgmr.msra.gmra.mxu0 %v1665_v3  ;;  %1688 = vmatmul.bf16.vlgmr.msra.gmra.mxu1 %v1665_v3 }
 0x507   :  { %1702 = vmatmul.bf16.vlgmr.msra.gmra.mxu2 %v1665_v3  ;;  %1716 = vmatmul.bf16.vlgmr.msra.gmra.mxu3 %v1665_v3 }
 0x583   :  { %v1675_v43 = vpop.f32.mrf.mxu0  ;;  %v1689_v9 = vpop.f32.mrf.mxu1 }
 0x584   :  { %v1722_v29 = vadd.f32 %v1675_v43, %v4328_v22  ;;  %v1723_v38 = vadd.f32 %v1689_v9, %v4329_v34  ;;  %v2755_v43 = vld [vmem:[#allocation3 + $0x2c0] sm:$0xf]  ;;  %v3010_v9 = vld [vmem:[#allocation3 + $0x2f4] sm:$0xf0]  ;;  %v3009_v34 = vld [vmem:[#allocation3 + $0x284] sm:$0xf0] }
 0x585   :  { %v2756_v22 = vor.u32 %v3010_v9, %v2755_v43 }
 0x586   :  { %v1730_v50 = vmul.f32 0.5, %v1722_v29  ;;  %v1738_v60 = vmul.f32 0.5, %v1723_v38  ;;  %v2751_v29 = vld [vmem:[#allocation3 + $0x250] sm:$0xf] }
 0x587   :  { %v2752_v38 = vor.u32 %v3009_v34, %v2751_v29 }
 0x588   :  { %3178 = vtanh.f32 %v1730_v50  ;;  %v2747_v50 = vld [vmem:[#allocation3 + $0x1e0] sm:$0xf] }
 0x589   :  { %3180 = vtanh.f32 %v1738_v60  ;;  %v3008_v60 = vld [vmem:[#allocation3 + $0x214] sm:$0xf0] }
 0x58a   :  { %v1703_v61 = vpop.f32.mrf.mxu2  ;;  %v1717_v62 = vpop.f32.mrf.mxu3 }
 0x58b   :  { %v1724_v11 = vadd.f32 %v1703_v61, %v4330_v2  ;;  %v1677_v13 = vpop.f32.mrf.mxu0  ;;  %v1691_v14 = vpop.f32.mrf.mxu1  ;;  %v1725_v44 = vadd.f32 %v1717_v62, %v4333_v25  ;;  %v2748_v61 = vor.u32 %v3008_v60, %v2747_v50  ;;  %v2743_v62 = vld [vmem:[#allocation3 + $0x170] sm:$0xf]  ;;  %v3007_v2 = vld [vmem:[#allocation3 + $0x1a4] sm:$0xf0] }
 0x58c   :  { %v1726_v28 = vadd.f32 %v1677_v13, %v4331_v20  ;;  %v1727_v31 = vadd.f32 %v1691_v14, %v4332_v30  ;;  %v2739_v13 = vld [vmem:[#allocation3 + $0x100] sm:$0xf]  ;;  %v3006_v14 = vld [vmem:[#allocation3 + $0x134] sm:$0xf0]  ;;  %v3005_v30 = vld [vmem:[#allocation3 + $0xc4] sm:$0xf0] }
 0x58d   :  { %3182 = vtanh.f32 %v1724_v11  ;;  %v1748_v36 = vmul.f32 0.5, %v1725_v44  ;;  %v2744_v11 = vor.u32 %v3007_v2, %v2743_v62  ;;  %v2740_v20 = vor.u32 %v3006_v14, %v2739_v13  ;;  %v2731_v44 = vld [vmem:[#allocation3 + $0x20] sm:$0xf] }
 0x58e   :  { %v3179_v39 = vpop.eup %3178  ;;  %v1731_v49 = vmul.f32 0.5, %v1726_v28  ;;  %v1739_v51 = vmul.f32 0.5, %v1727_v31  ;;  %v2735_v28 = vld [vmem:[#allocation3 + $0x90] sm:$0xf] }
 0x58f   :  { %v3181_v52 = vpop.eup %3180  ;;  %v1734_v7 = vmul.f32 0.5, %v3179_v39  ;;  %v2736_v31 = vor.u32 %v3005_v30, %v2735_v28 }
 0x590   :  { %v1742_v45 = vmul.f32 0.5, %v3181_v52  ;;  %3184 = vtanh.f32 %v1731_v49 }
 0x591   :  { %3186 = vtanh.f32 %v1739_v51  ;;  %v1736_v58 = vadd.f32 0.5, %v1734_v7  ;;  %v4336_v51 = vld [vmem:[#allocation45_spill] sm:$0xff]  ;;  %v4337_v7 = vld [vmem:[#allocation46_spill] sm:$0xff] }
 0x592   :  { %v1744_v6 = vadd.f32 0.5, %v1742_v45  ;;  %v1705_v10 = vpop.f32.mrf.mxu2  ;;  %v1719_v15 = vpop.f32.mrf.mxu3  ;;  %v3004_v45 = vld [vmem:[#allocation3 + $0x54] sm:$0xf0] }
 0x593   :  { %v3183_v23 = vpop.eup %3182  ;;  %v1728_v41 = vadd.f32 %v1705_v10, %v4334_v40  ;;  %v1729_v26 = vadd.f32 %v1719_v15, %v4335_v42  ;;  %v2732_v10 = vor.u32 %v3004_v45, %v2731_v44  ;;  %v2788_v44 = vld [vmem:[#allocation3 + $0x254] sm:$0xf]  ;;  %v3018_v45 = vld [vmem:[#allocation3 + $0x288] sm:$0xf0] }
 0x594   :  { %v1756_v8 = vmul.f32 %v1744_v6, %v1651_v57  ;;  %v1758_v48 = vmul.f32 %v3183_v23, %v1736_v58 }
 0x595   :  { %3188 = vtanh.f32 %v1728_v41  ;;  %v1749_v4 = vmul.f32 0.5, %v1729_v26  ;;  %v4339_v26 = vld [vmem:[#allocation49_spill] sm:$0xff] }
 0x596   :  { %v3185_v32 = vpop.eup %3184  ;;  %3190 = vtanh.f32 %v1748_v36  ;;  %v4177_v17 = vadd.f32 %v1758_v48, %v1756_v8  ;;  %v4338_v36 = vld [vmem:[#allocation47_spill] sm:$0xff] }
 0x597   :  { %v3187_v24 = vpop.eup %3186  ;;  %v1735_v59 = vmul.f32 0.5, %v3185_v32  ;;  %3192 = vtanh.f32 %v1749_v4  ;;  %v4340_v32 = vld [vmem:[#allocation50_spill] sm:$0xff] }
 0x598   :  { %v1743_v19 = vmul.f32 0.5, %v3187_v24  ;;  %3194 = vtanh.f32 %v4177_v17 }
 0x599   :  { %v1737_v16 = vadd.f32 0.5, %v1735_v59 }
 0x59a   :  { %v1745_v37 = vadd.f32 0.5, %v1743_v19 }
 0x59b   :  { %v3189_v35 = vpop.eup %3188 }
 0x59c   :  { %v1757_v27 = vmul.f32 %v1745_v37, %v1652_v46  ;;  %v1759_v12 = vmul.f32 %v3189_v35, %v1737_v16  ;;  %v3191_v1 = vpop.eup %3190  ;;  %v2759_v46 = vld [vmem:[#allocation3 + $0x330] sm:$0xf] }
 0x59d   :  { %v3193_v63 = vpop.eup %3192  ;;  %v1752_v57 = vmul.f32 0.5, %v3191_v1  ;;  %v2760_v3 = vor.u32 %v3011_v0, %v2759_v46  ;;  %v4341_v37 = vld [vmem:[#allocation48_spill] sm:$0xff] }
 0x59e   :  { %v4180_v21 = vadd.f32 %v1759_v12, %v1757_v27  ;;  %v1753_v33 = vmul.f32 0.5, %v3193_v63  ;;  %v3195_v55 = vpop.eup %3194 }
 0x59f   :  { %v1754_v56 = vadd.f32 0.5, %v1752_v57  ;;  %1942 = vmatpush.bf16.msra.mxu0 %v2760_v3 }
 0x5a0   :  { %3196 = vtanh.f32 %v4180_v21  ;;  %v1755_v47 = vadd.f32 0.5, %v1753_v33 }
 0x5a1   :  { %v1764_v53 = vmul.f32 %v3195_v55, %v1754_v56  ;;  %v4342_v56 = vld [vmem:[#allocation51_spill] sm:$0xff] }
 0x5a3   :  { %1943 = vmatpush.bf16.msra.mxu0 %v2756_v22 }
 0x5a6   :  { %v3197_v18 = vpop.eup %3196 }
 0x5a7   :  { %v1765_v5 = vmul.f32 %v3197_v18, %v1755_v47  ;;  %1944 = vmatpush.bf16.msra.mxu0 %v2752_v38  ;;  %v4343_v18 = vld [vmem:[#allocation52_spill] sm:$0xff] }
 0x5a9   :  { %v1774_v54 = vpack.c.bf16 %v1765_v5, %v1764_v53 }
 0x5ab   :  { %1783 = vmatmul.bf16.vlgmr.msrb.gmra.mxu0 %v1774_v54  ;;  %1797 = vmatmul.bf16.vlgmr.msrb.gmra.mxu1 %v1774_v54 }
 0x5ac   :  { %1811 = vmatmul.bf16.vlgmr.msrb.gmra.mxu2 %v1774_v54  ;;  %1825 = vmatmul.bf16.vlgmr.msrb.gmra.mxu3 %v1774_v54 }
 0x5ad   :  { %1945 = vmatpush.bf16.msra.mxu0 %v2748_v61 }
 0x5b1   :  { %1946 = vmatpush.bf16.msra.mxu0 %v2744_v11 }
 0x5b5   :  { %1947 = vmatpush.bf16.msra.mxu0 %v2740_v20 }
 0x5b9   :  { %1948 = vmatpush.bf16.msra.mxu0 %v2736_v31 }
 0x5bd   :  { %1949 = vmatpush.bf16.msra.mxu0 %v2732_v10  ;;  %v3017_v10 = vld [vmem:[#allocation3 + $0x218] sm:$0xf0] }
 0x628   :  { %v1784_v39 = vpop.f32.mrf.mxu0  ;;  %v1798_v49 = vpop.f32.mrf.mxu1 }
 0x629   :  { %v1831_v52 = vadd.f32 %v1784_v39, %v4336_v51  ;;  %v1832_v25 = vadd.f32 %v1798_v49, %v4337_v7  ;;  %v3020_v49 = vld [vmem:[#allocation3 + $0x368] sm:$0xf0]  ;;  %v2792_v51 = vld [vmem:[#allocation3 + $0x2c4] sm:$0xf]  ;;  %v3019_v7 = vld [vmem:[#allocation3 + $0x2f8] sm:$0xf0] }
 0x62b   :  { %v1839_v58 = vmul.f32 0.5, %v1831_v52  ;;  %v1847_v6 = vmul.f32 0.5, %v1832_v25  ;;  %v2793_v25 = vor.u32 %v3019_v7, %v2792_v51  ;;  %v3023_v51 = vld [vmem:[#allocation3 + $0xcc] sm:$0xf0]  ;;  %v2805_v7 = vld [vmem:[#allocation3 + $0x28] sm:$0xf] }
 0x62d   :  { %3198 = vtanh.f32 %v1839_v58  ;;  %v2789_v58 = vor.u32 %v3018_v45, %v2788_v44  ;;  %v2866_v45 = vld [vmem:[#allocation3 + $0x33c] sm:$0xf] }
 0x62e   :  { %3200 = vtanh.f32 %v1847_v6  ;;  %v2784_v6 = vld [vmem:[#allocation3 + $0x1e4] sm:$0xf] }
 0x62f   :  { %v1812_v15 = vpop.f32.mrf.mxu2  ;;  %v1826_v23 = vpop.f32.mrf.mxu3 }
 0x630   :  { %v1833_v40 = vadd.f32 %v1812_v15, %v4338_v36  ;;  %v1786_v41 = vpop.f32.mrf.mxu0  ;;  %v1800_v42 = vpop.f32.mrf.mxu1  ;;  %v1834_v35 = vadd.f32 %v1826_v23, %v4341_v37  ;;  %v2785_v15 = vor.u32 %v3017_v10, %v2784_v6  ;;  %v2780_v23 = vld [vmem:[#allocation3 + $0x174] sm:$0xf]  ;;  %v3016_v36 = vld [vmem:[#allocation3 + $0x1a8] sm:$0xf0] }
 0x631   :  { %v1835_v4 = vadd.f32 %v1786_v41, %v4339_v26  ;;  %v1836_v8 = vadd.f32 %v1800_v42, %v4340_v32  ;;  %v1892_v42 = vld [vmem:[%s4248_s4] sm:$0xff]  ;;  %v1893_v26 = vld [vmem:[%s4248_s4 + $0x8] sm:$0xff]  ;;  %v2772_v37 = vld [vmem:[#allocation3 + $0x94] sm:$0xf] }
 0x632   :  { %3202 = vtanh.f32 %v1833_v40  ;;  %v1857_v55 = vmul.f32 0.5, %v1834_v35  ;;  %v2781_v40 = vor.u32 %v3016_v36, %v2780_v23  ;;  %v3014_v35 = vld [vmem:[#allocation3 + $0xc8] sm:$0xf0] }
 0x633   :  { %v3199_v48 = vpop.eup %3198  ;;  %v1840_v24 = vmul.f32 0.5, %v1835_v4  ;;  %v1848_v59 = vmul.f32 0.5, %v1836_v8  ;;  %v2862_v6 = vld [vmem:[#allocation3 + $0x2cc] sm:$0xf] }
 0x634   :  { %v3201_v19 = vpop.eup %3200  ;;  %v1843_v16 = vmul.f32 0.5, %v3199_v48 }
 0x635   :  { %v1851_v27 = vmul.f32 0.5, %v3201_v19  ;;  %3204 = vtanh.f32 %v1840_v24  ;;  %v3012_v24 = vld [vmem:[%s4247_s3] sm:$0xff]  ;;  %v3015_v19 = vld [vmem:[#allocation3 + $0x138] sm:$0xf0] }
 0x636   :  { %3206 = vtanh.f32 %v1848_v59  ;;  %v1845_v12 = vadd.f32 0.5, %v1843_v16  ;;  %v2776_v59 = vld [vmem:[#allocation3 + $0x104] sm:$0xf] }
 0x637   :  { %v1853_v1 = vadd.f32 0.5, %v1851_v27  ;;  %v1814_v63 = vpop.f32.mrf.mxu2  ;;  %v1828_v57 = vpop.f32.mrf.mxu3  ;;  %v2777_v16 = vor.u32 %v3015_v19, %v2776_v59  ;;  %v2773_v27 = vor.u32 %v3014_v35, %v2772_v37  ;;  %v2858_v37 = vld [vmem:[#allocation3 + $0x25c] sm:$0xf]  ;;  %v3035_v35 = vld [vmem:[#allocation3 + $0x290] sm:$0xf0] }
 0x638   :  { %v3203_v33 = vpop.eup %3202  ;;  %v1837_v47 = vadd.f32 %v1814_v63, %v4342_v56  ;;  %v1838_v53 = vadd.f32 %v1828_v57, %v4343_v18  ;;  %v2833_v18 = vld [vmem:[#allocation3 + $0x338] sm:$0xf] }
 0x639   :  { %v1865_v46 = vmul.f32 %v1853_v1, %v4177_v17  ;;  %v1867_v0 = vmul.f32 %v3203_v33, %v1845_v12  ;;  %v2768_v12 = vld [vmem:[#allocation3 + $0x24] sm:$0xf]  ;;  %v3013_v1 = vld [vmem:[#allocation3 + $0x58] sm:$0xf0] }
 0x63a   :  { %3208 = vtanh.f32 %v1837_v47  ;;  %v1858_v5 = vmul.f32 0.5, %v1838_v53  ;;  %v2769_v63 = vor.u32 %v3013_v1, %v2768_v12  ;;  %v3029_v53 = vld [vmem:[#allocation3 + $0x36c] sm:$0xf0]  ;;  %v2854_v12 = vld [vmem:[#allocation3 + $0x1ec] sm:$0xf] }
 0x63b   :  { %v3205_v54 = vpop.eup %3204  ;;  %3210 = vtanh.f32 %v1857_v55  ;;  %v1869_v29 = vadd.f32 %v1867_v0, %v1865_v46  ;;  %v3028_v46 = vld [vmem:[#allocation3 + $0x2fc] sm:$0xf0]  ;;  %v3034_v1 = vld [vmem:[#allocation3 + $0x220] sm:$0xf0] }
 0x63c   :  { %v3207_v3 = vpop.eup %3206  ;;  %v1844_v43 = vmul.f32 0.5, %v3205_v54  ;;  %3212 = vtanh.f32 %v1858_v5  ;;  %v2829_v5 = vld [vmem:[#allocation3 + $0x2c8] sm:$0xf]  ;;  %v2834_v54 = vor.u32 %v3029_v53, %v2833_v18  ;;  %v2842_v53 = vld [vmem:[#allocation3 + $0x9c] sm:$0xf] }
 0x63d   :  { %v1852_v9 = vmul.f32 0.5, %v3207_v3  ;;  %3214 = vtanh.f32 %v1869_v29  ;;  %v2830_v0 = vor.u32 %v3028_v46, %v2829_v5  ;;  %v2825_v3 = vld [vmem:[#allocation3 + $0x258] sm:$0xf]  ;;  %v3031_v5 = vld [vmem:[#allocation3 + $0xd0] sm:$0xf0] }
 0x63e   :  { %v1846_v22 = vadd.f32 0.5, %v1844_v43  ;;  %v3027_v43 = vld [vmem:[#allocation3 + $0x28c] sm:$0xf0]  ;;  %v2838_v46 = vld [vmem:[#allocation3 + $0x2c] sm:$0xf] }
 0x63f   :  { %v1854_v34 = vadd.f32 0.5, %v1852_v9  ;;  %v2826_v9 = vor.u32 %v3027_v43, %v2825_v3  ;;  %v2199_v43 = vld [vmem:[%s4245_s1] sm:$0xf] }
 0x640   :  { %v3209_v38 = vpop.eup %3208 }
 0x641   :  { %v1866_v50 = vmul.f32 %v1854_v34, %v4180_v21  ;;  %v1868_v60 = vmul.f32 %v3209_v38, %v1846_v22  ;;  %v3211_v61 = vpop.eup %3210  ;;  %v2796_v21 = vld [vmem:[#allocation3 + $0x334] sm:$0xf] }
 0x642   :  { %v3213_v62 = vpop.eup %3212  ;;  %v1861_v11 = vmul.f32 0.5, %v3211_v61  ;;  %v2797_v52 = vor.u32 %v3020_v49, %v2796_v21  ;;  %v2809_v49 = vld [vmem:[#allocation3 + $0x98] sm:$0xf] }
 0x643   :  { %v1870_v2 = vadd.f32 %v1868_v60, %v1866_v50  ;;  %v1862_v17 = vmul.f32 0.5, %v3213_v62  ;;  %v3215_v13 = vpop.eup %3214  ;;  %v3021_v62 = vld [vmem:[%s4247_s3 + $0x8] sm:$0xff] }
 0x644   :  { %v1863_v14 = vadd.f32 0.5, %v1861_v11  ;;  %2049 = vmatpush.bf16.msra.mxu2 %v2797_v52  ;;  %v3026_v11 = vld [vmem:[#allocation3 + $0x21c] sm:$0xf0]  ;;  %v2810_v52 = vor.u32 %v3023_v51, %v2809_v49 }
 0x645   :  { %3216 = vtanh.f32 %v1870_v2  ;;  %v1864_v20 = vadd.f32 0.5, %v1862_v17  ;;  %v2821_v2 = vld [vmem:[#allocation3 + $0x1e8] sm:$0xf] }
 0x646   :  { %v4193_v30 = vmul.f32 %v3215_v13, %v1863_v14  ;;  %v2822_v17 = vor.u32 %v3026_v11, %v2821_v2  ;;  %v2817_v13 = vld [vmem:[#allocation3 + $0x178] sm:$0xf]  ;;  %v3025_v14 = vld [vmem:[#allocation3 + $0x1ac] sm:$0xf0]  ;;  %v2886_v2 = vld [vmem:[#allocation3 + $0x1f4] sm:$0xf] }
 0x647   :  { %v3050_v11 = vld [vmem:[#allocation3 + $0x228] sm:$0xf0] }
 0x648   :  { %2050 = vmatpush.bf16.msra.mxu2 %v2793_v25  ;;  %v3022_v25 = vld [vmem:[#allocation3 + $0x5c] sm:$0xf0] }
 0x649   :  { %v2806_v44 = vor.u32 %v3022_v25, %v2805_v7  ;;  %v2930_v25 = vld [vmem:[#allocation3 + $0x340] sm:$0xf] }
 0x64b   :  { %v3217_v28 = vpop.eup %3216 }
 0x64c   :  { %v4195_v31 = vmul.f32 %v3217_v28, %v1864_v20  ;;  %2051 = vmatpush.bf16.msra.mxu2 %v2789_v58  ;;  %v2818_v20 = vor.u32 %v3025_v14, %v2817_v13  ;;  %v2813_v28 = vld [vmem:[#allocation3 + $0x108] sm:$0xf]  ;;  %v3037_v58 = vld [vmem:[#allocation3 + $0x370] sm:$0xf0]  ;;  %v2882_v13 = vld [vmem:[#allocation3 + $0x184] sm:$0xf] }
 0x64d   :  { %v2867_v10 = vor.u32 %v3037_v58, %v2866_v45  ;;  %v3049_v14 = vld [vmem:[#allocation3 + $0x1b8] sm:$0xf0] }
 0x64e   :  { %v1875_v39 = vpack.c.bf16 %v4195_v31, %v4193_v30 }
 0x64f   :  { %2265 = vmatpush.bf16.msrb.mxu0 %v2867_v10 }
 0x650   :  { %1950 = vmatmul.bf16.vlgmr.msra.gmra.mxu0 %v1875_v39  ;;  %2052 = vmatpush.bf16.msra.mxu2 %v2785_v15  ;;  %v3024_v39 = vld [vmem:[#allocation3 + $0x13c] sm:$0xf0]  ;;  %v3036_v15 = vld [vmem:[#allocation3 + $0x300] sm:$0xf0] }
 0x651   :  { %v2814_v21 = vor.u32 %v3024_v39, %v2813_v28  ;;  %v2863_v23 = vor.u32 %v3036_v15, %v2862_v6  ;;  %v2883_v28 = vor.u32 %v3049_v14, %v2882_v13  ;;  %v2878_v39 = vld [vmem:[#allocation3 + $0x114] sm:$0xf]  ;;  %v2926_v15 = vld [vmem:[#allocation3 + $0x2d0] sm:$0xf] }
 0x653   :  { %2266 = vmatpush.bf16.msrb.mxu0 %v2863_v23  ;;  %v3044_v23 = vld [vmem:[#allocation3 + $0x304] sm:$0xf0] }
 0x654   :  { %2053 = vmatpush.bf16.msra.mxu2 %v2781_v40  ;;  %v2070_v40 = vld [vmem:[%s4248_s4 + $0x10] sm:$0xff] }
 0x658   :  { %2054 = vmatpush.bf16.msra.mxu2 %v2777_v16 }
 0x65c   :  { %2055 = vmatpush.bf16.msra.mxu2 %v2773_v27  ;;  %v2859_v27 = vor.u32 %v3035_v35, %v2858_v37  ;;  %v3047_v37 = vld [vmem:[#allocation3 + $0xd8] sm:$0xf0]  ;;  %v2906_v35 = vld [vmem:[#allocation3 + $0xa0] sm:$0xf] }
 0x65e   :  { %2267 = vmatpush.bf16.msrb.mxu0 %v2859_v27 }
 0x660   :  { %2056 = vmatpush.bf16.msra.mxu2 %v2769_v63  ;;  %v2855_v63 = vor.u32 %v3034_v1, %v2854_v12  ;;  %v3039_v12 = vld [vmem:[#allocation3 + $0xd4] sm:$0xf0] }
 0x661   :  { %v2907_v1 = vor.u32 %v3039_v12, %v2906_v35 }
 0x662   :  { %2268 = vmatpush.bf16.msrb.mxu0 %v2855_v63  ;;  %v2216_v63 = vld [vmem:[%s4248_s4 + $0x20] sm:$0xff] }
 0x6cd   :  { %v1951_v41 = vpop.f32.mrf.mxu0 }
 0x6ce   :  { %v4205_v32 = vadd.f32 %v1951_v41, %v1892_v42  ;;  %v2071_v42 = vld [vmem:[%s4248_s4 + $0x18] sm:$0xff] }
 0x6d5   :  { %v1953_v4 = vpop.f32.mrf.mxu0 }
 0x6d6   :  { %v4207_v8 = vadd.f32 %v1953_v4, %v1893_v26 }
 0x6d8   :  { %v1956_v48 = vpack.c.bf16 %v4207_v8, %v4205_v32 }
 0x6da   :  { %1975 = vmatpush.bf16.msra.mxu1 %v1956_v48 }
 0x6dd   :  { %2765 = vmatmul.msk.bf16.vlgmr.msra.gmra.mxu1 %vm1964_vm0, %v3012_v24 }
 0x6de   :  { %2163 = vmatpush.bf16.msrb.mxu1 %v2834_v54  ;;  %v2843_v54 = vor.u32 %v3031_v5, %v2842_v53 }
 0x6e2   :  { %2164 = vmatpush.bf16.msrb.mxu1 %v2830_v0  ;;  %v3030_v0 = vld [vmem:[#allocation3 + $0x60] sm:$0xf0] }
 0x6e3   :  { %v2839_v3 = vor.u32 %v3030_v0, %v2838_v46  ;;  %v3038_v46 = vld [vmem:[#allocation3 + $0x64] sm:$0xf0] }
 0x6e6   :  { %2165 = vmatpush.bf16.msrb.mxu1 %v2826_v9  ;;  %v2898_v9 = vld [vmem:[#allocation3 + $0x344] sm:$0xf] }
 0x6ea   :  { %2166 = vmatpush.bf16.msrb.mxu1 %v2822_v17  ;;  %v2887_v17 = vor.u32 %v3050_v11, %v2886_v2 }
 0x6ee   :  { %2167 = vmatpush.bf16.msrb.mxu1 %v2818_v20 }
 0x6f2   :  { %2168 = vmatpush.bf16.msrb.mxu1 %v2814_v21  ;;  %v3048_v21 = vld [vmem:[#allocation3 + $0x148] sm:$0xf0] }
 0x6f3   :  { %v2879_v49 = vor.u32 %v3048_v21, %v2878_v39 }
 0x6f6   :  { %2169 = vmatpush.bf16.msrb.mxu1 %v2810_v52 }
 0x6fa   :  { %2170 = vmatpush.bf16.msrb.mxu1 %v2806_v44  ;;  %v3045_v44 = vld [vmem:[#allocation3 + $0x374] sm:$0xf0] }
 0x6fb   :  { %v2931_v6 = vor.u32 %v3045_v44, %v2930_v25 }
 0x75a   :  { %v1977_v57 = vpop.f32.mrf.mxu1 }
 0x75b   :  { %v1982_v55 = vmul.f32 %v1977_v57, %v4205_v32  ;;  %v2850_v57 = vld [vmem:[#allocation3 + $0x17c] sm:$0xf] }
 0x762   :  { %v1979_v33 = vpop.f32.mrf.mxu1 }
 0x763   :  { %v1983_v56 = vmul.f32 %v1979_v33, %v4207_v8  ;;  %v3033_v33 = vld [vmem:[#allocation3 + $0x1b0] sm:$0xf0] }
 0x765   :  { %v1984_v47 = vpack.c.bf16 %v1983_v56, %v1982_v55  ;;  %v2851_v55 = vor.u32 %v3033_v33, %v2850_v57  ;;  %v2846_v56 = vld [vmem:[#allocation3 + $0x10c] sm:$0xf] }
 0x767   :  { %2057 = vmatmul.bf16.vlgmr.msra.gmra.mxu2 %v1984_v47  ;;  %2269 = vmatpush.bf16.msrb.mxu0 %v2851_v55  ;;  %v3032_v47 = vld [vmem:[#allocation3 + $0x140] sm:$0xf0]  ;;  %v2870_v55 = vld [vmem:[#allocation3 + $0x34] sm:$0xf] }
 0x768   :  { %v2847_v18 = vor.u32 %v3032_v47, %v2846_v56  ;;  %v3046_v56 = vld [vmem:[#allocation3 + $0x68] sm:$0xf0] }
 0x769   :  { %v2871_v47 = vor.u32 %v3046_v56, %v2870_v55 }
 0x76b   :  { %2270 = vmatpush.bf16.msrb.mxu0 %v2847_v18 }
 0x76f   :  { %2271 = vmatpush.bf16.msrb.mxu0 %v2843_v54  ;;  %v2902_v54 = vld [vmem:[#allocation3 + $0x30] sm:$0xf] }
 0x770   :  { %v2903_v0 = vor.u32 %v3038_v46, %v2902_v54 }
 0x773   :  { %2272 = vmatpush.bf16.msrb.mxu0 %v2839_v3 }
 0x776   :  { %2273 = vmatmul.bf16.vlgmr.msrb.gmra.mxu0 %v2199_v43 }
 0x7ea   :  { %v2058_v22 = vpop.f32.mrf.mxu2 }
 0x7eb   :  { %v2063_v29 = vmul.f32 1.442695, %v2058_v22  ;;  %v3053_v22 = vld [vmem:[#allocation3 + $0x378] sm:$0xf0] }
 0x7ed   :  { %3218 = vpow2.f32 %v2063_v29  ;;  %v2899_v29 = vor.u32 %v3053_v22, %v2898_v9 }
 0x7ef   :  { %2361 = vmatpush.bf16.msrb.mxu2 %v2899_v29 }
 0x7f2   :  { %v2060_v34 = vpop.f32.mrf.mxu2 }
 0x7f3   :  { %v2065_v38 = vmul.f32 1.442695, %v2060_v34  ;;  %v3219_v50 = vpop.eup %3218  ;;  %v2894_v34 = vld [vmem:[#allocation3 + $0x2d4] sm:$0xf]  ;;  %v2274_v57 = vpop.f32.mrf.mxu0 }
 0x7f4   :  { %v2275_v33 = vadd.f32 %v2274_v57, %v2216_v63 }
 0x7f5   :  { %3220 = vpow2.f32 %v2065_v38  ;;  %v3052_v38 = vld [vmem:[#allocation3 + $0x308] sm:$0xf0] }
 0x7f6   :  { %v2278_v18 = vmax.f32 %v2275_v33, 0.0 }
 0x7f8   :  { %v2296_v53 = vpack.c.bf16 %v2278_v18, %v2278_v18 }
 0x7fb   :  { %v3221_v60 = vpop.eup %3220  ;;  %v2276_v5 = vpop.f32.mrf.mxu0 }
 0x7fc   :  { %v2069_v61 = vpack.c.bf16 %v3221_v60, %v3219_v50 }
 0x7fe   :  { %2087 = vmatpush.bf16.msra.mxu3 %v2069_v61  ;;  %v3051_v61 = vld [vmem:[#allocation3 + $0x298] sm:$0xf0] }
 0x801   :  { %2802 = vmatmul.msk.bf16.vlgmr.msra.gmra.mxu3 %vm1964_vm0, %v3021_v62 }
 0x884   :  { %v2089_v36 = vpop.f32.mrf.mxu3 }
 0x885   :  { %v2090_v41 = vadd.f32 %v2089_v36, %v2070_v40  ;;  %v2181_v36 = vld [vmem:[%s4247_s3 + $0x10] sm:$0xf]  ;;  %v2922_v40 = vld [vmem:[#allocation3 + $0x260] sm:$0xf] }
 0x887   :  { %3222 = vrcp.f32 %v2090_v41 }
 0x88c   :  { %v2091_v26 = vpop.f32.mrf.mxu3 }
 0x88d   :  { %v2092_v4 = vadd.f32 %v2091_v26, %v2071_v42  ;;  %v3223_v48 = vpop.eup %3222  ;;  %v3042_v42 = vld [vmem:[#allocation3 + $0x224] sm:$0xf0]  ;;  %v2914_v26 = vld [vmem:[#allocation3 + $0x180] sm:$0xf] }
 0x88e   :  { %v2096_v59 = vmul.f32 %v3223_v48, %v3219_v50  ;;  %v2895_v50 = vor.u32 %v3052_v38, %v2894_v34 }
 0x88f   :  { %3224 = vrcp.f32 %v2092_v4  ;;  %v3041_v4 = vld [vmem:[#allocation3 + $0x1b4] sm:$0xf0] }
 0x890   :  { %2362 = vmatpush.bf16.msrb.mxu2 %v2895_v50  ;;  %v2915_v48 = vor.u32 %v3041_v4, %v2914_v26 }
 0x895   :  { %v3225_v24 = vpop.eup %3224 }
 0x896   :  { %v2097_v19 = vmul.f32 %v3225_v24, %v3221_v60  ;;  %v2890_v60 = vld [vmem:[#allocation3 + $0x264] sm:$0xf]  ;;  %v2910_v24 = vld [vmem:[#allocation3 + $0x110] sm:$0xf] }
 0x897   :  { %v2891_v62 = vor.u32 %v3051_v61, %v2890_v60 }
 0x898   :  { %v2098_v16 = vpack.c.bf16 %v2097_v19, %v2096_v59  ;;  %v3040_v59 = vld [vmem:[#allocation3 + $0x144] sm:$0xf0] }
 0x899   :  { %2363 = vmatpush.bf16.msrb.mxu2 %v2891_v62  ;;  %v2911_v19 = vor.u32 %v3040_v59, %v2910_v24 }
 0x89a   :  { %2171 = vmatmul.bf16.vlgmr.msrb.gmra.mxu1 %v2098_v16  ;;  %v2874_v16 = vld [vmem:[#allocation3 + $0xa4] sm:$0xf] }
 0x89b   :  { %v2875_v27 = vor.u32 %v3047_v37, %v2874_v16 }
 0x89d   :  { %2364 = vmatpush.bf16.msrb.mxu2 %v2887_v17 }
 0x8a1   :  { %2365 = vmatpush.bf16.msrb.mxu2 %v2883_v28 }
 0x8a5   :  { %2366 = vmatpush.bf16.msrb.mxu2 %v2879_v49 }
 0x8a9   :  { %2367 = vmatpush.bf16.msrb.mxu2 %v2875_v27 }
 0x8ad   :  { %2368 = vmatpush.bf16.msrb.mxu2 %v2871_v47 }
 0x8b0   :  { %2369 = vmatmul.bf16.vlgmr.msrb.gmra.mxu2 %v2296_v53 }
 0x917   :  { %v2172_v20 = vpop.f32.mrf.mxu1 }
 0x918   :  { %v2177_v51 = vmul.f32 %v2172_v20, %v4205_v32  ;;  %v2927_v32 = vor.u32 %v3044_v23, %v2926_v15 }
 0x91a   :  { %v2179_v45 = vadd.f32 %v2177_v51, %v4193_v30  ;;  %v2918_v30 = vld [vmem:[#allocation3 + $0x1f0] sm:$0xf] }
 0x91f   :  { %v2174_v52 = vpop.f32.mrf.mxu1 }
 0x920   :  { %v2178_v7 = vmul.f32 %v2174_v52, %v4207_v8  ;;  %v3043_v8 = vld [vmem:[#allocation3 + $0x294] sm:$0xf0] }
 0x921   :  { %v2923_v41 = vor.u32 %v3043_v8, %v2922_v40 }
 0x922   :  { %v2180_v58 = vadd.f32 %v2178_v7, %v4195_v31  ;;  %v2919_v31 = vor.u32 %v3042_v42, %v2918_v30 }
 0x924   :  { %v2182_v10 = vpack.c.bf16 %v2180_v58, %v2179_v45 }
 0x926   :  { %2193 = vmatpush.bf16.msrb.mxu3 %v2182_v10 }
 0x929   :  { %2835 = vmatmul.msk.bf16.vlgmr.msrb.gmra.mxu3 %vm1964_vm0, %v2181_v36 }
 0x92a   :  { %2422 = vmatpush.bf16.msra.mxu3 %v2931_v6 }
 0x92e   :  { %2423 = vmatpush.bf16.msra.mxu3 %v2927_v32 }
 0x932   :  { %2424 = vmatpush.bf16.msra.mxu3 %v2923_v41 }
 0x933   :  { %v2370_v22 = vpop.f32.mrf.mxu2 }
 0x936   :  { %2425 = vmatpush.bf16.msra.mxu3 %v2919_v31 }
 0x93a   :  { %2426 = vmatpush.bf16.msra.mxu3 %v2915_v48 }
 0x93b   :  { %v2372_v29 = vpop.f32.mrf.mxu2 }
 0x93e   :  { %2427 = vmatpush.bf16.msra.mxu3 %v2911_v19 }
 0x942   :  { %2428 = vmatpush.bf16.msra.mxu3 %v2907_v1 }
 0x946   :  { %2429 = vmatpush.bf16.msra.mxu3 %v2903_v0 }
 0x9ac   :  { %v2195_v3 = vpop.f32.mrf.mxu3 }
 0x9ad   :  { %v2279_v43 = vpack.c.bf16 %v2195_v3, %v2195_v3 }
 0x9af   :  { %2430 = vmatmul.bf16.vlgmr.msra.gmra.mxu3 %v2279_v43 }
 0x9b4   :  { %v2197_v9 = vpop.f32.mrf.mxu3 }
 0xa32   :  { %v2431_v34 = vpop.f32.mrf.mxu3 }
 0xa33   :  { %v2432_v38 = vadd.f32 %v2431_v34, %v2370_v22 }
 0xa35   :  { %2435 = vst [vmem:[%s4249_s5] sm:$0xff] %v2432_v38 }
 0xa3a   :  { %v2433_v50 = vpop.f32.mrf.mxu3 }
 0xa3b   :  { %2440 = vsyncpa [#allocation4], 1 }

</bundles_post_ra>
